<compile_context>
chip_gen: v5e
topology: v5e:2x2
jax: 0.10.0
libtpu: 0.0.40
codegen_flags: <defaults>
</compile_context>

<pallas_src>
import functools

import jax
import jax.numpy as jnp
from jax.experimental import pallas as pl
from jax.experimental.pallas import tpu as pltpu


def _round_up(v, m):
    return (v + m - 1) // m * m


def _delayed_linear_kernel(h_true, x_ref, wgi_ref, bgi_ref, wgb_ref, bgb_ref,
                           w1_ref, b1_ref, gamma_ref, beta_ref,
                           o_ref, buf_ref, dl_ref):
    """One (batch tile x time chunk). Time axis innermost; buf_ref carries."""
    tc = pl.program_id(1)

    # Re-initialize the recurrent buffer at the start of every batch tile.
    @pl.when(tc == 0)
    def _():
        buf_ref[...] = jnp.zeros_like(buf_ref)

    TT, BT, Ip = x_ref.shape
    Hp = o_ref.shape[-1]
    N = TT * BT
    f32 = jnp.float32
    gdt = x_ref.dtype                      # MXU operand dtype (bf16 or f32)

    # ---------------- Phase 1 (hoisted): input delay gate, one GEMM ---------
    x_flat = x_ref[...].reshape(N, Ip)
    xf = x_flat.astype(f32)
    dg = jax.nn.sigmoid(
        jnp.dot(x_flat, wgi_ref[...], preferred_element_type=f32)
        + bgi_ref[...])
    # Store only the delayed contribution; the immediate one is recomputed in
    # phase 2 as (x_t - delayed_t), so a second (TT,BT,I) scratch is not needed.
    dl_ref[...] = ((1.0 - dg) * xf).reshape(TT, BT, Ip)

    # ---------------- Phase 2: the truly sequential recurrence --------------
    # TODO(synk): on v5e/v6e, wgb could be held in MXU staging registers via
    # pltpu.matmul_push_rhs/matmul_acc_lhs/matmul_pop to avoid re-pushing the
    # RHS every step; skipped here to keep the kernel portable.
    wgb = wgb_ref[...]                     # loop invariants, loaded once
    bgb = bgb_ref[...]
    unroll = min(TT, 8)
    half = BT // 2
    two_streams = (BT >= 16) and (half % 8 == 0)

    if two_streams:
        # Two independent batch sub-streams per step: while one is in the
        # EUP/VPU (sigmoid / elementwise), the other keeps the MXU busy.
        def step(t, carry):
            b0, b1 = carry
            d = dl_ref[t]                                  # (BT, Ip) f32
            x_t = x_ref[t].astype(f32)
            nb0 = b0 + d[:half]
            nb1 = b1 + d[half:]
            g0 = jax.nn.sigmoid(
                jnp.dot(nb0.astype(gdt), wgb, preferred_element_type=f32) + bgb)
            g1 = jax.nn.sigmoid(
                jnp.dot(nb1.astype(gdt), wgb, preferred_element_type=f32) + bgb)
            release = jnp.concatenate([nb0 * g0, nb1 * g1], axis=0)
            dl_ref[t] = (x_t - d) + release                # immediate + release
            return nb0 * (1.0 - g0), nb1 * (1.0 - g1)

        b0, b1 = jax.lax.fori_loop(
            0, TT, step, (buf_ref[:half], buf_ref[half:]), unroll=unroll)
        buf_ref[:half] = b0
        buf_ref[half:] = b1
    else:
        def step(t, buf):
            d = dl_ref[t]
            x_t = x_ref[t].astype(f32)
            b = buf + d
            g = jax.nn.sigmoid(
                jnp.dot(b.astype(gdt), wgb, preferred_element_type=f32) + bgb)
            dl_ref[t] = (x_t - d) + b * g                  # immediate + release
            return b * (1.0 - g)

        buf_ref[...] = jax.lax.fori_loop(0, TT, step, buf_ref[...],
                                         unroll=unroll)

    # ---------------- Phase 3 (hoisted): Linear -> ReLU -> LayerNorm --------
    combined = dl_ref[...].reshape(N, Ip)
    h = jnp.dot(combined.astype(gdt), w1_ref[...], preferred_element_type=f32)
    h = jnp.maximum(h + b1_ref[...], 0.0)
    # LayerNorm over the true H lanes only (padded h columns are exactly 0).
    mean = jnp.sum(h, axis=-1, keepdims=True) * (1.0 / h_true)
    diff = h - mean
    sq = jnp.square(diff)
    if Hp != h_true:
        lane_ok = (jax.lax.broadcasted_iota(jnp.int32, (1, Hp), 1)
                   < h_true).astype(f32)
        sq = sq * lane_ok
    var = jnp.sum(sq, axis=-1, keepdims=True) * (1.0 / h_true)
    y = diff * jax.lax.rsqrt(var + 1e-5)
    y = y * gamma_ref[...] + beta_ref[...]
    o_ref[...] = y.reshape(TT, BT, Hp).astype(o_ref.dtype)


def _vmem_capacity_bytes():
    try:
        return int(pltpu.get_tpu_info().vmem_capacity_bytes)
    except Exception:
        return 64 * 1024 * 1024            # conservative (v7x-sized) fallback


def _device_kind():
    try:
        return jax.devices()[0].device_kind.lower()
    except Exception:
        return ""


def _estimate_vmem(tt, bt, ip, hp, gemm_bytes, single_buffered_weights):
    x_blk = 2 * tt * bt * ip * gemm_bytes          # double-buffered input
    o_blk = 2 * tt * bt * hp * 4                   # double-buffered output
    scratch = (tt * bt * ip + bt * ip) * 4         # dl + buf
    wmul = 1 if single_buffered_weights else 2
    weights = wmul * ((2 * ip * ip + ip * hp) * gemm_bytes
                      + (2 * ip + 3 * hp) * 4)
    return x_blk + o_blk + scratch + weights


def delayed_linear(x, params, *, block_b=None, block_t=None,
                   gemm_dtype=jnp.bfloat16):
    """DelayedLinear forward.  x: (B, T, I) f32 -> (B, T, H) f32.

    Weights are stored transposed (in_features, out_features) so the kernel
    computes x @ W.  GEMM operands go to the MXU in `gemm_dtype` (bf16 by
    default) with f32 accumulation; the recurrent buffer, biases, elementwise
    math and LayerNorm stay in f32.
    """
    B, T, I = x.shape
    H = params["w1"].shape[1]
    f32 = jnp.float32
    gemm_bytes = jnp.dtype(gemm_dtype).itemsize

    # Lane-dense tiles: pad I and H to multiples of 128 (no-op at real sizes).
    Ip = _round_up(I, 128)
    Hp = _round_up(H, 128)

    # Batch tile: sublane-aligned, >=16 so the serial loop can run two
    # independent sub-streams, capped at the MXU M extent.
    if block_b is None:
        block_b = min(256, _round_up(max(B, 16), 8))
    block_b = _round_up(block_b, 8)
    B_pad = _round_up(B, block_b)
    nb = B_pad // block_b

    # Per-chip VMEM budget (v7x: 64 MiB physical -> ~51 MiB; v5e/v6e: 100 MiB).
    vmem_limit = max(min(int(0.80 * _vmem_capacity_bytes()), 100 * 1024 * 1024),
                     32 * 1024 * 1024)
    budget = int(0.90 * vmem_limit)

    # Time chunk: largest divisor of T that fits the budget, preferring nt>=2
    # so the next chunk's x DMA overlaps the serial fori_loop.
    if block_t is None:
        divisors = [d for d in range(1, T + 1) if T % d == 0]
        fits = [d for d in divisors
                if _estimate_vmem(d, block_b, Ip, Hp, gemm_bytes, True) <= budget]
        if not fits:
            fits = [1]
        pipelined = [d for d in fits if T // d >= 2]
        block_t = max(pipelined) if pipelined else max(fits)
    TT = block_t
    assert T % TT == 0, "time chunk must divide T"
    nt = T // TT

    # TODO(synk): if this layer is called repeatedly, keep activations
    # time-major and pre-pad/cast params upstream so this relayout and the
    # per-call weight padding are not paid every call.
    x_tm = jnp.transpose(x, (1, 0, 2))                         # (T, B, I)
    x_tm = jnp.pad(x_tm, ((0, 0), (0, B_pad - B), (0, Ip - I)))
    x_tm = x_tm.astype(gemm_dtype)

    def pad2(a, r, c):
        return jnp.pad(a, ((0, r - a.shape[0]), (0, c - a.shape[1])))

    wgi = pad2(params["wgi"], Ip, Ip).astype(gemm_dtype)
    wgb = pad2(params["wgb"], Ip, Ip).astype(gemm_dtype)
    w1 = pad2(params["w1"], Ip, Hp).astype(gemm_dtype)
    bgi = pad2(params["bgi"], 1, Ip).astype(f32)
    bgb = pad2(params["bgb"], 1, Ip).astype(f32)
    b1 = pad2(params["b1"], 1, Hp).astype(f32)
    gamma = pad2(params["gamma"], 1, Hp).astype(f32)
    beta = pad2(params["beta"], 1, Hp).astype(f32)

    Np = T * B_pad
    flops = 2 * Np * Ip * (2 * Ip + Hp)
    transcendentals = Np * (2 * Ip + 1)
    bytes_accessed = (Np * Ip * gemm_bytes + Np * Hp * 4
                      + (2 * Ip * Ip + Ip * Hp) * gemm_bytes
                      + (2 * Ip + 3 * Hp) * 4)

    # Engage both TensorCores on v7x when there are >=2 independent batch tiles.
    if nb >= 2 and "v7" in _device_kind():
        dim_sem = (pltpu.CORE_PARALLEL, pltpu.ARBITRARY)
    else:
        dim_sem = ("parallel", "arbitrary")

    kernel = functools.partial(_delayed_linear_kernel, H)
    operands = (x_tm, wgi, bgi, wgb, bgb, w1, b1, gamma, beta)

    def run(single_buffer_invariants):
        inv_kwargs = ({"pipeline_mode": pl.Buffered(1)}
                      if single_buffer_invariants else {})

        def inv(shape):
            return pl.BlockSpec(shape, lambda b, t: (0,) * len(shape),
                                **inv_kwargs)

        return pl.pallas_call(
            kernel,
            out_shape=jax.ShapeDtypeStruct((T, B_pad, Hp), f32),
            grid_spec=pltpu.PrefetchScalarGridSpec(
                num_scalar_prefetch=0,
                grid=(nb, nt),                  # batch tiles ||, time serial
                in_specs=[
                    pl.BlockSpec((TT, block_b, Ip), lambda b, t: (t, b, 0)),
                    inv((Ip, Ip)),              # W_gate_input^T   (gemm dtype)
                    inv((1, Ip)),               # b_gate_input     (f32)
                    inv((Ip, Ip)),              # W_gate_buffer^T  (gemm dtype)
                    inv((1, Ip)),               # b_gate_buffer    (f32)
                    inv((Ip, Hp)),              # W_linear^T       (gemm dtype)
                    inv((1, Hp)),               # b_linear         (f32)
                    inv((1, Hp)),               # LN gamma         (f32)
                    inv((1, Hp)),               # LN beta          (f32)
                ],
                out_specs=pl.BlockSpec((TT, block_b, Hp),
                                       lambda b, t: (t, b, 0)),
                scratch_shapes=[
                    pltpu.VMEM((block_b, Ip), f32),      # recurrent buffer
                    pltpu.VMEM((TT, block_b, Ip), f32),  # delayed -> combined
                ],
            ),
            compiler_params=pltpu.CompilerParams(
                dimension_semantics=dim_sem,
                vmem_limit_bytes=int(vmem_limit),
            ),
            cost_estimate=pl.CostEstimate(
                flops=int(flops),
                transcendentals=int(transcendentals),
                bytes_accessed=int(bytes_accessed)),
        )(*operands)

    try:
        out_tm = run(True)
    except Exception:
        # Older Pallas without BlockSpec.pipeline_mode: fall back to default
        # double-buffering of the loop-invariant weights.
        out_tm = run(False)

    # Drop batch/H padding, back to the PyTorch (B, T, H) convention.
    return jnp.transpose(out_tm[:, :B, :H], (1, 0, 2))


def _reference(x, params, gemm_dtype=jnp.bfloat16):
    """Pure-JAX reference mirroring the PyTorch loop.  It applies the same
    bf16 rounding to the MXU operands that the kernel uses, so the comparison
    isolates kernel logic from the (deliberate) bf16 GEMM precision trade."""
    f32 = jnp.float32
    B, T, I = x.shape
    xq = x.astype(gemm_dtype).astype(f32)
    wgi = params["wgi"].astype(gemm_dtype)
    wgb = params["wgb"].astype(gemm_dtype)
    w1 = params["w1"].astype(gemm_dtype)
    bgi, bgb = params["bgi"], params["bgb"]
    b1, gamma, beta = params["b1"], params["gamma"], params["beta"]
    buf = jnp.zeros((B, I), f32)
    outs = []
    for t in range(T):
        cur = xq[:, t, :]
        dg = jax.nn.sigmoid(jnp.dot(cur.astype(gemm_dtype), wgi,
                                    preferred_element_type=f32) + bgi)
        immediate = cur * dg
        buf = buf + (1.0 - dg) * cur
        bdg = jax.nn.sigmoid(jnp.dot(buf.astype(gemm_dtype), wgb,
                                     preferred_element_type=f32) + bgb)
        release = buf * bdg
        buf = buf * (1.0 - bdg)
        combined = immediate + release
        h = jnp.maximum(jnp.dot(combined.astype(gemm_dtype), w1,
                                preferred_element_type=f32) + b1, 0.0)
        mean = jnp.mean(h, axis=-1, keepdims=True)
        var = jnp.mean(jnp.square(h - mean), axis=-1, keepdims=True)
        outs.append((h - mean) * jax.lax.rsqrt(var + 1e-5) * gamma + beta)
    return jnp.stack(outs, axis=1)


if __name__ == "__main__":
    B, T, I, H = 2, 8, 16, 32

    key = jax.random.PRNGKey(0)
    ks = jax.random.split(key, 7)
    scale_i = 1.0 / (I ** 0.5)

    # Weights stored transposed (in_features, out_features): kernel does x @ W.
    params = {
        "wgi": jax.random.uniform(ks[0], (I, I), jnp.float32, -scale_i, scale_i),
        "bgi": jax.random.uniform(ks[1], (1, I), jnp.float32, -scale_i, scale_i),
        "wgb": jax.random.uniform(ks[2], (I, I), jnp.float32, -scale_i, scale_i),
        "bgb": jax.random.uniform(ks[3], (1, I), jnp.float32, -scale_i, scale_i),
        "w1":  jax.random.uniform(ks[4], (I, H), jnp.float32, -scale_i, scale_i),
        "b1":  jax.random.uniform(ks[5], (1, H), jnp.float32, -scale_i, scale_i),
        "gamma": jnp.ones((1, H), jnp.float32),   # torch LayerNorm default init
        "beta":  jnp.zeros((1, H), jnp.float32),
    }

    x = jax.random.normal(ks[6], (B, T, I), jnp.float32)

    out = jax.block_until_ready(delayed_linear(x, params))
    ref = jax.block_until_ready(_reference(x, params))

    assert out.shape == (B, T, H)
    max_err = float(jnp.max(jnp.abs(out - ref)))
    assert jnp.allclose(out, ref, atol=1e-3, rtol=1e-3), (
        "mismatch vs reference, max abs err = %g" % max_err)
    print("KERNEL_OK")
</pallas_src>

<mosaic_0001>
module attributes {stable_mosaic.version = 11 : i64} {
  func.func @_delayed_linear_kernel(%arg0: i32, %arg1: i32, %arg2: memref<4x16x128xbf16, #tpu.memory_space<vmem>>, %arg3: memref<128x128xbf16, #tpu.memory_space<vmem>>, %arg4: memref<1x128xf32, #tpu.memory_space<vmem>>, %arg5: memref<128x128xbf16, #tpu.memory_space<vmem>>, %arg6: memref<1x128xf32, #tpu.memory_space<vmem>>, %arg7: memref<128x128xbf16, #tpu.memory_space<vmem>>, %arg8: memref<1x128xf32, #tpu.memory_space<vmem>>, %arg9: memref<1x128xf32, #tpu.memory_space<vmem>>, %arg10: memref<1x128xf32, #tpu.memory_space<vmem>>, %arg11: memref<4x16x128xf32, #tpu.memory_space<vmem>>, %arg12: memref<16x128xf32, #tpu.memory_space<vmem>>, %arg13: memref<4x16x128xf32, #tpu.memory_space<vmem>>) attributes {dimension_semantics = [#tpu.dimension_semantics<parallel>, #tpu.dimension_semantics<arbitrary>], iteration_bounds = array<i64: 1, 2>, scalar_prefetch = 0 : i64, scratch_operands = 2 : i64, tpu.core_type = #tpu.core_type<tc>, window_params = [{transform_indices = @transform_0, window_bounds = array<i64: 4, 16, 128>}, {pipeline_mode = #tpu.pipeline_mode<synchronous>, transform_indices = @transform_1, window_bounds = array<i64: 128, 128>}, {pipeline_mode = #tpu.pipeline_mode<synchronous>, transform_indices = @transform_2, window_bounds = array<i64: 1, 128>}, {pipeline_mode = #tpu.pipeline_mode<synchronous>, transform_indices = @transform_3, window_bounds = array<i64: 128, 128>}, {pipeline_mode = #tpu.pipeline_mode<synchronous>, transform_indices = @transform_4, window_bounds = array<i64: 1, 128>}, {pipeline_mode = #tpu.pipeline_mode<synchronous>, transform_indices = @transform_5, window_bounds = array<i64: 128, 128>}, {pipeline_mode = #tpu.pipeline_mode<synchronous>, transform_indices = @transform_6, window_bounds = array<i64: 1, 128>}, {pipeline_mode = #tpu.pipeline_mode<synchronous>, transform_indices = @transform_7, window_bounds = array<i64: 1, 128>}, {pipeline_mode = #tpu.pipeline_mode<synchronous>, transform_indices = @transform_8, window_bounds = array<i64: 1, 128>}, {transform_indices = @transform_9, window_bounds = array<i64: 4, 16, 128>}]} {
    %c0_i32 = arith.constant 0 : i32
    %0 = arith.cmpi eq, %arg1, %c0_i32 : i32
    %1 = arith.extui %0 : i1 to i32
    %c0_i32_0 = arith.constant 0 : i32
    %2 = arith.cmpi ne, %1, %c0_i32_0 : i32
    scf.if %2 {
      %cst_93 = arith.constant 0.000000e+00 : f32
      %244 = vector.broadcast %cst_93 : f32 to vector<16x128xf32>
      %c0_94 = arith.constant 0 : index
      %c0_95 = arith.constant 0 : index
      %245 = vector.load %arg12[%c0_94, %c0_95] : memref<16x128xf32, #tpu.memory_space<vmem>>, vector<16x128xf32>
      tpu.vector_store %arg12[%c0_94, %c0_95], %244 {strides = array<i32>} : memref<16x128xf32, #tpu.memory_space<vmem>>, vector<16x128xf32>,
    } else {
    }
    %c0 = arith.constant 0 : index
    %c0_1 = arith.constant 0 : index
    %c0_2 = arith.constant 0 : index
    %3 = vector.load %arg2[%c0, %c0_1, %c0_2] : memref<4x16x128xbf16, #tpu.memory_space<vmem>>, vector<4x16x128xbf16>
    %4 = vector.shape_cast %3 : vector<4x16x128xbf16> to vector<64x128xbf16>
    %5 = arith.extf %4 : vector<64x128xbf16> to vector<64x128xf32>
    %c0_3 = arith.constant 0 : index
    %c0_4 = arith.constant 0 : index
    %6 = vector.load %arg3[%c0_3, %c0_4] : memref<128x128xbf16, #tpu.memory_space<vmem>>, vector<128x128xbf16>
    %cst = arith.constant dense<0.000000e+00> : vector<64x128xf32>
    %7 = tpu.matmul %4, %6, %cst {dimension_numbers = #tpu.dot_dimension_numbers<[1], [0], [0], [1], [0, 0, 1, 1], [], []>} : vector<64x128xbf16>, vector<128x128xbf16>, vector<64x128xf32> -> vector<64x128xf32>
    %c0_5 = arith.constant 0 : index
    %c0_6 = arith.constant 0 : index
    %8 = vector.load %arg4[%c0_5, %c0_6] : memref<1x128xf32, #tpu.memory_space<vmem>>, vector<1x128xf32>
    %9 = vector.broadcast %8 : vector<1x128xf32> to vector<64x128xf32>
    %10 = arith.addf %7, %9 : vector<64x128xf32>
    %11 = arith.negf %10 : vector<64x128xf32>
    %12 = math.exp %11 : vector<64x128xf32>
    %cst_7 = arith.constant 1.000000e+00 : f32
    %13 = vector.broadcast %cst_7 : f32 to vector<64x128xf32>
    %14 = arith.addf %13, %12 : vector<64x128xf32>
    %15 = arith.divf %13, %14 : vector<64x128xf32>
    %cst_8 = arith.constant 1.000000e+00 : f32
    %16 = vector.broadcast %cst_8 : f32 to vector<64x128xf32>
    %17 = arith.subf %16, %15 : vector<64x128xf32>
    %18 = arith.mulf %17, %5 : vector<64x128xf32>
    %19 = vector.shape_cast %18 : vector<64x128xf32> to vector<4x16x128xf32>
    %c0_9 = arith.constant 0 : index
    %c0_10 = arith.constant 0 : index
    %c0_11 = arith.constant 0 : index
    %20 = vector.load %arg13[%c0_9, %c0_10, %c0_11] : memref<4x16x128xf32, #tpu.memory_space<vmem>>, vector<4x16x128xf32>
    tpu.vector_store %arg13[%c0_9, %c0_10, %c0_11], %19 {strides = array<i32>} : memref<4x16x128xf32, #tpu.memory_space<vmem>>, vector<4x16x128xf32>,
    %c0_12 = arith.constant 0 : index
    %c0_13 = arith.constant 0 : index
    %21 = vector.load %arg5[%c0_12, %c0_13] : memref<128x128xbf16, #tpu.memory_space<vmem>>, vector<128x128xbf16>
    %c0_14 = arith.constant 0 : index
    %c0_15 = arith.constant 0 : index
    %22 = vector.load %arg6[%c0_14, %c0_15] : memref<1x128xf32, #tpu.memory_space<vmem>>, vector<1x128xf32>
    %c0_16 = arith.constant 0 : index
    %c0_17 = arith.constant 0 : index
    %23 = vector.load %arg12[%c0_16, %c0_17] : memref<16x128xf32, #tpu.memory_space<vmem>>, vector<8x128xf32>
    %c8 = arith.constant 8 : index
    %c0_18 = arith.constant 0 : index
    %24 = vector.load %arg12[%c8, %c0_18] : memref<16x128xf32, #tpu.memory_space<vmem>>, vector<8x128xf32>
    %c0_i32_19 = arith.constant 0 : i32
    %25 = arith.index_cast %c0_i32_19 : i32 to index
    %c0_20 = arith.constant 0 : index
    %c0_21 = arith.constant 0 : index
    %26 = vector.load %arg13[%25, %c0_20, %c0_21] : memref<4x16x128xf32, #tpu.memory_space<vmem>>, vector<1x16x128xf32>
    %27 = vector.shape_cast %26 : vector<1x16x128xf32> to vector<16x128xf32>
    %28 = arith.index_cast %c0_i32_19 : i32 to index
    %c0_22 = arith.constant 0 : index
    %c0_23 = arith.constant 0 : index
    %29 = vector.load %arg2[%28, %c0_22, %c0_23] : memref<4x16x128xbf16, #tpu.memory_space<vmem>>, vector<1x16x128xbf16>
    %30 = vector.shape_cast %29 : vector<1x16x128xbf16> to vector<16x128xbf16>
    %31 = arith.extf %30 : vector<16x128xbf16> to vector<16x128xf32>
    %32 = vector.extract_strided_slice %27 {offsets = [0, 0], sizes = [8, 128], strides = [1, 1]} : vector<16x128xf32> to vector<8x128xf32>
    %33 = arith.addf %23, %32 : vector<8x128xf32>
    %34 = vector.extract_strided_slice %27 {offsets = [8, 0], sizes = [8, 128], strides = [1, 1]} : vector<16x128xf32> to vector<8x128xf32>
    %35 = arith.addf %24, %34 : vector<8x128xf32>
    %36 = arith.truncf %33 : vector<8x128xf32> to vector<8x128xbf16>
    %cst_24 = arith.constant dense<0.000000e+00> : vector<8x128xf32>
    %37 = tpu.matmul %36, %21, %cst_24 {dimension_numbers = #tpu.dot_dimension_numbers<[1], [0], [0], [1], [0, 0, 1, 1], [], []>} : vector<8x128xbf16>, vector<128x128xbf16>, vector<8x128xf32> -> vector<8x128xf32>
    %38 = vector.broadcast %22 : vector<1x128xf32> to vector<8x128xf32>
    %39 = arith.addf %37, %38 : vector<8x128xf32>
    %40 = arith.negf %39 : vector<8x128xf32>
    %41 = math.exp %40 : vector<8x128xf32>
    %cst_25 = arith.constant 1.000000e+00 : f32
    %42 = vector.broadcast %cst_25 : f32 to vector<8x128xf32>
    %43 = arith.addf %42, %41 : vector<8x128xf32>
    %44 = arith.divf %42, %43 : vector<8x128xf32>
    %45 = arith.truncf %35 : vector<8x128xf32> to vector<8x128xbf16>
    %cst_26 = arith.constant dense<0.000000e+00> : vector<8x128xf32>
    %46 = tpu.matmul %45, %21, %cst_26 {dimension_numbers = #tpu.dot_dimension_numbers<[1], [0], [0], [1], [0, 0, 1, 1], [], []>} : vector<8x128xbf16>, vector<128x128xbf16>, vector<8x128xf32> -> vector<8x128xf32>
    %47 = vector.broadcast %22 : vector<1x128xf32> to vector<8x128xf32>
    %48 = arith.addf %46, %47 : vector<8x128xf32>
    %49 = arith.negf %48 : vector<8x128xf32>
    %50 = math.exp %49 : vector<8x128xf32>
    %cst_27 = arith.constant 1.000000e+00 : f32
    %51 = vector.broadcast %cst_27 : f32 to vector<8x128xf32>
    %52 = arith.addf %51, %50 : vector<8x128xf32>
    %53 = arith.divf %51, %52 : vector<8x128xf32>
    %54 = arith.mulf %33, %44 : vector<8x128xf32>
    %55 = arith.mulf %35, %53 : vector<8x128xf32>
    %56 = tpu.concatenate %54, %55 in 0 : vector<8x128xf32>, vector<8x128xf32> -> vector<16x128xf32>
    %57 = arith.subf %31, %27 : vector<16x128xf32>
    %58 = arith.addf %57, %56 : vector<16x128xf32>
    %59 = arith.index_cast %c0_i32_19 : i32 to index
    %c0_28 = arith.constant 0 : index
    %c0_29 = arith.constant 0 : index
    %60 = vector.load %arg13[%59, %c0_28, %c0_29] : memref<4x16x128xf32, #tpu.memory_space<vmem>>, vector<1x16x128xf32>
    %61 = vector.shape_cast %60 : vector<1x16x128xf32> to vector<16x128xf32>
    %62 = vector.shape_cast %58 : vector<16x128xf32> to vector<1x16x128xf32>
    tpu.vector_store %arg13[%59, %c0_28, %c0_29], %62 {strides = array<i32>} : memref<4x16x128xf32, #tpu.memory_space<vmem>>, vector<1x16x128xf32>,
    %cst_30 = arith.constant 1.000000e+00 : f32
    %63 = vector.broadcast %cst_30 : f32 to vector<8x128xf32>
    %64 = arith.subf %63, %44 : vector<8x128xf32>
    %65 = arith.mulf %33, %64 : vector<8x128xf32>
    %cst_31 = arith.constant 1.000000e+00 : f32
    %66 = vector.broadcast %cst_31 : f32 to vector<8x128xf32>
    %67 = arith.subf %66, %53 : vector<8x128xf32>
    %68 = arith.mulf %35, %67 : vector<8x128xf32>
    %c1_i32 = arith.constant 1 : i32
    %69 = arith.index_cast %c1_i32 : i32 to index
    %c0_32 = arith.constant 0 : index
    %c0_33 = arith.constant 0 : index
    %70 = vector.load %arg13[%69, %c0_32, %c0_33] : memref<4x16x128xf32, #tpu.memory_space<vmem>>, vector<1x16x128xf32>
    %71 = vector.shape_cast %70 : vector<1x16x128xf32> to vector<16x128xf32>
    %72 = arith.index_cast %c1_i32 : i32 to index
    %c0_34 = arith.constant 0 : index
    %c0_35 = arith.constant 0 : index
    %73 = vector.load %arg2[%72, %c0_34, %c0_35] : memref<4x16x128xbf16, #tpu.memory_space<vmem>>, vector<1x16x128xbf16>
    %74 = vector.shape_cast %73 : vector<1x16x128xbf16> to vector<16x128xbf16>
    %75 = arith.extf %74 : vector<16x128xbf16> to vector<16x128xf32>
    %76 = vector.extract_strided_slice %71 {offsets = [0, 0], sizes = [8, 128], strides = [1, 1]} : vector<16x128xf32> to vector<8x128xf32>
    %77 = arith.addf %65, %76 : vector<8x128xf32>
    %78 = vector.extract_strided_slice %71 {offsets = [8, 0], sizes = [8, 128], strides = [1, 1]} : vector<16x128xf32> to vector<8x128xf32>
    %79 = arith.addf %68, %78 : vector<8x128xf32>
    %80 = arith.truncf %77 : vector<8x128xf32> to vector<8x128xbf16>
    %cst_36 = arith.constant dense<0.000000e+00> : vector<8x128xf32>
    %81 = tpu.matmul %80, %21, %cst_36 {dimension_numbers = #tpu.dot_dimension_numbers<[1], [0], [0], [1], [0, 0, 1, 1], [], []>} : vector<8x128xbf16>, vector<128x128xbf16>, vector<8x128xf32> -> vector<8x128xf32>
    %82 = vector.broadcast %22 : vector<1x128xf32> to vector<8x128xf32>
    %83 = arith.addf %81, %82 : vector<8x128xf32>
    %84 = arith.negf %83 : vector<8x128xf32>
    %85 = math.exp %84 : vector<8x128xf32>
    %cst_37 = arith.constant 1.000000e+00 : f32
    %86 = vector.broadcast %cst_37 : f32 to vector<8x128xf32>
    %87 = arith.addf %86, %85 : vector<8x128xf32>
    %88 = arith.divf %86, %87 : vector<8x128xf32>
    %89 = arith.truncf %79 : vector<8x128xf32> to vector<8x128xbf16>
    %cst_38 = arith.constant dense<0.000000e+00> : vector<8x128xf32>
    %90 = tpu.matmul %89, %21, %cst_38 {dimension_numbers = #tpu.dot_dimension_numbers<[1], [0], [0], [1], [0, 0, 1, 1], [], []>} : vector<8x128xbf16>, vector<128x128xbf16>, vector<8x128xf32> -> vector<8x128xf32>
    %91 = vector.broadcast %22 : vector<1x128xf32> to vector<8x128xf32>
    %92 = arith.addf %90, %91 : vector<8x128xf32>
    %93 = arith.negf %92 : vector<8x128xf32>
    %94 = math.exp %93 : vector<8x128xf32>
    %cst_39 = arith.constant 1.000000e+00 : f32
    %95 = vector.broadcast %cst_39 : f32 to vector<8x128xf32>
    %96 = arith.addf %95, %94 : vector<8x128xf32>
    %97 = arith.divf %95, %96 : vector<8x128xf32>
    %98 = arith.mulf %77, %88 : vector<8x128xf32>
    %99 = arith.mulf %79, %97 : vector<8x128xf32>
    %100 = tpu.concatenate %98, %99 in 0 : vector<8x128xf32>, vector<8x128xf32> -> vector<16x128xf32>
    %101 = arith.subf %75, %71 : vector<16x128xf32>
    %102 = arith.addf %101, %100 : vector<16x128xf32>
    %103 = arith.index_cast %c1_i32 : i32 to index
    %c0_40 = arith.constant 0 : index
    %c0_41 = arith.constant 0 : index
    %104 = vector.load %arg13[%103, %c0_40, %c0_41] : memref<4x16x128xf32, #tpu.memory_space<vmem>>, vector<1x16x128xf32>
    %105 = vector.shape_cast %104 : vector<1x16x128xf32> to vector<16x128xf32>
    %106 = vector.shape_cast %102 : vector<16x128xf32> to vector<1x16x128xf32>
    tpu.vector_store %arg13[%103, %c0_40, %c0_41], %106 {strides = array<i32>} : memref<4x16x128xf32, #tpu.memory_space<vmem>>, vector<1x16x128xf32>,
    %cst_42 = arith.constant 1.000000e+00 : f32
    %107 = vector.broadcast %cst_42 : f32 to vector<8x128xf32>
    %108 = arith.subf %107, %88 : vector<8x128xf32>
    %109 = arith.mulf %77, %108 : vector<8x128xf32>
    %cst_43 = arith.constant 1.000000e+00 : f32
    %110 = vector.broadcast %cst_43 : f32 to vector<8x128xf32>
    %111 = arith.subf %110, %97 : vector<8x128xf32>
    %112 = arith.mulf %79, %111 : vector<8x128xf32>
    %c2_i32 = arith.constant 2 : i32
    %113 = arith.index_cast %c2_i32 : i32 to index
    %c0_44 = arith.constant 0 : index
    %c0_45 = arith.constant 0 : index
    %114 = vector.load %arg13[%113, %c0_44, %c0_45] : memref<4x16x128xf32, #tpu.memory_space<vmem>>, vector<1x16x128xf32>
    %115 = vector.shape_cast %114 : vector<1x16x128xf32> to vector<16x128xf32>
    %116 = arith.index_cast %c2_i32 : i32 to index
    %c0_46 = arith.constant 0 : index
    %c0_47 = arith.constant 0 : index
    %117 = vector.load %arg2[%116, %c0_46, %c0_47] : memref<4x16x128xbf16, #tpu.memory_space<vmem>>, vector<1x16x128xbf16>
    %118 = vector.shape_cast %117 : vector<1x16x128xbf16> to vector<16x128xbf16>
    %119 = arith.extf %118 : vector<16x128xbf16> to vector<16x128xf32>
    %120 = vector.extract_strided_slice %115 {offsets = [0, 0], sizes = [8, 128], strides = [1, 1]} : vector<16x128xf32> to vector<8x128xf32>
    %121 = arith.addf %109, %120 : vector<8x128xf32>
    %122 = vector.extract_strided_slice %115 {offsets = [8, 0], sizes = [8, 128], strides = [1, 1]} : vector<16x128xf32> to vector<8x128xf32>
    %123 = arith.addf %112, %122 : vector<8x128xf32>
    %124 = arith.truncf %121 : vector<8x128xf32> to vector<8x128xbf16>
    %cst_48 = arith.constant dense<0.000000e+00> : vector<8x128xf32>
    %125 = tpu.matmul %124, %21, %cst_48 {dimension_numbers = #tpu.dot_dimension_numbers<[1], [0], [0], [1], [0, 0, 1, 1], [], []>} : vector<8x128xbf16>, vector<128x128xbf16>, vector<8x128xf32> -> vector<8x128xf32>
    %126 = vector.broadcast %22 : vector<1x128xf32> to vector<8x128xf32>
    %127 = arith.addf %125, %126 : vector<8x128xf32>
    %128 = arith.negf %127 : vector<8x128xf32>
    %129 = math.exp %128 : vector<8x128xf32>
    %cst_49 = arith.constant 1.000000e+00 : f32
    %130 = vector.broadcast %cst_49 : f32 to vector<8x128xf32>
    %131 = arith.addf %130, %129 : vector<8x128xf32>
    %132 = arith.divf %130, %131 : vector<8x128xf32>
    %133 = arith.truncf %123 : vector<8x128xf32> to vector<8x128xbf16>
    %cst_50 = arith.constant dense<0.000000e+00> : vector<8x128xf32>
    %134 = tpu.matmul %133, %21, %cst_50 {dimension_numbers = #tpu.dot_dimension_numbers<[1], [0], [0], [1], [0, 0, 1, 1], [], []>} : vector<8x128xbf16>, vector<128x128xbf16>, vector<8x128xf32> -> vector<8x128xf32>
    %135 = vector.broadcast %22 : vector<1x128xf32> to vector<8x128xf32>
    %136 = arith.addf %134, %135 : vector<8x128xf32>
    %137 = arith.negf %136 : vector<8x128xf32>
    %138 = math.exp %137 : vector<8x128xf32>
    %cst_51 = arith.constant 1.000000e+00 : f32
    %139 = vector.broadcast %cst_51 : f32 to vector<8x128xf32>
    %140 = arith.addf %139, %138 : vector<8x128xf32>
    %141 = arith.divf %139, %140 : vector<8x128xf32>
    %142 = arith.mulf %121, %132 : vector<8x128xf32>
    %143 = arith.mulf %123, %141 : vector<8x128xf32>
    %144 = tpu.concatenate %142, %143 in 0 : vector<8x128xf32>, vector<8x128xf32> -> vector<16x128xf32>
    %145 = arith.subf %119, %115 : vector<16x128xf32>
    %146 = arith.addf %145, %144 : vector<16x128xf32>
    %147 = arith.index_cast %c2_i32 : i32 to index
    %c0_52 = arith.constant 0 : index
    %c0_53 = arith.constant 0 : index
    %148 = vector.load %arg13[%147, %c0_52, %c0_53] : memref<4x16x128xf32, #tpu.memory_space<vmem>>, vector<1x16x128xf32>
    %149 = vector.shape_cast %148 : vector<1x16x128xf32> to vector<16x128xf32>
    %150 = vector.shape_cast %146 : vector<16x128xf32> to vector<1x16x128xf32>
    tpu.vector_store %arg13[%147, %c0_52, %c0_53], %150 {strides = array<i32>} : memref<4x16x128xf32, #tpu.memory_space<vmem>>, vector<1x16x128xf32>,
    %cst_54 = arith.constant 1.000000e+00 : f32
    %151 = vector.broadcast %cst_54 : f32 to vector<8x128xf32>
    %152 = arith.subf %151, %132 : vector<8x128xf32>
    %153 = arith.mulf %121, %152 : vector<8x128xf32>
    %cst_55 = arith.constant 1.000000e+00 : f32
    %154 = vector.broadcast %cst_55 : f32 to vector<8x128xf32>
    %155 = arith.subf %154, %141 : vector<8x128xf32>
    %156 = arith.mulf %123, %155 : vector<8x128xf32>
    %c3_i32 = arith.constant 3 : i32
    %157 = arith.index_cast %c3_i32 : i32 to index
    %c0_56 = arith.constant 0 : index
    %c0_57 = arith.constant 0 : index
    %158 = vector.load %arg13[%157, %c0_56, %c0_57] : memref<4x16x128xf32, #tpu.memory_space<vmem>>, vector<1x16x128xf32>
    %159 = vector.shape_cast %158 : vector<1x16x128xf32> to vector<16x128xf32>
    %160 = arith.index_cast %c3_i32 : i32 to index
    %c0_58 = arith.constant 0 : index
    %c0_59 = arith.constant 0 : index
    %161 = vector.load %arg2[%160, %c0_58, %c0_59] : memref<4x16x128xbf16, #tpu.memory_space<vmem>>, vector<1x16x128xbf16>
    %162 = vector.shape_cast %161 : vector<1x16x128xbf16> to vector<16x128xbf16>
    %163 = arith.extf %162 : vector<16x128xbf16> to vector<16x128xf32>
    %164 = vector.extract_strided_slice %159 {offsets = [0, 0], sizes = [8, 128], strides = [1, 1]} : vector<16x128xf32> to vector<8x128xf32>
    %165 = arith.addf %153, %164 : vector<8x128xf32>
    %166 = vector.extract_strided_slice %159 {offsets = [8, 0], sizes = [8, 128], strides = [1, 1]} : vector<16x128xf32> to vector<8x128xf32>
    %167 = arith.addf %156, %166 : vector<8x128xf32>
    %168 = arith.truncf %165 : vector<8x128xf32> to vector<8x128xbf16>
    %cst_60 = arith.constant dense<0.000000e+00> : vector<8x128xf32>
    %169 = tpu.matmul %168, %21, %cst_60 {dimension_numbers = #tpu.dot_dimension_numbers<[1], [0], [0], [1], [0, 0, 1, 1], [], []>} : vector<8x128xbf16>, vector<128x128xbf16>, vector<8x128xf32> -> vector<8x128xf32>
    %170 = vector.broadcast %22 : vector<1x128xf32> to vector<8x128xf32>
    %171 = arith.addf %169, %170 : vector<8x128xf32>
    %172 = arith.negf %171 : vector<8x128xf32>
    %173 = math.exp %172 : vector<8x128xf32>
    %cst_61 = arith.constant 1.000000e+00 : f32
    %174 = vector.broadcast %cst_61 : f32 to vector<8x128xf32>
    %175 = arith.addf %174, %173 : vector<8x128xf32>
    %176 = arith.divf %174, %175 : vector<8x128xf32>
    %177 = arith.truncf %167 : vector<8x128xf32> to vector<8x128xbf16>
    %cst_62 = arith.constant dense<0.000000e+00> : vector<8x128xf32>
    %178 = tpu.matmul %177, %21, %cst_62 {dimension_numbers = #tpu.dot_dimension_numbers<[1], [0], [0], [1], [0, 0, 1, 1], [], []>} : vector<8x128xbf16>, vector<128x128xbf16>, vector<8x128xf32> -> vector<8x128xf32>
    %179 = vector.broadcast %22 : vector<1x128xf32> to vector<8x128xf32>
    %180 = arith.addf %178, %179 : vector<8x128xf32>
    %181 = arith.negf %180 : vector<8x128xf32>
    %182 = math.exp %181 : vector<8x128xf32>
    %cst_63 = arith.constant 1.000000e+00 : f32
    %183 = vector.broadcast %cst_63 : f32 to vector<8x128xf32>
    %184 = arith.addf %183, %182 : vector<8x128xf32>
    %185 = arith.divf %183, %184 : vector<8x128xf32>
    %186 = arith.mulf %165, %176 : vector<8x128xf32>
    %187 = arith.mulf %167, %185 : vector<8x128xf32>
    %188 = tpu.concatenate %186, %187 in 0 : vector<8x128xf32>, vector<8x128xf32> -> vector<16x128xf32>
    %189 = arith.subf %163, %159 : vector<16x128xf32>
    %190 = arith.addf %189, %188 : vector<16x128xf32>
    %191 = arith.index_cast %c3_i32 : i32 to index
    %c0_64 = arith.constant 0 : index
    %c0_65 = arith.constant 0 : index
    %192 = vector.load %arg13[%191, %c0_64, %c0_65] : memref<4x16x128xf32, #tpu.memory_space<vmem>>, vector<1x16x128xf32>
    %193 = vector.shape_cast %192 : vector<1x16x128xf32> to vector<16x128xf32>
    %194 = vector.shape_cast %190 : vector<16x128xf32> to vector<1x16x128xf32>
    tpu.vector_store %arg13[%191, %c0_64, %c0_65], %194 {strides = array<i32>} : memref<4x16x128xf32, #tpu.memory_space<vmem>>, vector<1x16x128xf32>,
    %cst_66 = arith.constant 1.000000e+00 : f32
    %195 = vector.broadcast %cst_66 : f32 to vector<8x128xf32>
    %196 = arith.subf %195, %176 : vector<8x128xf32>
    %197 = arith.mulf %165, %196 : vector<8x128xf32>
    %cst_67 = arith.constant 1.000000e+00 : f32
    %198 = vector.broadcast %cst_67 : f32 to vector<8x128xf32>
    %199 = arith.subf %198, %185 : vector<8x128xf32>
    %200 = arith.mulf %167, %199 : vector<8x128xf32>
    %c4_i32 = arith.constant 4 : i32
    %c0_68 = arith.constant 0 : index
    %c0_69 = arith.constant 0 : index
    %201 = vector.load %arg12[%c0_68, %c0_69] : memref<16x128xf32, #tpu.memory_space<vmem>>, vector<8x128xf32>
    tpu.vector_store %arg12[%c0_68, %c0_69], %197 {strides = array<i32>} : memref<16x128xf32, #tpu.memory_space<vmem>>, vector<8x128xf32>,
    %c8_70 = arith.constant 8 : index
    %c0_71 = arith.constant 0 : index
    %202 = vector.load %arg12[%c8_70, %c0_71] : memref<16x128xf32, #tpu.memory_space<vmem>>, vector<8x128xf32>
    tpu.vector_store %arg12[%c8_70, %c0_71], %200 {strides = array<i32>} : memref<16x128xf32, #tpu.memory_space<vmem>>, vector<8x128xf32>,
    %c0_72 = arith.constant 0 : index
    %c0_73 = arith.constant 0 : index
    %c0_74 = arith.constant 0 : index
    %203 = vector.load %arg13[%c0_72, %c0_73, %c0_74] : memref<4x16x128xf32, #tpu.memory_space<vmem>>, vector<4x16x128xf32>
    %204 = vector.shape_cast %203 : vector<4x16x128xf32> to vector<64x128xf32>
    %205 = arith.truncf %204 : vector<64x128xf32> to vector<64x128xbf16>
    %c0_75 = arith.constant 0 : index
    %c0_76 = arith.constant 0 : index
    %206 = vector.load %arg7[%c0_75, %c0_76] : memref<128x128xbf16, #tpu.memory_space<vmem>>, vector<128x128xbf16>
    %cst_77 = arith.constant dense<0.000000e+00> : vector<64x128xf32>
    %207 = tpu.matmul %205, %206, %cst_77 {dimension_numbers = #tpu.dot_dimension_numbers<[1], [0], [0], [1], [0, 0, 1, 1], [], []>} : vector<64x128xbf16>, vector<128x128xbf16>, vector<64x128xf32> -> vector<64x128xf32>
    %c0_78 = arith.constant 0 : index
    %c0_79 = arith.constant 0 : index
    %208 = vector.load %arg8[%c0_78, %c0_79] : memref<1x128xf32, #tpu.memory_space<vmem>>, vector<1x128xf32>
    %209 = vector.broadcast %208 : vector<1x128xf32> to vector<64x128xf32>
    %210 = arith.addf %207, %209 : vector<64x128xf32>
    %cst_80 = arith.constant 0.000000e+00 : f32
    %211 = vector.broadcast %cst_80 : f32 to vector<64x128xf32>
    %212 = arith.maximumf %210, %211 : vector<64x128xf32>
    %cst_81 = arith.constant dense<0.000000e+00> : vector<64xf32>
    %213 = vector.multi_reduction <add>, %212, %cst_81 [1] : vector<64x128xf32> to vector<64xf32>
    %214 = vector.shape_cast %213 : vector<64xf32> to vector<64x1xf32>
    %cst_82 = arith.constant 3.125000e-02 : f32
    %215 = vector.broadcast %cst_82 : f32 to vector<64x1xf32>
    %216 = arith.mulf %214, %215 : vector<64x1xf32>
    %217 = vector.broadcast %216 : vector<64x1xf32> to vector<64x128xf32>
    %218 = arith.subf %212, %217 : vector<64x128xf32>
    %219 = arith.mulf %218, %218 : vector<64x128xf32>
    %220 = tpu.iota {dimensions = array<i32: 1>} : vector<1x128xi32>
    %c32_i32 = arith.constant 32 : i32
    %221 = vector.broadcast %c32_i32 : i32 to vector<1x128xi32>
    %222 = arith.cmpi slt, %220, %221 : vector<1x128xi32>
    %223 = arith.extui %222 : vector<1x128xi1> to vector<1x128xi32>
    %224 = arith.sitofp %223 : vector<1x128xi32> to vector<1x128xf32>
    %225 = vector.broadcast %224 : vector<1x128xf32> to vector<64x128xf32>
    %226 = arith.mulf %219, %225 : vector<64x128xf32>
    %cst_83 = arith.constant dense<0.000000e+00> : vector<64xf32>
    %227 = vector.multi_reduction <add>, %226, %cst_83 [1] : vector<64x128xf32> to vector<64xf32>
    %228 = vector.shape_cast %227 : vector<64xf32> to vector<64x1xf32>
    %cst_84 = arith.constant 3.125000e-02 : f32
    %229 = vector.broadcast %cst_84 : f32 to vector<64x1xf32>
    %230 = arith.mulf %228, %229 : vector<64x1xf32>
    %cst_85 = arith.constant 9.99999974E-6 : f32
    %231 = vector.broadcast %cst_85 : f32 to vector<64x1xf32>
    %232 = arith.addf %230, %231 : vector<64x1xf32>
    %233 = math.rsqrt %232 : vector<64x1xf32>
    %234 = vector.broadcast %233 : vector<64x1xf32> to vector<64x128xf32>
    %235 = arith.mulf %218, %234 : vector<64x128xf32>
    %c0_86 = arith.constant 0 : index
    %c0_87 = arith.constant 0 : index
    %236 = vector.load %arg9[%c0_86, %c0_87] : memref<1x128xf32, #tpu.memory_space<vmem>>, vector<1x128xf32>
    %237 = vector.broadcast %236 : vector<1x128xf32> to vector<64x128xf32>
    %238 = arith.mulf %235, %237 : vector<64x128xf32>
    %c0_88 = arith.constant 0 : index
    %c0_89 = arith.constant 0 : index
    %239 = vector.load %arg10[%c0_88, %c0_89] : memref<1x128xf32, #tpu.memory_space<vmem>>, vector<1x128xf32>
    %240 = vector.broadcast %239 : vector<1x128xf32> to vector<64x128xf32>
    %241 = arith.addf %238, %240 : vector<64x128xf32>
    %242 = vector.shape_cast %241 : vector<64x128xf32> to vector<4x16x128xf32>
    %c0_90 = arith.constant 0 : index
    %c0_91 = arith.constant 0 : index
    %c0_92 = arith.constant 0 : index
    %243 = vector.load %arg11[%c0_90, %c0_91, %c0_92] : memref<4x16x128xf32, #tpu.memory_space<vmem>>, vector<4x16x128xf32>
    tpu.vector_store %arg11[%c0_90, %c0_91, %c0_92], %242 {strides = array<i32>} : memref<4x16x128xf32, #tpu.memory_space<vmem>>, vector<4x16x128xf32>,
    return
  }
  func.func @transform_0(%arg0: i32, %arg1: i32) -> (i32, i32, i32) {
    %c0_i32 = arith.constant 0 : i32
    %c0_i32_0 = arith.constant 0 : i32
    return %arg1, %arg0, %c0_i32 : i32, i32, i32
  }
  func.func @transform_1(%arg0: i32, %arg1: i32) -> (i32, i32) {
    %c0_i32 = arith.constant 0 : i32
    %c0_i32_0 = arith.constant 0 : i32
    %c0_i32_1 = arith.constant 0 : i32
    return %c0_i32, %c0_i32_0 : i32, i32
  }
  func.func @transform_2(%arg0: i32, %arg1: i32) -> (i32, i32) {
    %c0_i32 = arith.constant 0 : i32
    %c0_i32_0 = arith.constant 0 : i32
    %c0_i32_1 = arith.constant 0 : i32
    return %c0_i32, %c0_i32_0 : i32, i32
  }
  func.func @transform_3(%arg0: i32, %arg1: i32) -> (i32, i32) {
    %c0_i32 = arith.constant 0 : i32
    %c0_i32_0 = arith.constant 0 : i32
    %c0_i32_1 = arith.constant 0 : i32
    return %c0_i32, %c0_i32_0 : i32, i32
  }
  func.func @transform_4(%arg0: i32, %arg1: i32) -> (i32, i32) {
    %c0_i32 = arith.constant 0 : i32
    %c0_i32_0 = arith.constant 0 : i32
    %c0_i32_1 = arith.constant 0 : i32
    return %c0_i32, %c0_i32_0 : i32, i32
  }
  func.func @transform_5(%arg0: i32, %arg1: i32) -> (i32, i32) {
    %c0_i32 = arith.constant 0 : i32
    %c0_i32_0 = arith.constant 0 : i32
    %c0_i32_1 = arith.constant 0 : i32
    return %c0_i32, %c0_i32_0 : i32, i32
  }
  func.func @transform_6(%arg0: i32, %arg1: i32) -> (i32, i32) {
    %c0_i32 = arith.constant 0 : i32
    %c0_i32_0 = arith.constant 0 : i32
    %c0_i32_1 = arith.constant 0 : i32
    return %c0_i32, %c0_i32_0 : i32, i32
  }
  func.func @transform_7(%arg0: i32, %arg1: i32) -> (i32, i32) {
    %c0_i32 = arith.constant 0 : i32
    %c0_i32_0 = arith.constant 0 : i32
    %c0_i32_1 = arith.constant 0 : i32
    return %c0_i32, %c0_i32_0 : i32, i32
  }
  func.func @transform_8(%arg0: i32, %arg1: i32) -> (i32, i32) {
    %c0_i32 = arith.constant 0 : i32
    %c0_i32_0 = arith.constant 0 : i32
    %c0_i32_1 = arith.constant 0 : i32
    return %c0_i32, %c0_i32_0 : i32, i32
  }
  func.func @transform_9(%arg0: i32, %arg1: i32) -> (i32, i32, i32) {
    %c0_i32 = arith.constant 0 : i32
    %c0_i32_0 = arith.constant 0 : i32
    return %arg1, %arg0, %c0_i32 : i32, i32, i32
  }
}

module attributes {stable_mosaic.version = 11 : i64} {
  func.func @_delayed_linear_kernel(%arg0: i32, %arg1: i32, %arg2: memref<4x16x128xbf16, #tpu.memory_space<vmem>>, %arg3: memref<128x128xbf16, #tpu.memory_space<vmem>>, %arg4: memref<1x128xf32, #tpu.memory_space<vmem>>, %arg5: memref<128x128xbf16, #tpu.memory_space<vmem>>, %arg6: memref<1x128xf32, #tpu.memory_space<vmem>>, %arg7: memref<128x128xbf16, #tpu.memory_space<vmem>>, %arg8: memref<1x128xf32, #tpu.memory_space<vmem>>, %arg9: memref<1x128xf32, #tpu.memory_space<vmem>>, %arg10: memref<1x128xf32, #tpu.memory_space<vmem>>, %arg11: memref<4x16x128xf32, #tpu.memory_space<vmem>>, %arg12: memref<16x128xf32, #tpu.memory_space<vmem>>, %arg13: memref<4x16x128xf32, #tpu.memory_space<vmem>>) attributes {dimension_semantics = [#tpu.dimension_semantics<parallel>, #tpu.dimension_semantics<arbitrary>], iteration_bounds = array<i64: 1, 2>, scalar_prefetch = 0 : i64, scratch_operands = 2 : i64, tpu.core_type = #tpu.core_type<tc>, window_params = [{transform_indices = @transform_0, window_bounds = array<i64: 4, 16, 128>}, {pipeline_mode = #tpu.pipeline_mode<synchronous>, transform_indices = @transform_1, window_bounds = array<i64: 128, 128>}, {pipeline_mode = #tpu.pipeline_mode<synchronous>, transform_indices = @transform_2, window_bounds = array<i64: 1, 128>}, {pipeline_mode = #tpu.pipeline_mode<synchronous>, transform_indices = @transform_3, window_bounds = array<i64: 128, 128>}, {pipeline_mode = #tpu.pipeline_mode<synchronous>, transform_indices = @transform_4, window_bounds = array<i64: 1, 128>}, {pipeline_mode = #tpu.pipeline_mode<synchronous>, transform_indices = @transform_5, window_bounds = array<i64: 128, 128>}, {pipeline_mode = #tpu.pipeline_mode<synchronous>, transform_indices = @transform_6, window_bounds = array<i64: 1, 128>}, {pipeline_mode = #tpu.pipeline_mode<synchronous>, transform_indices = @transform_7, window_bounds = array<i64: 1, 128>}, {pipeline_mode = #tpu.pipeline_mode<synchronous>, transform_indices = @transform_8, window_bounds = array<i64: 1, 128>}, {transform_indices = @transform_9, window_bounds = array<i64: 4, 16, 128>}]} {
    %c0_i32 = arith.constant 0 : i32
    %0 = arith.cmpi eq, %arg1, %c0_i32 : i32
    %1 = arith.extui %0 : i1 to i32
    %c0_i32_0 = arith.constant 0 : i32
    %2 = arith.cmpi ne, %1, %c0_i32_0 : i32
    scf.if %2 {
      %cst_93 = arith.constant 0.000000e+00 : f32
      %244 = vector.broadcast %cst_93 : f32 to vector<16x128xf32>
      %c0_94 = arith.constant 0 : index
      %c0_95 = arith.constant 0 : index
      %245 = vector.load %arg12[%c0_94, %c0_95] : memref<16x128xf32, #tpu.memory_space<vmem>>, vector<16x128xf32>
      tpu.vector_store %arg12[%c0_94, %c0_95], %244 {strides = array<i32>} : memref<16x128xf32, #tpu.memory_space<vmem>>, vector<16x128xf32>,
    } else {
    }
    %c0 = arith.constant 0 : index
    %c0_1 = arith.constant 0 : index
    %c0_2 = arith.constant 0 : index
    %3 = vector.load %arg2[%c0, %c0_1, %c0_2] : memref<4x16x128xbf16, #tpu.memory_space<vmem>>, vector<4x16x128xbf16>
    %4 = vector.shape_cast %3 : vector<4x16x128xbf16> to vector<64x128xbf16>
    %5 = arith.extf %4 : vector<64x128xbf16> to vector<64x128xf32>
    %c0_3 = arith.constant 0 : index
    %c0_4 = arith.constant 0 : index
    %6 = vector.load %arg3[%c0_3, %c0_4] : memref<128x128xbf16, #tpu.memory_space<vmem>>, vector<128x128xbf16>
    %cst = arith.constant dense<0.000000e+00> : vector<64x128xf32>
    %7 = tpu.matmul %4, %6, %cst {dimension_numbers = #tpu.dot_dimension_numbers<[1], [0], [0], [1], [0, 0, 1, 1], [], []>} : vector<64x128xbf16>, vector<128x128xbf16>, vector<64x128xf32> -> vector<64x128xf32>
    %c0_5 = arith.constant 0 : index
    %c0_6 = arith.constant 0 : index
    %8 = vector.load %arg4[%c0_5, %c0_6] : memref<1x128xf32, #tpu.memory_space<vmem>>, vector<1x128xf32>
    %9 = vector.broadcast %8 : vector<1x128xf32> to vector<64x128xf32>
    %10 = arith.addf %7, %9 : vector<64x128xf32>
    %11 = arith.negf %10 : vector<64x128xf32>
    %12 = math.exp %11 : vector<64x128xf32>
    %cst_7 = arith.constant 1.000000e+00 : f32
    %13 = vector.broadcast %cst_7 : f32 to vector<64x128xf32>
    %14 = arith.addf %13, %12 : vector<64x128xf32>
    %15 = arith.divf %13, %14 : vector<64x128xf32>
    %cst_8 = arith.constant 1.000000e+00 : f32
    %16 = vector.broadcast %cst_8 : f32 to vector<64x128xf32>
    %17 = arith.subf %16, %15 : vector<64x128xf32>
    %18 = arith.mulf %17, %5 : vector<64x128xf32>
    %19 = vector.shape_cast %18 : vector<64x128xf32> to vector<4x16x128xf32>
    %c0_9 = arith.constant 0 : index
    %c0_10 = arith.constant 0 : index
    %c0_11 = arith.constant 0 : index
    %20 = vector.load %arg13[%c0_9, %c0_10, %c0_11] : memref<4x16x128xf32, #tpu.memory_space<vmem>>, vector<4x16x128xf32>
    tpu.vector_store %arg13[%c0_9, %c0_10, %c0_11], %19 {strides = array<i32>} : memref<4x16x128xf32, #tpu.memory_space<vmem>>, vector<4x16x128xf32>,
    %c0_12 = arith.constant 0 : index
    %c0_13 = arith.constant 0 : index
    %21 = vector.load %arg5[%c0_12, %c0_13] : memref<128x128xbf16, #tpu.memory_space<vmem>>, vector<128x128xbf16>
    %c0_14 = arith.constant 0 : index
    %c0_15 = arith.constant 0 : index
    %22 = vector.load %arg6[%c0_14, %c0_15] : memref<1x128xf32, #tpu.memory_space<vmem>>, vector<1x128xf32>
    %c0_16 = arith.constant 0 : index
    %c0_17 = arith.constant 0 : index
    %23 = vector.load %arg12[%c0_16, %c0_17] : memref<16x128xf32, #tpu.memory_space<vmem>>, vector<8x128xf32>
    %c8 = arith.constant 8 : index
    %c0_18 = arith.constant 0 : index
    %24 = vector.load %arg12[%c8, %c0_18] : memref<16x128xf32, #tpu.memory_space<vmem>>, vector<8x128xf32>
    %c0_i32_19 = arith.constant 0 : i32
    %25 = arith.index_cast %c0_i32_19 : i32 to index
    %c0_20 = arith.constant 0 : index
    %c0_21 = arith.constant 0 : index
    %26 = vector.load %arg13[%25, %c0_20, %c0_21] : memref<4x16x128xf32, #tpu.memory_space<vmem>>, vector<1x16x128xf32>
    %27 = vector.shape_cast %26 : vector<1x16x128xf32> to vector<16x128xf32>
    %28 = arith.index_cast %c0_i32_19 : i32 to index
    %c0_22 = arith.constant 0 : index
    %c0_23 = arith.constant 0 : index
    %29 = vector.load %arg2[%28, %c0_22, %c0_23] : memref<4x16x128xbf16, #tpu.memory_space<vmem>>, vector<1x16x128xbf16>
    %30 = vector.shape_cast %29 : vector<1x16x128xbf16> to vector<16x128xbf16>
    %31 = arith.extf %30 : vector<16x128xbf16> to vector<16x128xf32>
    %32 = vector.extract_strided_slice %27 {offsets = [0, 0], sizes = [8, 128], strides = [1, 1]} : vector<16x128xf32> to vector<8x128xf32>
    %33 = arith.addf %23, %32 : vector<8x128xf32>
    %34 = vector.extract_strided_slice %27 {offsets = [8, 0], sizes = [8, 128], strides = [1, 1]} : vector<16x128xf32> to vector<8x128xf32>
    %35 = arith.addf %24, %34 : vector<8x128xf32>
    %36 = arith.truncf %33 : vector<8x128xf32> to vector<8x128xbf16>
    %cst_24 = arith.constant dense<0.000000e+00> : vector<8x128xf32>
    %37 = tpu.matmul %36, %21, %cst_24 {dimension_numbers = #tpu.dot_dimension_numbers<[1], [0], [0], [1], [0, 0, 1, 1], [], []>} : vector<8x128xbf16>, vector<128x128xbf16>, vector<8x128xf32> -> vector<8x128xf32>
    %38 = vector.broadcast %22 : vector<1x128xf32> to vector<8x128xf32>
    %39 = arith.addf %37, %38 : vector<8x128xf32>
    %40 = arith.negf %39 : vector<8x128xf32>
    %41 = math.exp %40 : vector<8x128xf32>
    %cst_25 = arith.constant 1.000000e+00 : f32
    %42 = vector.broadcast %cst_25 : f32 to vector<8x128xf32>
    %43 = arith.addf %42, %41 : vector<8x128xf32>
    %44 = arith.divf %42, %43 : vector<8x128xf32>
    %45 = arith.truncf %35 : vector<8x128xf32> to vector<8x128xbf16>
    %cst_26 = arith.constant dense<0.000000e+00> : vector<8x128xf32>
    %46 = tpu.matmul %45, %21, %cst_26 {dimension_numbers = #tpu.dot_dimension_numbers<[1], [0], [0], [1], [0, 0, 1, 1], [], []>} : vector<8x128xbf16>, vector<128x128xbf16>, vector<8x128xf32> -> vector<8x128xf32>
    %47 = vector.broadcast %22 : vector<1x128xf32> to vector<8x128xf32>
    %48 = arith.addf %46, %47 : vector<8x128xf32>
    %49 = arith.negf %48 : vector<8x128xf32>
    %50 = math.exp %49 : vector<8x128xf32>
    %cst_27 = arith.constant 1.000000e+00 : f32
    %51 = vector.broadcast %cst_27 : f32 to vector<8x128xf32>
    %52 = arith.addf %51, %50 : vector<8x128xf32>
    %53 = arith.divf %51, %52 : vector<8x128xf32>
    %54 = arith.mulf %33, %44 : vector<8x128xf32>
    %55 = arith.mulf %35, %53 : vector<8x128xf32>
    %56 = tpu.concatenate %54, %55 in 0 : vector<8x128xf32>, vector<8x128xf32> -> vector<16x128xf32>
    %57 = arith.subf %31, %27 : vector<16x128xf32>
    %58 = arith.addf %57, %56 : vector<16x128xf32>
    %59 = arith.index_cast %c0_i32_19 : i32 to index
    %c0_28 = arith.constant 0 : index
    %c0_29 = arith.constant 0 : index
    %60 = vector.load %arg13[%59, %c0_28, %c0_29] : memref<4x16x128xf32, #tpu.memory_space<vmem>>, vector<1x16x128xf32>
    %61 = vector.shape_cast %60 : vector<1x16x128xf32> to vector<16x128xf32>
    %62 = vector.shape_cast %58 : vector<16x128xf32> to vector<1x16x128xf32>
    tpu.vector_store %arg13[%59, %c0_28, %c0_29], %62 {strides = array<i32>} : memref<4x16x128xf32, #tpu.memory_space<vmem>>, vector<1x16x128xf32>,
    %cst_30 = arith.constant 1.000000e+00 : f32
    %63 = vector.broadcast %cst_30 : f32 to vector<8x128xf32>
    %64 = arith.subf %63, %44 : vector<8x128xf32>
    %65 = arith.mulf %33, %64 : vector<8x128xf32>
    %cst_31 = arith.constant 1.000000e+00 : f32
    %66 = vector.broadcast %cst_31 : f32 to vector<8x128xf32>
    %67 = arith.subf %66, %53 : vector<8x128xf32>
    %68 = arith.mulf %35, %67 : vector<8x128xf32>
    %c1_i32 = arith.constant 1 : i32
    %69 = arith.index_cast %c1_i32 : i32 to index
    %c0_32 = arith.constant 0 : index
    %c0_33 = arith.constant 0 : index
    %70 = vector.load %arg13[%69, %c0_32, %c0_33] : memref<4x16x128xf32, #tpu.memory_space<vmem>>, vector<1x16x128xf32>
    %71 = vector.shape_cast %70 : vector<1x16x128xf32> to vector<16x128xf32>
    %72 = arith.index_cast %c1_i32 : i32 to index
    %c0_34 = arith.constant 0 : index
    %c0_35 = arith.constant 0 : index
    %73 = vector.load %arg2[%72, %c0_34, %c0_35] : memref<4x16x128xbf16, #tpu.memory_space<vmem>>, vector<1x16x128xbf16>
    %74 = vector.shape_cast %73 : vector<1x16x128xbf16> to vector<16x128xbf16>
    %75 = arith.extf %74 : vector<16x128xbf16> to vector<16x128xf32>
    %76 = vector.extract_strided_slice %71 {offsets = [0, 0], sizes = [8, 128], strides = [1, 1]} : vector<16x128xf32> to vector<8x128xf32>
    %77 = arith.addf %65, %76 : vector<8x128xf32>
    %78 = vector.extract_strided_slice %71 {offsets = [8, 0], sizes = [8, 128], strides = [1, 1]} : vector<16x128xf32> to vector<8x128xf32>
    %79 = arith.addf %68, %78 : vector<8x128xf32>
    %80 = arith.truncf %77 : vector<8x128xf32> to vector<8x128xbf16>
    %cst_36 = arith.constant dense<0.000000e+00> : vector<8x128xf32>
    %81 = tpu.matmul %80, %21, %cst_36 {dimension_numbers = #tpu.dot_dimension_numbers<[1], [0], [0], [1], [0, 0, 1, 1], [], []>} : vector<8x128xbf16>, vector<128x128xbf16>, vector<8x128xf32> -> vector<8x128xf32>
    %82 = vector.broadcast %22 : vector<1x128xf32> to vector<8x128xf32>
    %83 = arith.addf %81, %82 : vector<8x128xf32>
    %84 = arith.negf %83 : vector<8x128xf32>
    %85 = math.exp %84 : vector<8x128xf32>
    %cst_37 = arith.constant 1.000000e+00 : f32
    %86 = vector.broadcast %cst_37 : f32 to vector<8x128xf32>
    %87 = arith.addf %86, %85 : vector<8x128xf32>
    %88 = arith.divf %86, %87 : vector<8x128xf32>
    %89 = arith.truncf %79 : vector<8x128xf32> to vector<8x128xbf16>
    %cst_38 = arith.constant dense<0.000000e+00> : vector<8x128xf32>
    %90 = tpu.matmul %89, %21, %cst_38 {dimension_numbers = #tpu.dot_dimension_numbers<[1], [0], [0], [1], [0, 0, 1, 1], [], []>} : vector<8x128xbf16>, vector<128x128xbf16>, vector<8x128xf32> -> vector<8x128xf32>
    %91 = vector.broadcast %22 : vector<1x128xf32> to vector<8x128xf32>
    %92 = arith.addf %90, %91 : vector<8x128xf32>
    %93 = arith.negf %92 : vector<8x128xf32>
    %94 = math.exp %93 : vector<8x128xf32>
    %cst_39 = arith.constant 1.000000e+00 : f32
    %95 = vector.broadcast %cst_39 : f32 to vector<8x128xf32>
    %96 = arith.addf %95, %94 : vector<8x128xf32>
    %97 = arith.divf %95, %96 : vector<8x128xf32>
    %98 = arith.mulf %77, %88 : vector<8x128xf32>
    %99 = arith.mulf %79, %97 : vector<8x128xf32>
    %100 = tpu.concatenate %98, %99 in 0 : vector<8x128xf32>, vector<8x128xf32> -> vector<16x128xf32>
    %101 = arith.subf %75, %71 : vector<16x128xf32>
    %102 = arith.addf %101, %100 : vector<16x128xf32>
    %103 = arith.index_cast %c1_i32 : i32 to index
    %c0_40 = arith.constant 0 : index
    %c0_41 = arith.constant 0 : index
    %104 = vector.load %arg13[%103, %c0_40, %c0_41] : memref<4x16x128xf32, #tpu.memory_space<vmem>>, vector<1x16x128xf32>
    %105 = vector.shape_cast %104 : vector<1x16x128xf32> to vector<16x128xf32>
    %106 = vector.shape_cast %102 : vector<16x128xf32> to vector<1x16x128xf32>
    tpu.vector_store %arg13[%103, %c0_40, %c0_41], %106 {strides = array<i32>} : memref<4x16x128xf32, #tpu.memory_space<vmem>>, vector<1x16x128xf32>,
    %cst_42 = arith.constant 1.000000e+00 : f32
    %107 = vector.broadcast %cst_42 : f32 to vector<8x128xf32>
    %108 = arith.subf %107, %88 : vector<8x128xf32>
    %109 = arith.mulf %77, %108 : vector<8x128xf32>
    %cst_43 = arith.constant 1.000000e+00 : f32
    %110 = vector.broadcast %cst_43 : f32 to vector<8x128xf32>
    %111 = arith.subf %110, %97 : vector<8x128xf32>
    %112 = arith.mulf %79, %111 : vector<8x128xf32>
    %c2_i32 = arith.constant 2 : i32
    %113 = arith.index_cast %c2_i32 : i32 to index
    %c0_44 = arith.constant 0 : index
    %c0_45 = arith.constant 0 : index
    %114 = vector.load %arg13[%113, %c0_44, %c0_45] : memref<4x16x128xf32, #tpu.memory_space<vmem>>, vector<1x16x128xf32>
    %115 = vector.shape_cast %114 : vector<1x16x128xf32> to vector<16x128xf32>
    %116 = arith.index_cast %c2_i32 : i32 to index
    %c0_46 = arith.constant 0 : index
    %c0_47 = arith.constant 0 : index
    %117 = vector.load %arg2[%116, %c0_46, %c0_47] : memref<4x16x128xbf16, #tpu.memory_space<vmem>>, vector<1x16x128xbf16>
    %118 = vector.shape_cast %117 : vector<1x16x128xbf16> to vector<16x128xbf16>
    %119 = arith.extf %118 : vector<16x128xbf16> to vector<16x128xf32>
    %120 = vector.extract_strided_slice %115 {offsets = [0, 0], sizes = [8, 128], strides = [1, 1]} : vector<16x128xf32> to vector<8x128xf32>
    %121 = arith.addf %109, %120 : vector<8x128xf32>
    %122 = vector.extract_strided_slice %115 {offsets = [8, 0], sizes = [8, 128], strides = [1, 1]} : vector<16x128xf32> to vector<8x128xf32>
    %123 = arith.addf %112, %122 : vector<8x128xf32>
    %124 = arith.truncf %121 : vector<8x128xf32> to vector<8x128xbf16>
    %cst_48 = arith.constant dense<0.000000e+00> : vector<8x128xf32>
    %125 = tpu.matmul %124, %21, %cst_48 {dimension_numbers = #tpu.dot_dimension_numbers<[1], [0], [0], [1], [0, 0, 1, 1], [], []>} : vector<8x128xbf16>, vector<128x128xbf16>, vector<8x128xf32> -> vector<8x128xf32>
    %126 = vector.broadcast %22 : vector<1x128xf32> to vector<8x128xf32>
    %127 = arith.addf %125, %126 : vector<8x128xf32>
    %128 = arith.negf %127 : vector<8x128xf32>
    %129 = math.exp %128 : vector<8x128xf32>
    %cst_49 = arith.constant 1.000000e+00 : f32
    %130 = vector.broadcast %cst_49 : f32 to vector<8x128xf32>
    %131 = arith.addf %130, %129 : vector<8x128xf32>
    %132 = arith.divf %130, %131 : vector<8x128xf32>
    %133 = arith.truncf %123 : vector<8x128xf32> to vector<8x128xbf16>
    %cst_50 = arith.constant dense<0.000000e+00> : vector<8x128xf32>
    %134 = tpu.matmul %133, %21, %cst_50 {dimension_numbers = #tpu.dot_dimension_numbers<[1], [0], [0], [1], [0, 0, 1, 1], [], []>} : vector<8x128xbf16>, vector<128x128xbf16>, vector<8x128xf32> -> vector<8x128xf32>
    %135 = vector.broadcast %22 : vector<1x128xf32> to vector<8x128xf32>
    %136 = arith.addf %134, %135 : vector<8x128xf32>
    %137 = arith.negf %136 : vector<8x128xf32>
    %138 = math.exp %137 : vector<8x128xf32>
    %cst_51 = arith.constant 1.000000e+00 : f32
    %139 = vector.broadcast %cst_51 : f32 to vector<8x128xf32>
    %140 = arith.addf %139, %138 : vector<8x128xf32>
    %141 = arith.divf %139, %140 : vector<8x128xf32>
    %142 = arith.mulf %121, %132 : vector<8x128xf32>
    %143 = arith.mulf %123, %141 : vector<8x128xf32>
    %144 = tpu.concatenate %142, %143 in 0 : vector<8x128xf32>, vector<8x128xf32> -> vector<16x128xf32>
    %145 = arith.subf %119, %115 : vector<16x128xf32>
    %146 = arith.addf %145, %144 : vector<16x128xf32>
    %147 = arith.index_cast %c2_i32 : i32 to index
    %c0_52 = arith.constant 0 : index
    %c0_53 = arith.constant 0 : index
    %148 = vector.load %arg13[%147, %c0_52, %c0_53] : memref<4x16x128xf32, #tpu.memory_space<vmem>>, vector<1x16x128xf32>
    %149 = vector.shape_cast %148 : vector<1x16x128xf32> to vector<16x128xf32>
    %150 = vector.shape_cast %146 : vector<16x128xf32> to vector<1x16x128xf32>
    tpu.vector_store %arg13[%147, %c0_52, %c0_53], %150 {strides = array<i32>} : memref<4x16x128xf32, #tpu.memory_space<vmem>>, vector<1x16x128xf32>,
    %cst_54 = arith.constant 1.000000e+00 : f32
    %151 = vector.broadcast %cst_54 : f32 to vector<8x128xf32>
    %152 = arith.subf %151, %132 : vector<8x128xf32>
    %153 = arith.mulf %121, %152 : vector<8x128xf32>
    %cst_55 = arith.constant 1.000000e+00 : f32
    %154 = vector.broadcast %cst_55 : f32 to vector<8x128xf32>
    %155 = arith.subf %154, %141 : vector<8x128xf32>
    %156 = arith.mulf %123, %155 : vector<8x128xf32>
    %c3_i32 = arith.constant 3 : i32
    %157 = arith.index_cast %c3_i32 : i32 to index
    %c0_56 = arith.constant 0 : index
    %c0_57 = arith.constant 0 : index
    %158 = vector.load %arg13[%157, %c0_56, %c0_57] : memref<4x16x128xf32, #tpu.memory_space<vmem>>, vector<1x16x128xf32>
    %159 = vector.shape_cast %158 : vector<1x16x128xf32> to vector<16x128xf32>
    %160 = arith.index_cast %c3_i32 : i32 to index
    %c0_58 = arith.constant 0 : index
    %c0_59 = arith.constant 0 : index
    %161 = vector.load %arg2[%160, %c0_58, %c0_59] : memref<4x16x128xbf16, #tpu.memory_space<vmem>>, vector<1x16x128xbf16>
    %162 = vector.shape_cast %161 : vector<1x16x128xbf16> to vector<16x128xbf16>
    %163 = arith.extf %162 : vector<16x128xbf16> to vector<16x128xf32>
    %164 = vector.extract_strided_slice %159 {offsets = [0, 0], sizes = [8, 128], strides = [1, 1]} : vector<16x128xf32> to vector<8x128xf32>
    %165 = arith.addf %153, %164 : vector<8x128xf32>
    %166 = vector.extract_strided_slice %159 {offsets = [8, 0], sizes = [8, 128], strides = [1, 1]} : vector<16x128xf32> to vector<8x128xf32>
    %167 = arith.addf %156, %166 : vector<8x128xf32>
    %168 = arith.truncf %165 : vector<8x128xf32> to vector<8x128xbf16>
    %cst_60 = arith.constant dense<0.000000e+00> : vector<8x128xf32>
    %169 = tpu.matmul %168, %21, %cst_60 {dimension_numbers = #tpu.dot_dimension_numbers<[1], [0], [0], [1], [0, 0, 1, 1], [], []>} : vector<8x128xbf16>, vector<128x128xbf16>, vector<8x128xf32> -> vector<8x128xf32>
    %170 = vector.broadcast %22 : vector<1x128xf32> to vector<8x128xf32>
    %171 = arith.addf %169, %170 : vector<8x128xf32>
    %172 = arith.negf %171 : vector<8x128xf32>
    %173 = math.exp %172 : vector<8x128xf32>
    %cst_61 = arith.constant 1.000000e+00 : f32
    %174 = vector.broadcast %cst_61 : f32 to vector<8x128xf32>
    %175 = arith.addf %174, %173 : vector<8x128xf32>
    %176 = arith.divf %174, %175 : vector<8x128xf32>
    %177 = arith.truncf %167 : vector<8x128xf32> to vector<8x128xbf16>
    %cst_62 = arith.constant dense<0.000000e+00> : vector<8x128xf32>
    %178 = tpu.matmul %177, %21, %cst_62 {dimension_numbers = #tpu.dot_dimension_numbers<[1], [0], [0], [1], [0, 0, 1, 1], [], []>} : vector<8x128xbf16>, vector<128x128xbf16>, vector<8x128xf32> -> vector<8x128xf32>
    %179 = vector.broadcast %22 : vector<1x128xf32> to vector<8x128xf32>
    %180 = arith.addf %178, %179 : vector<8x128xf32>
    %181 = arith.negf %180 : vector<8x128xf32>
    %182 = math.exp %181 : vector<8x128xf32>
    %cst_63 = arith.constant 1.000000e+00 : f32
    %183 = vector.broadcast %cst_63 : f32 to vector<8x128xf32>
    %184 = arith.addf %183, %182 : vector<8x128xf32>
    %185 = arith.divf %183, %184 : vector<8x128xf32>
    %186 = arith.mulf %165, %176 : vector<8x128xf32>
    %187 = arith.mulf %167, %185 : vector<8x128xf32>
    %188 = tpu.concatenate %186, %187 in 0 : vector<8x128xf32>, vector<8x128xf32> -> vector<16x128xf32>
    %189 = arith.subf %163, %159 : vector<16x128xf32>
    %190 = arith.addf %189, %188 : vector<16x128xf32>
    %191 = arith.index_cast %c3_i32 : i32 to index
    %c0_64 = arith.constant 0 : index
    %c0_65 = arith.constant 0 : index
    %192 = vector.load %arg13[%191, %c0_64, %c0_65] : memref<4x16x128xf32, #tpu.memory_space<vmem>>, vector<1x16x128xf32>
    %193 = vector.shape_cast %192 : vector<1x16x128xf32> to vector<16x128xf32>
    %194 = vector.shape_cast %190 : vector<16x128xf32> to vector<1x16x128xf32>
    tpu.vector_store %arg13[%191, %c0_64, %c0_65], %194 {strides = array<i32>} : memref<4x16x128xf32, #tpu.memory_space<vmem>>, vector<1x16x128xf32>,
    %cst_66 = arith.constant 1.000000e+00 : f32
    %195 = vector.broadcast %cst_66 : f32 to vector<8x128xf32>
    %196 = arith.subf %195, %176 : vector<8x128xf32>
    %197 = arith.mulf %165, %196 : vector<8x128xf32>
    %cst_67 = arith.constant 1.000000e+00 : f32
    %198 = vector.broadcast %cst_67 : f32 to vector<8x128xf32>
    %199 = arith.subf %198, %185 : vector<8x128xf32>
    %200 = arith.mulf %167, %199 : vector<8x128xf32>
    %c4_i32 = arith.constant 4 : i32
    %c0_68 = arith.constant 0 : index
    %c0_69 = arith.constant 0 : index
    %201 = vector.load %arg12[%c0_68, %c0_69] : memref<16x128xf32, #tpu.memory_space<vmem>>, vector<8x128xf32>
    tpu.vector_store %arg12[%c0_68, %c0_69], %197 {strides = array<i32>} : memref<16x128xf32, #tpu.memory_space<vmem>>, vector<8x128xf32>,
    %c8_70 = arith.constant 8 : index
    %c0_71 = arith.constant 0 : index
    %202 = vector.load %arg12[%c8_70, %c0_71] : memref<16x128xf32, #tpu.memory_space<vmem>>, vector<8x128xf32>
    tpu.vector_store %arg12[%c8_70, %c0_71], %200 {strides = array<i32>} : memref<16x128xf32, #tpu.memory_space<vmem>>, vector<8x128xf32>,
    %c0_72 = arith.constant 0 : index
    %c0_73 = arith.constant 0 : index
    %c0_74 = arith.constant 0 : index
    %203 = vector.load %arg13[%c0_72, %c0_73, %c0_74] : memref<4x16x128xf32, #tpu.memory_space<vmem>>, vector<4x16x128xf32>
    %204 = vector.shape_cast %203 : vector<4x16x128xf32> to vector<64x128xf32>
    %205 = arith.truncf %204 : vector<64x128xf32> to vector<64x128xbf16>
    %c0_75 = arith.constant 0 : index
    %c0_76 = arith.constant 0 : index
    %206 = vector.load %arg7[%c0_75, %c0_76] : memref<128x128xbf16, #tpu.memory_space<vmem>>, vector<128x128xbf16>
    %cst_77 = arith.constant dense<0.000000e+00> : vector<64x128xf32>
    %207 = tpu.matmul %205, %206, %cst_77 {dimension_numbers = #tpu.dot_dimension_numbers<[1], [0], [0], [1], [0, 0, 1, 1], [], []>} : vector<64x128xbf16>, vector<128x128xbf16>, vector<64x128xf32> -> vector<64x128xf32>
    %c0_78 = arith.constant 0 : index
    %c0_79 = arith.constant 0 : index
    %208 = vector.load %arg8[%c0_78, %c0_79] : memref<1x128xf32, #tpu.memory_space<vmem>>, vector<1x128xf32>
    %209 = vector.broadcast %208 : vector<1x128xf32> to vector<64x128xf32>
    %210 = arith.addf %207, %209 : vector<64x128xf32>
    %cst_80 = arith.constant 0.000000e+00 : f32
    %211 = vector.broadcast %cst_80 : f32 to vector<64x128xf32>
    %212 = arith.maximumf %210, %211 : vector<64x128xf32>
    %cst_81 = arith.constant dense<0.000000e+00> : vector<64xf32>
    %213 = vector.multi_reduction <add>, %212, %cst_81 [1] : vector<64x128xf32> to vector<64xf32>
    %214 = vector.shape_cast %213 : vector<64xf32> to vector<64x1xf32>
    %cst_82 = arith.constant 3.125000e-02 : f32
    %215 = vector.broadcast %cst_82 : f32 to vector<64x1xf32>
    %216 = arith.mulf %214, %215 : vector<64x1xf32>
    %217 = vector.broadcast %216 : vector<64x1xf32> to vector<64x128xf32>
    %218 = arith.subf %212, %217 : vector<64x128xf32>
    %219 = arith.mulf %218, %218 : vector<64x128xf32>
    %220 = tpu.iota {dimensions = array<i32: 1>} : vector<1x128xi32>
    %c32_i32 = arith.constant 32 : i32
    %221 = vector.broadcast %c32_i32 : i32 to vector<1x128xi32>
    %222 = arith.cmpi slt, %220, %221 : vector<1x128xi32>
    %223 = arith.extui %222 : vector<1x128xi1> to vector<1x128xi32>
    %224 = arith.sitofp %223 : vector<1x128xi32> to vector<1x128xf32>
    %225 = vector.broadcast %224 : vector<1x128xf32> to vector<64x128xf32>
    %226 = arith.mulf %219, %225 : vector<64x128xf32>
    %cst_83 = arith.constant dense<0.000000e+00> : vector<64xf32>
    %227 = vector.multi_reduction <add>, %226, %cst_83 [1] : vector<64x128xf32> to vector<64xf32>
    %228 = vector.shape_cast %227 : vector<64xf32> to vector<64x1xf32>
    %cst_84 = arith.constant 3.125000e-02 : f32
    %229 = vector.broadcast %cst_84 : f32 to vector<64x1xf32>
    %230 = arith.mulf %228, %229 : vector<64x1xf32>
    %cst_85 = arith.constant 9.99999974E-6 : f32
    %231 = vector.broadcast %cst_85 : f32 to vector<64x1xf32>
    %232 = arith.addf %230, %231 : vector<64x1xf32>
    %233 = math.rsqrt %232 : vector<64x1xf32>
    %234 = vector.broadcast %233 : vector<64x1xf32> to vector<64x128xf32>
    %235 = arith.mulf %218, %234 : vector<64x128xf32>
    %c0_86 = arith.constant 0 : index
    %c0_87 = arith.constant 0 : index
    %236 = vector.load %arg9[%c0_86, %c0_87] : memref<1x128xf32, #tpu.memory_space<vmem>>, vector<1x128xf32>
    %237 = vector.broadcast %236 : vector<1x128xf32> to vector<64x128xf32>
    %238 = arith.mulf %235, %237 : vector<64x128xf32>
    %c0_88 = arith.constant 0 : index
    %c0_89 = arith.constant 0 : index
    %239 = vector.load %arg10[%c0_88, %c0_89] : memref<1x128xf32, #tpu.memory_space<vmem>>, vector<1x128xf32>
    %240 = vector.broadcast %239 : vector<1x128xf32> to vector<64x128xf32>
    %241 = arith.addf %238, %240 : vector<64x128xf32>
    %242 = vector.shape_cast %241 : vector<64x128xf32> to vector<4x16x128xf32>
    %c0_90 = arith.constant 0 : index
    %c0_91 = arith.constant 0 : index
    %c0_92 = arith.constant 0 : index
    %243 = vector.load %arg11[%c0_90, %c0_91, %c0_92] : memref<4x16x128xf32, #tpu.memory_space<vmem>>, vector<4x16x128xf32>
    tpu.vector_store %arg11[%c0_90, %c0_91, %c0_92], %242 {strides = array<i32>} : memref<4x16x128xf32, #tpu.memory_space<vmem>>, vector<4x16x128xf32>,
    return
  }
  func.func @transform_0(%arg0: i32, %arg1: i32) -> (i32, i32, i32) {
    %c0_i32 = arith.constant 0 : i32
    %c0_i32_0 = arith.constant 0 : i32
    return %arg1, %arg0, %c0_i32 : i32, i32, i32
  }
  func.func @transform_1(%arg0: i32, %arg1: i32) -> (i32, i32) {
    %c0_i32 = arith.constant 0 : i32
    %c0_i32_0 = arith.constant 0 : i32
    %c0_i32_1 = arith.constant 0 : i32
    return %c0_i32, %c0_i32_0 : i32, i32
  }
  func.func @transform_2(%arg0: i32, %arg1: i32) -> (i32, i32) {
    %c0_i32 = arith.constant 0 : i32
    %c0_i32_0 = arith.constant 0 : i32
    %c0_i32_1 = arith.constant 0 : i32
    return %c0_i32, %c0_i32_0 : i32, i32
  }
  func.func @transform_3(%arg0: i32, %arg1: i32) -> (i32, i32) {
    %c0_i32 = arith.constant 0 : i32
    %c0_i32_0 = arith.constant 0 : i32
    %c0_i32_1 = arith.constant 0 : i32
    return %c0_i32, %c0_i32_0 : i32, i32
  }
  func.func @transform_4(%arg0: i32, %arg1: i32) -> (i32, i32) {
    %c0_i32 = arith.constant 0 : i32
    %c0_i32_0 = arith.constant 0 : i32
    %c0_i32_1 = arith.constant 0 : i32
    return %c0_i32, %c0_i32_0 : i32, i32
  }
  func.func @transform_5(%arg0: i32, %arg1: i32) -> (i32, i32) {
    %c0_i32 = arith.constant 0 : i32
    %c0_i32_0 = arith.constant 0 : i32
    %c0_i32_1 = arith.constant 0 : i32
    return %c0_i32, %c0_i32_0 : i32, i32
  }
  func.func @transform_6(%arg0: i32, %arg1: i32) -> (i32, i32) {
    %c0_i32 = arith.constant 0 : i32
    %c0_i32_0 = arith.constant 0 : i32
    %c0_i32_1 = arith.constant 0 : i32
    return %c0_i32, %c0_i32_0 : i32, i32
  }
  func.func @transform_7(%arg0: i32, %arg1: i32) -> (i32, i32) {
    %c0_i32 = arith.constant 0 : i32
    %c0_i32_0 = arith.constant 0 : i32
    %c0_i32_1 = arith.constant 0 : i32
    return %c0_i32, %c0_i32_0 : i32, i32
  }
  func.func @transform_8(%arg0: i32, %arg1: i32) -> (i32, i32) {
    %c0_i32 = arith.constant 0 : i32
    %c0_i32_0 = arith.constant 0 : i32
    %c0_i32_1 = arith.constant 0 : i32
    return %c0_i32, %c0_i32_0 : i32, i32
  }
  func.func @transform_9(%arg0: i32, %arg1: i32) -> (i32, i32, i32) {
    %c0_i32 = arith.constant 0 : i32
    %c0_i32_0 = arith.constant 0 : i32
    return %arg1, %arg0, %c0_i32 : i32, i32, i32
  }
}

</mosaic_0001>

<bundles_post_ra>
// kernel: tpu_custom_call.1
= control target key start
LH: loop header
LB: loop body
LE: loop exit
PB: predicated region body
PF: predicated region fallthrough
CT: control target
= control target key end

     0   :  { %s2906_s0 = inlined_call_operand.hbm [shape: bf16[8,16,128], index: 0, kind: input, shape index: {}]   ;;  %s2907_s1 = inlined_call_operand.hbm [shape: bf16[128,128], index: 1, kind: input, shape index: {}]   ;;  %s2908_s2 = inlined_call_operand.vmem [shape: f32[1,128], index: 2, kind: input, shape index: {}]   ;;  %s2909_s3 = inlined_call_operand.hbm [shape: bf16[128,128], index: 3, kind: input, shape index: {}]   ;;  %s2910_s4 = inlined_call_operand.vmem [shape: f32[1,128], index: 4, kind: input, shape index: {}]   ;;  %s2911_s5 = inlined_call_operand.hbm [shape: bf16[128,128], index: 5, kind: input, shape index: {}]   ;;  %s2912_s6 = inlined_call_operand.vmem [shape: f32[1,128], index: 6, kind: input, shape index: {}]   ;;  %s2913_s7 = inlined_call_operand.vmem [shape: f32[1,128], index: 7, kind: input, shape index: {}]   ;;  %s2914_s8 = inlined_call_operand.vmem [shape: f32[1,128], index: 8, kind: input, shape index: {}]   ;;  %s2915_s9 = inlined_call_operand.hbm [shape: f32[8,16,128], index: 9, kind: output, shape index: {}]  }
   0x1   :  { %2923 = sst [smem:[#allocation21_spill]] %s2907_s1 }
   0x2   :  { %2924 = sst [smem:[#allocation22_spill]] %s2909_s3 }
   0x3   :  { %2925 = sst [smem:[#allocation23_spill]] %s2911_s5 }
   0x4   :  { %14 = vsyncpa [#allocation5], 0 }
   0x5   :  { %16 = vsyncpa [#allocation5 + $0x1], 0 }
   0x6   :  { %17 = vsyncpa [#allocation8], 0 }
   0x7   :  { %18 = vsyncpa [#allocation11], 0 }
   0x8   :  { %19 = vsyncpa [#allocation6], 0 }
   0x9   :  { %21 = vsyncpa [#allocation6 + $0x1], 0  ;;  %s2289_s30 = smov 0   ;;  %s2291_s10 = smov 0  }
   0xa   :  { %s2293_s11 = smov 0   ;;  %s2295_s12 = smov 0  }
   0xb   :  { %s2297_s13 = smov 0   ;;  %s2299_s14 = smov 0  }
   0xc LB: > { %2926 = sst [smem:[#allocation17_spill]] %s2208_s30  ;;  %s1624_s15 = sadd.s32 4294967295, %s2228_s14   ;;  %s2228_s14 = sphi %s2299_s14, %s27_s14   ;;  %s2224_s13 = sphi %s2297_s13, %s2965_s13   ;;  %s2220_s12 = sphi %s2295_s12, %s2964_s12   ;;  %s2216_s11 = sphi %s2293_s11, %s2963_s11   ;;  %s2212_s10 = sphi %s2291_s10, %s2962_s10   ;;  %s2208_s30 = sphi %s2289_s30, %s2961_s30  }
   0xd   : > { %2927 = sst [smem:[#allocation18_spill]] %s2228_s14  ;;  %s1625_s16 = sadd.s32 4294967294, %s2228_s14  }
   0xe   : > { %p61_p0 = scmp.ne.s32.totalorder %s2212_s10, %s2208_s30  ;;  %p2323_p1 = scmp.eq.s32.totalorder %s1624_s15, 0 }
   0xf   : > { %p2327_p2 = scmp.eq.s32.totalorder %s1624_s15, 1  ;;  %p261_p3 = scmp.eq.s32.totalorder %s1625_s16, 1 }
  0x10   : > { %p2333_p4 = por %p2323_p1, %p61_p0  ;;  %p1626_p5 = scmp.ge.s32.totalorder %s2228_s14, 1 }
  0x11   : > { %p2338_p6 = por %p261_p3, %p61_p0  ;;  %p268_p7 = scmp.lt.s32.totalorder %s2228_s14, 3 }
  0x12   : > { %s2933_s1 = sld [smem:[#allocation21_spill]]  ;;  %s2230_s25 = smov [#allocation7]  }
  0x13   : > { %s2931_s20 = scalar_select %p2338_p6, 1, 0 }
  0x14   : > { %p2346_p8 = pnand %p1626_p5, %p268_p7  ;;  %s281_s26 = sshll.u32 %s2230_s25, 4  ;;  %s282_s26 = int_to_ptr.vmem [resolvable:$true] %s281_s26 }
  0x15   : > { %2932 = sst [smem:[#allocation19_spill]] %s2931_s20  ;;  %p1630_p11 = scmp.ge.s32.totalorder %s2228_s14, 2 }
  0x16   : > { %p1850_p9 = pneg %p2346_p8  ;;  %s2936_s3 = sld [smem:[#allocation22_spill]] }
  0x17   : > { %s2917_s16 = smov 64   ;;  %s2918_s21 = smov 4  }
  0x18   : > { %s279_s23 = sshll.u32 %s2933_s1, 4  ;;  %p2354_p10 = pnand %p1850_p9, %p2323_p1  ;;  %s280_s23 = int_to_ptr.hbm [resolvable:$true] %s279_s23 }
  0x19   : > { %s2233_s22 = smov [#allocation9]   ;;  %s2937_s5 = sld [smem:[#allocation23_spill]] }
  0x1a   : > { %1853 = dma.hbm_to_vmem [thread:$0]  (!%p2354_p10), %s280_s23, 1024, %s282_s26, [#allocation8], %s2917_s16, %s2917_s16, %s2918_s21  }
  0x1b   : > { %s298_s25 = sshll.u32 %s2233_s22, 4  ;;  %s2234_s29 = smov [#allocation10]   ;;  %s299_s25 = int_to_ptr.vmem [resolvable:$true] %s298_s25 }
  0x1c   : > { %s296_s15 = sshll.u32 %s2936_s3, 4  ;;  %s315_s3 = sshll.u32 %s2234_s29, 4  ;;  %s297_s15 = int_to_ptr.hbm [resolvable:$true] %s296_s15  ;;  %s316_s3 = int_to_ptr.vmem [resolvable:$true] %s315_s3 }
  0x1d   : > { %1856 = dma.hbm_to_vmem [thread:$0]  (!%p2354_p10), %s297_s15, 1024, %s299_s25, [#allocation8], %s2917_s16, %s2917_s16, %s2918_s21  }
  0x1e   : > { %s36_s1 = sadd.s32 1, %s2224_s13  ;;  %s48_s20 = sadd.s32 1, %s2216_s11 }
  0x1f   : > { %s313_s28 = sshll.u32 %s2937_s5, 4  ;;  %p37_p12 = scmp.ge.s32.totalorder %s36_s1, 2  ;;  %s314_s28 = int_to_ptr.hbm [resolvable:$true] %s313_s28 }
  0x20   : > { %1859 = dma.hbm_to_vmem [thread:$0]  (!%p2354_p10), %s314_s28, 1024, %s316_s3, [#allocation11], %s2917_s16, %s2917_s16, %s2918_s21  }
  0x21   : > { %p55_p13 = scmp.ne.s32.totalorder %s2216_s11, %s2212_s10  ;;  %p56_p0 = scmp.eq.s32.totalorder %s2228_s14, 0 }
  0x22   : > { %s2967_s1 = smov (%p37_p12, %s36_s1), 0  ;;  %p1871_p7 = scmp.lt.s32.totalorder %s2228_s14, 2 }
  0x23   : > { %2938 = sst [smem:[#allocation20_spill]] %s2967_s1  ;;  %p2387_p3 = por %p56_p0, %p55_p13 }
  0x24   : > { %p2393_p5 = por %p2327_p2, %p55_p13  ;;  %s43_s27 = ssub.s32 %s2224_s13, %s2967_s1 }
  0x25   : > { %p46_p9 = scmp.eq.s32.totalorder %s43_s27, 0  ;;  %s338_s3 = sand.u32 1, %s2216_s11  }
  0x26   : > { %s1631_s15 = sshll.u32 %s338_s3, 5  ;;  %s1784_s25 = sshll.u32 %s2224_s13, 5 }
  0x27   : > { %s2402_s22 = scalar_select %p46_p9, %s2216_s11, %s48_s20  }
  0x28   : > { %s350_s16 = scalar_lea.hbm %s2906_s0, %s1784_s25  ;;  %s342_s21 = scalar_lea.vmem [#allocation4], %s1631_s15 }
  0x29   : > { %s353_s5 = sshll.u32 %s342_s21, 4  ;;  %s351_s18 = sshll.u32 %s350_s16, 4  ;;  %s354_s5 = int_to_ptr.vmem [resolvable:$true] %s353_s5  ;;  %s352_s18 = int_to_ptr.hbm [resolvable:$true] %s351_s18 }
  0x2a   : > { %p1861_p2 = pnand %p1871_p7, %p2387_p3  ;;  %s339_s30 = scalar_lea.sflag [#allocation5], %s338_s3 }
  0x2b   : > { %s2941_s1 = smov 4   ;;  %s2942_s14 = smov 64  }
  0x2c   : > { %1863 = dma.hbm_to_vmem [thread:$0]  (!%p1861_p2), %s352_s18, 512, %s354_s5, %s339_s30, %s2942_s14, %s2942_s14, %s2941_s1  }
  0x2d   : > { %365 = sbr.rel (%p2346_p8) target bundleno = 1351 (0x547), region = 56  ;;  %s2416_s20 = sand.u32 (!%p2346_p8), 1, %s2212_s10  }
  0x2e   : > { %s1636_s21 = sshll.u32 (!%p2346_p8), %s2416_s20, 5  ;;  %s368_s16 = scalar_lea.sflag (!%p2346_p8), [#allocation5], %s2416_s20 }
  0x2f   : > { %s2420_s27 = scalar_lea.vmem (!%p2346_p8), [#allocation4], %s1636_s21 }
  0x32   : > { %2191 = dma.done.wait (%p2333_p4), %s368_s16, 512  }
  0x33   : > { %2193 = vsyncadd (%p2333_p4), %s368_s16, 4294966784 }
  0x34   : > { %2195 = dma.done.wait (%p2323_p1), [#allocation8], 2048  }
  0x35   : > { %2197 = vsyncadd (%p2323_p1), [#allocation8], 4294965248 }
  0x36   : > { %2199 = dma.done.wait (%p2323_p1), [#allocation11], 1024  }
  0x37   : > { %2201 = vsyncadd (%p2323_p1), [#allocation11], 4294966272  ;;  %s1640_s5 = sshll.u32 %s2416_s20, 6  ;;  %p1641_p8 = scmp.ne.s32.totalorder %s2220_s12, 0 }
  0x38   : > { %s2435_s30 = scalar_lea.vmem [#allocation12], %s1640_s5 }
  0x39   : > { %429 = sbr.rel (%p1641_p8) target bundleno = 65 (0x41), region = 76 }
  0x3e   : > { %v2235_v0 = vmov 0.0  }
  0x3f   : > { %430 = vst [vmem:[#allocation2] sm:$0xff] %v2235_v0 }
  0x40   : > { %431 = vst [vmem:[#allocation2 + $0x8] sm:$0xff] %v2235_v0 }
  0x41 PF: > { %v1796_v1 = vld [vmem:[#allocation7 + $0x38] sm:$0xff]  ;;  %v1795_v2 = vld [vmem:[#allocation7 + $0x30] sm:$0xff]  ;;  %v1794_v3 = vld [vmem:[#allocation7 + $0x28] sm:$0xff]  ;;  %s1814_s29 = sshll.u32 %s2220_s12, 6  ;;  %s1490_s5 = scalar_lea.sflag [#allocation6], %s2416_s20 }
  0x42   : > { %540 = vmatpush.bf16.msra.mxu0 %v1796_v1  ;;  %v1793_v4 = vld [vmem:[#allocation7 + $0x20] sm:$0xff]  ;;  %v1792_v5 = vld [vmem:[#allocation7 + $0x18] sm:$0xff]  ;;  %v1791_v6 = vld [vmem:[#allocation7 + $0x10] sm:$0xff]  ;;  %s1504_s16 = scalar_lea.hbm %s2915_s9, %s1814_s29  ;;  %s2158_s1 = scalar_lea.hbm %s2915_s9, 128 }
  0x43   : > { %v1790_v7 = vld [vmem:[#allocation7 + $0x8] sm:$0xff]  ;;  %v1789_v8 = vld [vmem:[#allocation7] sm:$0xff]  ;;  %v2439_v10 = vld [vmem:[#allocation9 + $0x38] sm:$0xff]  ;;  %s1507_s12 = sshll.u32 %s1504_s16, 4  ;;  %s1508_s12 = int_to_ptr.hbm [resolvable:$true] %s1507_s12 }
  0x44   : > { %v1785_v9 = vld [vmem:[%s2420_s27] sm:$0xff]  ;;  %824 = vmatpush.bf16.msra.mxu1 %v2439_v10  ;;  %857 = vmatpush.bf16.msra.mxu3 %v2439_v10  ;;  %v2445_v11 = vld [vmem:[#allocation9 + $0x30] sm:$0xff]  ;;  %v2451_v12 = vld [vmem:[#allocation9 + $0x28] sm:$0xff]  ;;  %s2152_s14 = sshra.s32 %s1508_s12, 4  ;;  %s2153_s14 = int_to_ptr.hbm [resolvable:$true] %s2152_s14 }
  0x45   : > { %1000 = vmatpush.bf16.msra.mxu2 %v2439_v10  ;;  %v2457_v13 = vld [vmem:[#allocation9 + $0x20] sm:$0xff]  ;;  %v1786_v14 = vld [vmem:[%s2420_s27 + $0x8] sm:$0xff]  ;;  %v2464_v15 = vld [vmem:[#allocation9 + $0x18] sm:$0xff]  ;;  %s2154_s17 = scalar_lea.hbm %s2153_s14, 64  ;;  %p2159_p12 = scmp.lt.s32.totalorder %s2153_s14, %s2915_s9 }
  0x46   : > { %541 = vmatpush.bf16.msra.mxu0 %v1795_v2  ;;  %v2469_v16 = vld [vmem:[#allocation9 + $0x10] sm:$0xff]  ;;  %v2480_v18 = vld [vmem:[#allocation9 + $0x8] sm:$0xff]  ;;  %v2485_v21 = vld [vmem:[#allocation9] sm:$0xff]  ;;  %p2155_p1 = scmp.ne.s32.totalorder %s2153_s14, %s2154_s17  ;;  %p2160_p13 = scmp.lt.s32.totalorder %s2158_s1, %s2154_s17 }
  0x47   : > { %v2476_v17 = vld [vmem:[%s2908_s2] ss:$0 sm:$0xff]  ;;  %v432_v36 = vld [vmem:[%s2420_s27] sm:$0xff]   ;;  %v763_v59 = vld [vmem:[#allocation2 + $0x8] sm:$0xff] }
  0x48   : > { %825 = vmatpush.bf16.msra.mxu1 %v2445_v11  ;;  %858 = vmatpush.bf16.msra.mxu3 %v2445_v11  ;;  %v440_v41 = vunpack.c.l.bf16 %v432_v36  ;;  %v762_v46 = vld [vmem:[#allocation2] sm:$0xff]  ;;  %v441_v55 = vunpack.c.h.bf16 %v432_v36  ;;  %p2156_p4 = pnand %p2155_p1, %p2393_p5  ;;  %p2161_p0 = por %p2160_p13, %p2159_p12 }
  0x49   : > { %1001 = vmatpush.bf16.msra.mxu2 %v2445_v11 }
  0x4a   : > { %542 = vmatpush.bf16.msra.mxu0 %v1794_v3  ;;  %p2157_p10 = pneg %p2156_p4 }
  0x4c   : > { %826 = vmatpush.bf16.msra.mxu1 %v2451_v12  ;;  %859 = vmatpush.bf16.msra.mxu3 %v2451_v12  ;;  %p2162_p3 = pnand %p2161_p0, %p2157_p10 }
  0x4d   : > { %1002 = vmatpush.bf16.msra.mxu2 %v2451_v12 }
  0x4e   : > { %543 = vmatpush.bf16.msra.mxu0 %v1793_v4  ;;  %v1787_v4 = vld [vmem:[%s2420_s27 + $0x10] sm:$0xff] }
  0x50   : > { %827 = vmatpush.bf16.msra.mxu1 %v2457_v13  ;;  %860 = vmatpush.bf16.msra.mxu3 %v2457_v13 }
  0x51   : > { %1003 = vmatpush.bf16.msra.mxu2 %v2457_v13 }
  0x52   : > { %544 = vmatpush.bf16.msra.mxu0 %v1792_v5 }
  0x54   : > { %828 = vmatpush.bf16.msra.mxu1 %v2464_v15  ;;  %861 = vmatpush.bf16.msra.mxu3 %v2464_v15 }
  0x55   : > { %1004 = vmatpush.bf16.msra.mxu2 %v2464_v15 }
  0x56   : > { %545 = vmatpush.bf16.msra.mxu0 %v1791_v6 }
  0x58   : > { %829 = vmatpush.bf16.msra.mxu1 %v2469_v16  ;;  %862 = vmatpush.bf16.msra.mxu3 %v2469_v16 }
  0x59   : > { %1005 = vmatpush.bf16.msra.mxu2 %v2469_v16 }
  0x5a   : > { %546 = vmatpush.bf16.msra.mxu0 %v1790_v7 }
  0x5c   : > { %830 = vmatpush.bf16.msra.mxu1 %v2480_v18  ;;  %863 = vmatpush.bf16.msra.mxu3 %v2480_v18 }
  0x5d   : > { %1006 = vmatpush.bf16.msra.mxu2 %v2480_v18 }
  0x5e   : > { %547 = vmatpush.bf16.msra.mxu0 %v1789_v8  ;;  %v2548_v8 = vld [vmem:[%s2910_s4] ss:$0 sm:$0xff] }
  0x60   : > { %831 = vmatpush.bf16.msra.mxu1 %v2485_v21  ;;  %864 = vmatpush.bf16.msra.mxu3 %v2485_v21 }
  0x61   : > { %548 = vmatmul.bf16.vlgmr.msra.gmra.mxu0 %v1785_v9  ;;  %1007 = vmatpush.bf16.msra.mxu2 %v2485_v21 }
  0x62   : > { %1088 = vmatpush.bf16.msrb.mxu0 %v2439_v10 }
  0x64   : > { %945 = vmatpush.bf16.msrb.mxu1 %v2439_v10  ;;  %912 = vmatpush.bf16.msrb.mxu3 %v2439_v10 }
  0x66   : > { %1089 = vmatpush.bf16.msrb.mxu0 %v2445_v11 }
  0x68   : > { %946 = vmatpush.bf16.msrb.mxu1 %v2445_v11  ;;  %913 = vmatpush.bf16.msrb.mxu3 %v2445_v11 }
  0x6a   : > { %1090 = vmatpush.bf16.msrb.mxu0 %v2451_v12 }
  0x6c   : > { %947 = vmatpush.bf16.msrb.mxu1 %v2451_v12  ;;  %914 = vmatpush.bf16.msrb.mxu3 %v2451_v12 }
  0x6e   : > { %1091 = vmatpush.bf16.msrb.mxu0 %v2457_v13 }
  0x70   : > { %948 = vmatpush.bf16.msrb.mxu1 %v2457_v13  ;;  %915 = vmatpush.bf16.msrb.mxu3 %v2457_v13 }
  0x71   : > { %553 = vmatmul.bf16.gmra.mxu0 %v1786_v14 }
  0x72   : > { %1092 = vmatpush.bf16.msrb.mxu0 %v2464_v15 }
  0x74   : > { %949 = vmatpush.bf16.msrb.mxu1 %v2464_v15  ;;  %916 = vmatpush.bf16.msrb.mxu3 %v2464_v15 }
  0x76   : > { %1093 = vmatpush.bf16.msrb.mxu0 %v2469_v16 }
  0x78   : > { %950 = vmatpush.bf16.msrb.mxu1 %v2469_v16  ;;  %917 = vmatpush.bf16.msrb.mxu3 %v2469_v16 }
  0x7a   : > { %1094 = vmatpush.bf16.msrb.mxu0 %v2480_v18 }
  0x7c   : > { %951 = vmatpush.bf16.msrb.mxu1 %v2480_v18  ;;  %918 = vmatpush.bf16.msrb.mxu3 %v2480_v18 }
  0x7e   : > { %1095 = vmatpush.bf16.msrb.mxu0 %v2485_v21 }
  0x80   : > { %952 = vmatpush.bf16.msrb.mxu1 %v2485_v21  ;;  %919 = vmatpush.bf16.msrb.mxu3 %v2485_v21 }
  0x81   : > { %558 = vmatmul.bf16.gmra.mxu0 %v1787_v4 }
  0xde   : > { %v549_v19 = vpop.f32.mrf.mxu0 }
  0xdf   : > { %v550_v20 = vadd.f32 %v2476_v17, %v549_v19 }
  0xe1   : > { %v1690_v22 = vmul.f32 -1.442695, %v550_v20 }
  0xe3   : > { %1938 = vpow2.f32 %v1690_v22 }
  0xe6   : > { %v551_v23 = vpop.f32.mrf.mxu0 }
  0xe7   : > { %v552_v24 = vadd.f32 %v2476_v17, %v551_v23 }
  0xe9   : > { %v1939_v25 = vpop.eup %1938  ;;  %v1691_v26 = vmul.f32 -1.442695, %v552_v24 }
  0xea   : > { %v593_v27 = vadd.f32 1.0, %v1939_v25 }
  0xeb   : > { %1940 = vpow2.f32 %v1691_v26 }
  0xec   : > { %1942 = vrcp.f32 %v593_v27  ;;  %v612_v33 = vand.u32 2147483648, %v593_v27  ;;  %v610_v35 = vand.u32 2147483647, %v593_v27  ;;  %vm606_vm1 = vweird.f32 %v593_v27 }
  0xee   : > { %v613_v39 = vor.u32 1.1754944e-38, %v612_v33  ;;  %vm611_vm3 = vcmp.eq.f32.partialorder %v610_v35, 8.507059e+37  ;;  %v554_v63 = vpop.f32.mrf.mxu0 }
  0xef   : > { %v555_v0 = vadd.f32 %v2476_v17, %v554_v63 }
  0xf1   : > { %v1941_v28 = vpop.eup %1940  ;;  %v1692_v1 = vmul.f32 -1.442695, %v555_v0 }
  0xf2   : > { %v1943_v29 = vpop.eup %1942  ;;  %v594_v30 = vadd.f32 1.0, %v1941_v28 }
  0xf3   : > { %v602_v31 = vmul.f32 %v1943_v29, %v593_v27  ;;  %vm607_vm0 = vweird.f32 %v1943_v29 }
  0xf4   : > { %1944 = vrcp.f32 %v594_v30  ;;  %vm608_vm2 = vmor %vm606_vm1, %vm607_vm0  ;;  %v627_v47 = vand.u32 2147483648, %v594_v30  ;;  %v625_v50 = vand.u32 2147483647, %v594_v30  ;;  %vm621_vm5 = vweird.f32 %v594_v30 }
  0xf5   : > { %v603_v32 = vsub.f32 1.0, %v602_v31  ;;  %1946 = vpow2.f32 %v1692_v1 }
  0xf6   : > { %v628_v53 = vor.u32 1.1754944e-38, %v627_v47  ;;  %vm626_vm7 = vcmp.eq.f32.partialorder %v625_v50, 8.507059e+37  ;;  %v556_v2 = vpop.f32.mrf.mxu0 }
  0xf7   : > { %v604_v34 = vmul.f32 %v1943_v29, %v603_v32  ;;  %v557_v3 = vadd.f32 %v2476_v17, %v556_v2 }
  0xf9   : > { %v605_v37 = vadd.f32 %v1943_v29, %v604_v34  ;;  %v1693_v6 = vmul.f32 -1.442695, %v557_v3 }
  0xfa   : > { %v1945_v38 = vpop.eup %1944 }
  0xfb   : > { %v617_v40 = vmul.f32 %v1945_v38, %v594_v30  ;;  %v609_v42 = vsel %vm608_vm2, %v1943_v29, %v605_v37  ;;  %vm622_vm4 = vweird.f32 %v1945_v38  ;;  %v1947_v5 = vpop.eup %1946  ;;  %1948 = vpow2.f32 %v1693_v6  ;;  %v1816_v37 = vld [vmem:[%s2420_s27] sm:$0xff]  }
  0xfc   : > { %v614_v43 = vsel %vm611_vm3, %v613_v39, %v609_v42  ;;  %vm623_vm6 = vmor %vm621_vm5, %vm622_vm4  ;;  %v595_v7 = vadd.f32 1.0, %v1947_v5 }
  0xfd   : > { %v618_v44 = vsub.f32 1.0, %v617_v40  ;;  %v721_v45 = vsub.f32 1.0, %v614_v43 }
  0xfe   : > { %1950 = vrcp.f32 %v595_v7  ;;  %vm636_vm8 = vweird.f32 %v595_v7  ;;  %v642_v26 = vand.u32 2147483648, %v595_v7  ;;  %v640_v28 = vand.u32 2147483647, %v595_v7  ;;  %v559_v30 = vpop.f32.mrf.mxu0 }
  0xff   : > { %v619_v48 = vmul.f32 %v1945_v38, %v618_v44  ;;  %v2510_v49 = vmul.f32 %v721_v45, %v440_v41  ;;  %v434_v44 = vld [vmem:[%s2420_s27 + $0x8] sm:$0xff]  }
 0x100   : > { %v643_v33 = vor.u32 1.1754944e-38, %v642_v26  ;;  %vm641_vm11 = vcmp.eq.f32.partialorder %v640_v28, 8.507059e+37 }
 0x101   : > { %v2515_v51 = vadd.f32 %v762_v46, %v2510_v49  ;;  %v620_v52 = vadd.f32 %v1945_v38, %v619_v48  ;;  %v1817_v46 = vunpack.c.l.bf16 %v1816_v37 }
 0x103   : > { %v772_v54 = vpack.c.bf16 %v2515_v51, %v2515_v51  ;;  %v624_v56 = vsel %vm623_vm6, %v1945_v38, %v620_v52  ;;  %v442_v52 = vunpack.c.l.bf16 %v434_v44 }
 0x104   : > { %v629_v57 = vsel %vm626_vm7, %v628_v53, %v624_v56  ;;  %v891_v56 = vsub.f32 %v1817_v46, %v2510_v49 }
 0x105   : > { %832 = vmatmul.bf16.vlgmr.msra.gmra.mxu1 %v772_v54  ;;  %v722_v58 = vsub.f32 1.0, %v629_v57 }
 0x106   : > { %1121 = vmatpush.bf16.msra.mxu1 %v2439_v10 }
 0x107   : > { %v2520_v60 = vmul.f32 %v722_v58, %v441_v55 }
 0x109   : > { %v2523_v61 = vadd.f32 %v763_v59, %v2520_v60 }
 0x10a   : > { %1122 = vmatpush.bf16.msra.mxu1 %v2445_v11 }
 0x10b   : > { %v856_v62 = vpack.c.bf16 %v2523_v61, %v2523_v61 }
 0x10d   : > { %865 = vmatmul.bf16.vlgmr.msra.gmra.mxu3 %v856_v62 }
 0x10e   : > { %1033 = vmatpush.bf16.msra.mxu3 %v2439_v10  ;;  %1123 = vmatpush.bf16.msra.mxu1 %v2451_v12 }
 0x112   : > { %1034 = vmatpush.bf16.msra.mxu3 %v2445_v11  ;;  %1124 = vmatpush.bf16.msra.mxu1 %v2457_v13  ;;  %v1949_v11 = vpop.eup %1948 }
 0x116   : > { %1035 = vmatpush.bf16.msra.mxu3 %v2451_v12  ;;  %1125 = vmatpush.bf16.msra.mxu1 %v2464_v15 }
 0x11a   : > { %1036 = vmatpush.bf16.msra.mxu3 %v2457_v13  ;;  %1126 = vmatpush.bf16.msra.mxu1 %v2469_v16  ;;  %v1951_v13 = vpop.eup %1950 }
 0x11b   : > { %v632_v14 = vmul.f32 %v1951_v13, %v595_v7  ;;  %vm637_vm9 = vweird.f32 %v1951_v13 }
 0x11c   : > { %vm2557_vm10 = vmor %vm636_vm8, %vm637_vm9 }
 0x11d   : > { %v633_v19 = vsub.f32 1.0, %v632_v14  ;;  %v1818_v14 = vunpack.c.h.bf16 %v1816_v37 }
 0x11e   : > { %1037 = vmatpush.bf16.msra.mxu3 %v2464_v15  ;;  %1127 = vmatpush.bf16.msra.mxu1 %v2480_v18  ;;  %v2551_v15 = vadd.f32 1.0, %v1949_v11 }
 0x11f   : > { %v634_v22 = vmul.f32 %v1951_v13, %v633_v19 }
 0x120   : > { %vm651_vm0 = vweird.f32 %v2551_v15  ;;  %v657_v59 = vand.u32 2147483648, %v2551_v15  ;;  %v655_v1 = vand.u32 2147483647, %v2551_v15 }
 0x121   : > { %v635_v27 = vadd.f32 %v1951_v13, %v634_v22 }
 0x122   : > { %1038 = vmatpush.bf16.msra.mxu3 %v2469_v16  ;;  %1128 = vmatpush.bf16.msra.mxu1 %v2485_v21  ;;  %v658_v5 = vor.u32 1.1754944e-38, %v657_v59  ;;  %vm656_vm3 = vcmp.eq.f32.partialorder %v655_v1, 8.507059e+37  ;;  %v1806_v1 = vld [vmem:[#allocation10 + $0x8] sm:$0xff] }
 0x123   : > { %v639_v36 = vsel %vm2557_vm10, %v1951_v13, %v635_v27 }
 0x124   : > { %v644_v45 = vsel %vm641_vm11, %v643_v33, %v639_v36  ;;  %v1812_v36 = vld [vmem:[#allocation10 + $0x38] sm:$0xff] }
 0x125   : > { %v723_v53 = vsub.f32 1.0, %v644_v45  ;;  %1247 = vmatpush.bf16.msrb.mxu2 %v1812_v36 }
 0x126   : > { %1039 = vmatpush.bf16.msra.mxu3 %v2480_v18 }
 0x127   : > { %v2574_v63 = vmul.f32 %v723_v53, %v442_v52  ;;  %v1807_v53 = vld [vmem:[#allocation10 + $0x10] sm:$0xff] }
 0x12a   : > { %1040 = vmatpush.bf16.msra.mxu3 %v2485_v21 }
 0x182   : > { %v833_v9 = vpop.f32.mrf.mxu1 }
 0x183   : > { %v834_v10 = vadd.f32 %v2548_v8, %v833_v9 }
 0x185   : > { %v1730_v12 = vmul.f32 -1.442695, %v834_v10 }
 0x187   : > { %1952 = vpow2.f32 %v1730_v12 }
 0x188   : > { %1954 = vrcp.f32 %v2551_v15 }
 0x18a   : > { %v835_v16 = vpop.f32.mrf.mxu1 }
 0x18b   : > { %v443_v16 = vunpack.c.h.bf16 %v434_v44  ;;  %v1809_v44 = vld [vmem:[#allocation10 + $0x20] sm:$0xff] }
 0x18d   : > { %v1953_v18 = vpop.eup %1952 }
 0x18e   : > { %v840_v20 = vadd.f32 1.0, %v1953_v18  ;;  %v2555_v24 = vpop.eup %1954 }
 0x18f   : > { %v647_v31 = vmul.f32 %v2555_v24, %v2551_v15  ;;  %vm652_vm1 = vweird.f32 %v2555_v24 }
 0x190   : > { %1956 = vrcp.f32 %v840_v20  ;;  %v866_v21 = vpop.f32.mrf.mxu3  ;;  %v852_v39 = vand.u32 2147483648, %v840_v20  ;;  %v850_v42 = vand.u32 2147483647, %v840_v20  ;;  %vm846_vm13 = vweird.f32 %v840_v20  ;;  %vm653_vm2 = vmor %vm651_vm0, %vm652_vm1 }
 0x191   : > { %v867_v23 = vadd.f32 %v2548_v8, %v866_v21  ;;  %v648_v38 = vsub.f32 1.0, %v647_v31  ;;  %v561_v31 = vpop.f32.mrf.mxu0 }
 0x192   : > { %v853_v50 = vor.u32 1.1754944e-38, %v852_v39  ;;  %vm851_vm15 = vcmp.eq.f32.partialorder %v850_v42, 8.507059e+37  ;;  %v562_v33 = vadd.f32 %v2476_v17, %v561_v31 }
 0x193   : > { %v1731_v25 = vmul.f32 -1.442695, %v867_v23  ;;  %v649_v48 = vmul.f32 %v2555_v24, %v648_v38  ;;  %v892_v23 = vsub.f32 %v1818_v14, %v2520_v60  ;;  %v560_v60 = vadd.f32 %v2476_v17, %v559_v30  ;;  %v1811_v38 = vld [vmem:[#allocation10 + $0x30] sm:$0xff] }
 0x194   : > { %1248 = vmatpush.bf16.msrb.mxu2 %v1811_v38 }
 0x195   : > { %1958 = vpow2.f32 %v1731_v25  ;;  %v650_v62 = vadd.f32 %v2555_v24, %v649_v48  ;;  %v1808_v48 = vld [vmem:[#allocation10 + $0x18] sm:$0xff] }
 0x196   : > { %v1957_v29 = vpop.eup %1956 }
 0x197   : > { %v842_v32 = vmul.f32 %v1957_v29, %v840_v20  ;;  %vm847_vm12 = vweird.f32 %v1957_v29  ;;  %v654_v9 = vsel %vm653_vm2, %v2555_v24, %v650_v62 }
 0x198   : > { %v868_v34 = vpop.f32.mrf.mxu3  ;;  %vm848_vm14 = vmor %vm846_vm13, %vm847_vm12  ;;  %v659_v12 = vsel %vm656_vm3, %v658_v5, %v654_v9  ;;  %v1805_v5 = vld [vmem:[#allocation10] sm:$0xff] }
 0x199   : > { %v843_v35 = vsub.f32 1.0, %v842_v32  ;;  %v724_v18 = vsub.f32 1.0, %v659_v12  ;;  %v1694_v32 = vmul.f32 -1.442695, %v560_v60 }
 0x19b   : > { %v1959_v40 = vpop.eup %1958  ;;  %v844_v41 = vmul.f32 %v1957_v29, %v843_v35  ;;  %v2588_v24 = vmul.f32 %v724_v18, %v443_v16  ;;  %v1788_v35 = vld [vmem:[%s2420_s27 + $0x18] sm:$0xff] }
 0x19c   : > { %v873_v43 = vadd.f32 1.0, %v1959_v40  ;;  %563 = vmatmul.bf16.gmra.mxu0 %v1788_v35  ;;  %v1810_v40 = vld [vmem:[#allocation10 + $0x28] sm:$0xff] }
 0x19d   : > { %v845_v47 = vadd.f32 %v1957_v29, %v844_v41  ;;  %1249 = vmatpush.bf16.msrb.mxu2 %v1810_v40 }
 0x19e   : > { %1960 = vrcp.f32 %v873_v43  ;;  %v885_v10 = vand.u32 2147483648, %v873_v43  ;;  %v883_v11 = vand.u32 2147483647, %v873_v43  ;;  %vm879_vm5 = vweird.f32 %v873_v43 }
 0x19f   : > { %v849_v54 = vsel %vm848_vm14, %v1957_v29, %v845_v47  ;;  %1962 = vpow2.f32 %v1694_v32 }
 0x1a0   : > { %v854_v55 = vsel %vm851_vm15, %v853_v50, %v849_v54  ;;  %v886_v15 = vor.u32 1.1754944e-38, %v885_v10  ;;  %vm884_vm7 = vcmp.eq.f32.partialorder %v883_v11, 8.507059e+37 }
 0x1a1   : > { %v897_v57 = vsub.f32 1.0, %v854_v55  ;;  %v889_v58 = vmul.f32 %v854_v55, %v2515_v51  ;;  %1250 = vmatpush.bf16.msrb.mxu2 %v1809_v44 }
 0x1a3   : > { %v898_v0 = vmul.f32 %v897_v57, %v2515_v51  ;;  %v2578_v2 = vadd.f32 %v891_v56, %v889_v58 }
 0x1a4   : > { %v1961_v49 = vpop.eup %1960 }
 0x1a5   : > { %v875_v3 = vmul.f32 %v1961_v49, %v873_v43  ;;  %v2581_v4 = vadd.f32 %v898_v0, %v2574_v63  ;;  %vm880_vm4 = vweird.f32 %v1961_v49  ;;  %v1963_v34 = vpop.eup %1962  ;;  %1251 = vmatpush.bf16.msrb.mxu2 %v1808_v48 }
 0x1a6   : > { %vm881_vm6 = vmor %vm879_vm5, %vm880_vm4  ;;  %v597_v37 = vadd.f32 1.0, %v1963_v34 }
 0x1a7   : > { %v876_v6 = vsub.f32 1.0, %v875_v3  ;;  %v911_v7 = vpack.c.bf16 %v2581_v4, %v2581_v4 }
 0x1a8   : > { %vm666_vm8 = vweird.f32 %v597_v37  ;;  %v670_v9 = vand.u32 2147483647, %v597_v37 }
 0x1a9   : > { %v877_v51 = vmul.f32 %v1961_v49, %v876_v6  ;;  %920 = vmatmul.bf16.vlgmr.msrb.gmra.mxu3 %v911_v7  ;;  %1252 = vmatpush.bf16.msrb.mxu2 %v1807_v53  ;;  %v672_v6 = vand.u32 2147483648, %v597_v37 }
 0x1aa   : > { %vm671_vm11 = vcmp.eq.f32.partialorder %v670_v9, 8.507059e+37 }
 0x1ab   : > { %v878_v13 = vadd.f32 %v1961_v49, %v877_v51 }
 0x1ad   : > { %v882_v19 = vsel %vm881_vm6, %v1961_v49, %v878_v13  ;;  %1253 = vmatpush.bf16.msrb.mxu2 %v1806_v1 }
 0x1ae   : > { %v887_v20 = vsel %vm884_vm7, %v886_v15, %v882_v19  ;;  %v673_v15 = vor.u32 1.1754944e-38, %v672_v6 }
 0x1af   : > { %v899_v21 = vsub.f32 1.0, %v887_v20  ;;  %v890_v22 = vmul.f32 %v887_v20, %v2523_v61 }
 0x1b1   : > { %v900_v25 = vmul.f32 %v899_v21, %v2523_v61  ;;  %v2591_v26 = vadd.f32 %v892_v23, %v890_v22  ;;  %v1695_v61 = vmul.f32 -1.442695, %v562_v33  ;;  %1254 = vmatpush.bf16.msrb.mxu2 %v1805_v5 }
 0x1b3   : > { %v2594_v27 = vadd.f32 %v900_v25, %v2588_v24  ;;  %v1175_v28 = vpack.c.bf16 %v2591_v26, %v2578_v2  ;;  %1964 = vpow2.f32 %v1695_v61  ;;  %v436_v25 = vld [vmem:[%s2420_s27 + $0x10] sm:$0xff]  }
 0x1b4   : > { %1966 = vrcp.f32 %v597_v37  ;;  %v444_v34 = vunpack.c.l.bf16 %v436_v25 }
 0x1b5   : > { %v944_v29 = vpack.c.bf16 %v2594_v27, %v2594_v27 }
 0x1b7   : > { %953 = vmatmul.bf16.vlgmr.msrb.gmra.mxu1 %v944_v29 }
 0x1b9   : > { %v1965_v39 = vpop.eup %1964 }
 0x1ba   : > { %v2603_v41 = vadd.f32 1.0, %v1965_v39  ;;  %v1967_v45 = vpop.eup %1966 }
 0x1bb   : > { %v662_v47 = vmul.f32 %v1967_v45, %v597_v37  ;;  %vm667_vm9 = vweird.f32 %v1967_v45 }
 0x1bc   : > { %1968 = vrcp.f32 %v2603_v41  ;;  %vm2612_vm10 = vmor %vm666_vm8, %vm667_vm9  ;;  %vm681_vm12 = vweird.f32 %v2603_v41  ;;  %v685_v18 = vand.u32 2147483647, %v2603_v41  ;;  %v687_v21 = vand.u32 2147483648, %v2603_v41 }
 0x1bd   : > { %v663_v56 = vsub.f32 1.0, %v662_v47 }
 0x1be   : > { %vm2629_vm0 = vcmp.eq.f32.partialorder %v685_v18, 8.507059e+37  ;;  %v688_v61 = vor.u32 1.1754944e-38, %v687_v21 }
 0x1bf   : > { %v664_v0 = vmul.f32 %v1967_v45, %v663_v56 }
 0x1c1   : > { %v665_v7 = vadd.f32 %v1967_v45, %v664_v0 }
 0x1c2   : > { %v2607_v54 = vpop.eup %1968 }
 0x1c3   : > { %v677_v59 = vmul.f32 %v2607_v54, %v2603_v41  ;;  %v669_v16 = vsel %vm2612_vm10, %v1967_v45, %v665_v7  ;;  %vm682_vm13 = vweird.f32 %v2607_v54 }
 0x1c4   : > { %v674_v29 = vsel %vm671_vm11, %v673_v15, %v669_v16  ;;  %vm2625_vm15 = vmor %vm681_vm12, %vm682_vm13 }
 0x1c5   : > { %v678_v49 = vsub.f32 1.0, %v677_v59  ;;  %v725_v35 = vsub.f32 1.0, %v674_v29 }
 0x1c7   : > { %v679_v12 = vmul.f32 %v2607_v54, %v678_v49  ;;  %v2637_v45 = vmul.f32 %v725_v35, %v444_v34  ;;  %v2672_v34 = vld [vmem:[%s2912_s6] ss:$0 sm:$0xff] }
 0x1c9   : > { %v680_v20 = vadd.f32 %v2607_v54, %v679_v12 }
 0x1cb   : > { %v684_v39 = vsel %vm2625_vm15, %v2607_v54, %v680_v20 }
 0x22c   : > { %v921_v42 = vpop.f32.mrf.mxu3 }
 0x22d   : > { %v922_v43 = vadd.f32 %v2548_v8, %v921_v42 }
 0x22f   : > { %v1734_v46 = vmul.f32 -1.442695, %v922_v43  ;;  %v1831_v43 = vld [vmem:[%s2420_s27 + $0x8] sm:$0xff]  }
 0x231   : > { %1970 = vpow2.f32 %v1734_v46  ;;  %v689_v46 = vsel %vm2629_vm0, %v688_v61, %v684_v39 }
 0x234   : > { %v923_v50 = vpop.f32.mrf.mxu3  ;;  %v954_v52 = vpop.f32.mrf.mxu1 }
 0x235   : > { %v955_v55 = vadd.f32 %v2548_v8, %v954_v52  ;;  %v1821_v52 = vunpack.c.l.bf16 %v1831_v43 }
 0x237   : > { %v1971_v57 = vpop.eup %1970  ;;  %v1735_v58 = vmul.f32 -1.442695, %v955_v55  ;;  %v1822_v55 = vunpack.c.h.bf16 %v1831_v43  ;;  %v979_v5 = vsub.f32 %v1821_v52, %v2574_v63  ;;  %v564_v63 = vpop.f32.mrf.mxu0 }
 0x238   : > { %v928_v62 = vadd.f32 1.0, %v1971_v57  ;;  %v445_v57 = vunpack.c.h.bf16 %v436_v25 }
 0x239   : > { %1972 = vpow2.f32 %v1735_v58  ;;  %v726_v58 = vsub.f32 1.0, %v689_v46  ;;  %v980_v6 = vsub.f32 %v1822_v55, %v2588_v24  ;;  %v565_v24 = vadd.f32 %v2476_v17, %v564_v63 }
 0x23a   : > { %1974 = vrcp.f32 %v928_v62  ;;  %v940_v22 = vand.u32 2147483648, %v928_v62  ;;  %v938_v30 = vand.u32 2147483647, %v928_v62  ;;  %vm934_vm1 = vweird.f32 %v928_v62 }
 0x23b   : > { %v2651_v7 = vmul.f32 %v726_v58, %v445_v57 }
 0x23c   : > { %v956_v3 = vpop.f32.mrf.mxu1  ;;  %v941_v36 = vor.u32 1.1754944e-38, %v940_v22  ;;  %vm939_vm3 = vcmp.eq.f32.partialorder %v938_v30, 8.507059e+37 }
 0x23f   : > { %v1973_v10 = vpop.eup %1972 }
 0x240   : > { %v1975_v11 = vpop.eup %1974  ;;  %v961_v13 = vadd.f32 1.0, %v1973_v10 }
 0x241   : > { %v930_v14 = vmul.f32 %v1975_v11, %v928_v62  ;;  %vm935_vm14 = vweird.f32 %v1975_v11 }
 0x242   : > { %1976 = vrcp.f32 %v961_v13  ;;  %vm936_vm2 = vmor %vm934_vm1, %vm935_vm14  ;;  %v973_v44 = vand.u32 2147483648, %v961_v13  ;;  %v971_v48 = vand.u32 2147483647, %v961_v13  ;;  %vm967_vm5 = vweird.f32 %v961_v13 }
 0x243   : > { %v931_v19 = vsub.f32 1.0, %v930_v14 }
 0x244   : > { %v974_v56 = vor.u32 1.1754944e-38, %v973_v44  ;;  %vm972_vm7 = vcmp.eq.f32.partialorder %v971_v48, 8.507059e+37 }
 0x245   : > { %v932_v23 = vmul.f32 %v1975_v11, %v931_v19 }
 0x247   : > { %v933_v32 = vadd.f32 %v1975_v11, %v932_v23 }
 0x248   : > { %v1977_v33 = vpop.eup %1976 }
 0x249   : > { %v963_v37 = vmul.f32 %v1977_v33, %v961_v13  ;;  %v937_v38 = vsel %vm936_vm2, %v1975_v11, %v933_v32  ;;  %vm968_vm4 = vweird.f32 %v1977_v33  ;;  %v1696_v13 = vmul.f32 -1.442695, %v565_v24 }
 0x24a   : > { %v942_v40 = vsel %vm939_vm3, %v941_v36, %v937_v38  ;;  %vm969_vm6 = vmor %vm967_vm5, %vm968_vm4 }
 0x24b   : > { %v964_v41 = vsub.f32 1.0, %v963_v37  ;;  %v985_v42 = vsub.f32 1.0, %v942_v40  ;;  %v977_v0 = vmul.f32 %v942_v40, %v2581_v4  ;;  %1978 = vpow2.f32 %v1696_v13 }
 0x24d   : > { %v965_v47 = vmul.f32 %v1977_v33, %v964_v41  ;;  %v986_v50 = vmul.f32 %v985_v42, %v2581_v4  ;;  %v981_v10 = vadd.f32 %v979_v5, %v977_v0  ;;  %v438_v5 = vld [vmem:[%s2420_s27 + $0x18] sm:$0xff]  }
 0x24e   : > { %v446_v24 = vunpack.c.l.bf16 %v438_v5 }
 0x24f   : > { %v966_v53 = vadd.f32 %v1977_v33, %v965_v47  ;;  %v2643_v54 = vadd.f32 %v986_v50, %v2637_v45 }
 0x251   : > { %v970_v59 = vsel %vm969_vm6, %v1977_v33, %v966_v53  ;;  %v999_v62 = vpack.c.bf16 %v2643_v54, %v2643_v54  ;;  %v1979_v16 = vpop.eup %1978 }
 0x252   : > { %v975_v1 = vsel %vm972_vm7, %v974_v56, %v970_v59  ;;  %v599_v18 = vadd.f32 1.0, %v1979_v16 }
 0x253   : > { %1008 = vmatmul.bf16.vlgmr.msra.gmra.mxu2 %v999_v62  ;;  %v987_v49 = vsub.f32 1.0, %v975_v1  ;;  %v978_v3 = vmul.f32 %v975_v1, %v2594_v27 }
 0x254   : > { %vm696_vm8 = vweird.f32 %v599_v18  ;;  %v702_v35 = vand.u32 2147483648, %v599_v18  ;;  %v700_v41 = vand.u32 2147483647, %v599_v18 }
 0x255   : > { %v988_v9 = vmul.f32 %v987_v49, %v2594_v27  ;;  %v982_v51 = vadd.f32 %v980_v6, %v978_v3  ;;  %v566_v27 = vpop.f32.mrf.mxu0 }
 0x256   : > { %v567_v14 = vadd.f32 %v2476_v17, %v566_v27  ;;  %v703_v47 = vor.u32 1.1754944e-38, %v702_v35  ;;  %vm701_vm11 = vcmp.eq.f32.partialorder %v700_v41, 8.507059e+37 }
 0x257   : > { %v2655_v11 = vadd.f32 %v988_v9, %v2651_v7  ;;  %v1176_v12 = vpack.c.bf16 %v982_v51, %v981_v10 }
 0x258   : > { %v1697_v15 = vmul.f32 -1.442695, %v567_v14 }
 0x259   : > { %v1032_v4 = vpack.c.bf16 %v2655_v11, %v2655_v11 }
 0x25a   : > { %1980 = vpow2.f32 %v1697_v15 }
 0x25b   : > { %1041 = vmatmul.bf16.vlgmr.msra.gmra.mxu3 %v1032_v4  ;;  %1982 = vrcp.f32 %v599_v18 }
 0x260   : > { %v1981_v19 = vpop.eup %1980 }
 0x261   : > { %v600_v20 = vadd.f32 1.0, %v1981_v19  ;;  %v1983_v26 = vpop.eup %1982 }
 0x262   : > { %v692_v22 = vmul.f32 %v1983_v26, %v599_v18  ;;  %vm697_vm9 = vweird.f32 %v1983_v26 }
 0x263   : > { %1255 = vmatmul.bf16.vlgmr.msrb.gmra.mxu2 %v1175_v28  ;;  %1984 = vrcp.f32 %v600_v20  ;;  %vm2677_vm10 = vmor %vm696_vm8, %vm697_vm9  ;;  %vm711_vm12 = vweird.f32 %v600_v20  ;;  %v715_v55 = vand.u32 2147483647, %v600_v20  ;;  %v717_v58 = vand.u32 2147483648, %v600_v20 }
 0x264   : > { %v693_v17 = vsub.f32 1.0, %v692_v22 }
 0x265   : > { %vm2700_vm0 = vcmp.eq.f32.partialorder %v715_v55, 8.507059e+37  ;;  %v718_v4 = vor.u32 1.1754944e-38, %v717_v58 }
 0x266   : > { %v694_v61 = vmul.f32 %v1983_v26, %v693_v17 }
 0x268   : > { %v695_v40 = vadd.f32 %v1983_v26, %v694_v61 }
 0x269   : > { %v2665_v29 = vpop.eup %1984 }
 0x26a   : > { %v707_v32 = vmul.f32 %v2665_v29, %v600_v20  ;;  %v699_v53 = vsel %vm2677_vm10, %v1983_v26, %v695_v40  ;;  %vm712_vm13 = vweird.f32 %v2665_v29  ;;  %v1832_v20 = vld [vmem:[%s2420_s27 + $0x10] sm:$0xff]  }
 0x26b   : > { %v704_v0 = vsel %vm701_vm11, %v703_v47, %v699_v53  ;;  %vm2696_vm15 = vmor %vm711_vm12, %vm712_vm13  ;;  %v1825_v17 = vunpack.c.l.bf16 %v1832_v20 }
 0x26c   : > { %v708_v36 = vsub.f32 1.0, %v707_v32  ;;  %v727_v13 = vsub.f32 1.0, %v704_v0 }
 0x26d   : > { %v1067_v42 = vsub.f32 %v1825_v17, %v2637_v45 }
 0x26e   : > { %v709_v48 = vmul.f32 %v2665_v29, %v708_v36 }
 0x270   : > { %v710_v57 = vadd.f32 %v2665_v29, %v709_v48 }
 0x272   : > { %v714_v15 = vsel %vm2696_vm15, %v2665_v29, %v710_v57 }
 0x273   : > { %1260 = vmatmul.bf16.gmra.mxu2 %v1176_v12  ;;  %v719_v26 = vsel %vm2700_vm0, %v718_v4, %v714_v15 }
 0x274   : > { %v728_v61 = vsub.f32 1.0, %v719_v26 }
 0x2d6   : > { %v1009_v21 = vpop.f32.mrf.mxu2 }
 0x2d7   : > { %v1010_v2 = vadd.f32 %v2548_v8, %v1009_v21 }
 0x2d9   : > { %v1738_v28 = vmul.f32 -1.442695, %v1010_v2  ;;  %v2712_v2 = vmul.f32 %v727_v13, %v446_v24  ;;  %v1324_v24 = vlaneseq }
 0x2db   : > { %1986 = vpow2.f32 %v1738_v28 }
 0x2de   : > { %v1011_v23 = vpop.f32.mrf.mxu2  ;;  %v1042_v25 = vpop.f32.mrf.mxu3 }
 0x2df   : > { %v1043_v30 = vadd.f32 %v2548_v8, %v1042_v25 }
 0x2e1   : > { %v1987_v60 = vpop.eup %1986  ;;  %v1739_v31 = vmul.f32 -1.442695, %v1043_v30  ;;  %v1826_v30 = vunpack.c.h.bf16 %v1832_v20 }
 0x2e2   : > { %v1016_v33 = vadd.f32 1.0, %v1987_v60 }
 0x2e3   : > { %1988 = vpow2.f32 %v1739_v31 }
 0x2e4   : > { %1990 = vrcp.f32 %v1016_v33  ;;  %v1028_v59 = vand.u32 2147483648, %v1016_v33  ;;  %v1026_v49 = vand.u32 2147483647, %v1016_v33  ;;  %vm1022_vm1 = vweird.f32 %v1016_v33 }
 0x2e6   : > { %v1044_v37 = vpop.f32.mrf.mxu3  ;;  %v1256_v38 = vpop.f32.mrf.mxu2  ;;  %v1029_v63 = vor.u32 1.1754944e-38, %v1028_v59  ;;  %vm1027_vm3 = vcmp.eq.f32.partialorder %v1026_v49, 8.507059e+37 }
 0x2e7   : > { %v2675_v39 = vadd.f32 %v2672_v34, %v1256_v38 }
 0x2e9   : > { %v1989_v43 = vpop.eup %1988  ;;  %v1276_v44 = vmax.f32 %v2675_v39, 0.0 }
 0x2ea   : > { %v1991_v46 = vpop.eup %1990  ;;  %v2683_v50 = vadd.f32 1.0, %v1989_v43  ;;  %v1068_v43 = vsub.f32 %v1826_v30, %v2651_v7 }
 0x2eb   : > { %v1018_v52 = vmul.f32 %v1991_v46, %v1016_v33  ;;  %1284 = vadd.xlane.f32.xlu0 %v1276_v44  ;;  %vm1023_vm14 = vweird.f32 %v1991_v46  ;;  %v447_v33 = vunpack.c.h.bf16 %v438_v5 }
 0x2ec   : > { %1992 = vrcp.f32 %v2683_v50  ;;  %vm1024_vm2 = vmor %vm1022_vm1, %vm1023_vm14  ;;  %v1059_v28 = vand.u32 2147483647, %v2683_v50  ;;  %v1061_v22 = vand.u32 2147483648, %v2683_v50  ;;  %vm1055_vm5 = vweird.f32 %v2683_v50 }
 0x2ed   : > { %v1019_v56 = vsub.f32 1.0, %v1018_v52  ;;  %v2735_v48 = vmul.f32 %v728_v61, %v447_v33 }
 0x2ee   : > { %v1258_v62 = vpop.f32.mrf.mxu2  ;;  %v1062_v35 = vor.u32 1.1754944e-38, %v1061_v22  ;;  %vm1060_vm7 = vcmp.eq.f32.partialorder %v1059_v28, 8.507059e+37 }
 0x2ef   : > { %v1020_v1 = vmul.f32 %v1991_v46, %v1019_v56  ;;  %v2693_v3 = vadd.f32 %v2672_v34, %v1258_v62 }
 0x2f1   : > { %v1277_v10 = vmax.f32 %v2693_v3, 0.0  ;;  %v1021_v51 = vadd.f32 %v1991_v46, %v1020_v1 }
 0x2f2   : > { %v1993_v12 = vpop.eup %1992 }
 0x2f3   : > { %v1051_v27 = vmul.f32 %v1993_v12, %v2683_v50  ;;  %1286 = vadd.xlane.f32.xlu0 %v1277_v10  ;;  %v1025_v14 = vsel %vm1024_vm2, %v1991_v46, %v1021_v51  ;;  %vm1056_vm4 = vweird.f32 %v1993_v12 }
 0x2f4   : > { %v1030_v16 = vsel %vm1027_vm3, %v1029_v63, %v1025_v14  ;;  %vm1057_vm6 = vmor %vm1055_vm5, %vm1056_vm4 }
 0x2f5   : > { %v1052_v18 = vsub.f32 1.0, %v1051_v27  ;;  %v1073_v19 = vsub.f32 1.0, %v1030_v16  ;;  %v1065_v38 = vmul.f32 %v1030_v16, %v2643_v54  ;;  %v1325_v16 = vand.u32 127, %v1324_v24 }
 0x2f6   : > { %v1261_v21 = vpop.f32.mrf.mxu2 }
 0x2f7   : > { %v2719_v23 = vadd.f32 %v2672_v34, %v1261_v21  ;;  %v1074_v25 = vmul.f32 %v1073_v19, %v2643_v54  ;;  %v1053_v29 = vmul.f32 %v1993_v12, %v1052_v18  ;;  %v1069_v52 = vadd.f32 %v1067_v42, %v1065_v38  ;;  %v1833_v42 = vld [vmem:[%s2420_s27 + $0x18] sm:$0xff]   ;;  %s1505_s27 = sshll.u32 %s2435_s30, 4  ;;  %s1506_s27 = int_to_ptr.vmem [resolvable:$true] %s1505_s27 }
 0x2f8   : > { %vm1326_vm8 = vcmp.lt.s32.totalorder %v1325_v16, 32 }
 0x2f9   : > { %v1278_v60 = vmax.f32 %v2719_v23, 0.0  ;;  %v2724_v31 = vadd.f32 %v1074_v25, %v2712_v2  ;;  %v1054_v32 = vadd.f32 %v1993_v12, %v1053_v29 }
 0x2fb   : > { %1288 = vadd.xlane.f32.xlu1 %v1278_v60  ;;  %v1087_v36 = vpack.c.bf16 %v2724_v31, %v2724_v31  ;;  %v1058_v37 = vsel %vm1057_vm6, %v1993_v12, %v1054_v32  ;;  %v2236_v32 = vmov 0.0  }
 0x2fc   : > { %v1063_v40 = vsel %vm1060_vm7, %v1062_v35, %v1058_v37  ;;  %v2769_v33 = vsel %vm1326_vm8, 1.0, %v2236_v32 }
 0x2fd   : > { %1096 = vmatmul.bf16.vlgmr.msrb.gmra.mxu0 %v1087_v36  ;;  %v1066_v41 = vmul.f32 %v1063_v40, %v2655_v11  ;;  %v1075_v46 = vsub.f32 1.0, %v1063_v40 }
 0x2fe   : > { %v1263_v47 = vpop.f32.mrf.mxu2 }
 0x2ff   : > { %v2738_v50 = vadd.f32 %v2672_v34, %v1263_v47  ;;  %v1070_v53 = vadd.f32 %v1068_v43, %v1066_v41  ;;  %v1076_v55 = vmul.f32 %v1075_v46, %v2655_v11 }
 0x301   : > { %v1279_v54 = vmax.f32 %v2738_v50, 0.0  ;;  %v2743_v56 = vadd.f32 %v1076_v55, %v2735_v48  ;;  %v1177_v57 = vpack.c.bf16 %v1070_v53, %v1069_v52  ;;  %v1829_v53 = vunpack.c.l.bf16 %v1833_v42 }
 0x303   : > { %1265 = vmatmul.bf16.gmra.mxu2 %v1177_v57  ;;  %1290 = vadd.xlane.f32.xlu1 %v1279_v54  ;;  %v1120_v45 = vpack.c.bf16 %v2743_v56, %v2743_v56  ;;  %v1830_v57 = vunpack.c.h.bf16 %v1833_v42 }
 0x305   : > { %1129 = vmatmul.bf16.vlgmr.msra.gmra.mxu1 %v1120_v45 }
 0x35e   : > { %v1285_v4 = vpop.xlane.xlu0 %1284 }
 0x35f   : > { %v1300_v13 = vmul.f32 0.03125, %v1285_v4 }
 0x361   : > { %v2762_v20 = vsub.f32 %v1276_v44, %v1300_v13 }
 0x363   : > { %v1316_v30 = vmul.f32 %v2762_v20, %v2762_v20 }
 0x365   : > { %v1329_v41 = vmul.f32 %v2769_v33, %v1316_v30 }
 0x366   : > { %v1287_v32 = vpop.xlane.xlu0 %1286 }
 0x36e   : > { %v2752_v51 = vpop.xlane.xlu1 %1288 }
 0x376   : > { %v1291_v28 = vpop.xlane.xlu1 %1290 }
 0x377   : > { %v1303_v17 = vmul.f32 0.03125, %v1291_v28 }
 0x379   : > { %v2771_v38 = vsub.f32 %v1279_v54, %v1303_v17 }
 0x37a   : > { %v1097_v7 = vpop.f32.mrf.mxu0 }
 0x37b   : > { %v1098_v58 = vadd.f32 %v2548_v8, %v1097_v7  ;;  %v1319_v55 = vmul.f32 %v2771_v38, %v2771_v38 }
 0x37d   : > { %v1742_v59 = vmul.f32 -1.442695, %v1098_v58 }
 0x37f   : > { %1994 = vpow2.f32 %v1742_v59 }
 0x382   : > { %v1099_v62 = vpop.f32.mrf.mxu0  ;;  %v1130_v0 = vpop.f32.mrf.mxu1 }
 0x383   : > { %v1131_v11 = vadd.f32 %v2548_v8, %v1130_v0  ;;  %v1155_v62 = vsub.f32 %v1829_v53, %v2712_v2  ;;  %v1332_v0 = vmul.f32 %v2769_v33, %v1319_v55  ;;  %v1302_v53 = vmul.f32 0.03125, %v2752_v51 }
 0x385   : > { %v1995_v1 = vpop.eup %1994  ;;  %v1743_v49 = vmul.f32 -1.442695, %v1131_v11 }
 0x386   : > { %v1104_v5 = vadd.f32 1.0, %v1995_v1  ;;  %v1266_v6 = vpop.f32.mrf.mxu2  ;;  %v1156_v1 = vsub.f32 %v1830_v57, %v2735_v48 }
 0x387   : > { %1996 = vpow2.f32 %v1743_v49  ;;  %v2750_v9 = vadd.f32 %v2672_v34, %v1266_v6 }
 0x388   : > { %1998 = vrcp.f32 %v1104_v5  ;;  %v1116_v22 = vand.u32 2147483648, %v1104_v5  ;;  %v1114_v29 = vand.u32 2147483647, %v1104_v5  ;;  %vm1110_vm10 = vweird.f32 %v1104_v5 }
 0x389   : > { %v1280_v12 = vmax.f32 %v2750_v9, 0.0 }
 0x38a   : > { %v1132_v63 = vpop.f32.mrf.mxu1  ;;  %v1117_v61 = vor.u32 1.1754944e-38, %v1116_v22  ;;  %vm1115_vm12 = vcmp.eq.f32.partialorder %v1114_v29, 8.507059e+37  ;;  %v2787_v29 = vld [vmem:[%s2913_s7] ss:$0 sm:$0xff] }
 0x38b   : > { %1292 = vadd.xlane.f32.xlu2 %v1280_v12 }
 0x38d   : > { %v1997_v8 = vpop.eup %1996 }
 0x38e   : > { %v1999_v27 = vpop.eup %1998  ;;  %v1137_v14 = vadd.f32 1.0, %v1997_v8  ;;  %v1268_v15 = vpop.f32.mrf.mxu2 }
 0x38f   : > { %v1106_v18 = vmul.f32 %v1999_v27, %v1104_v5  ;;  %v2758_v19 = vadd.f32 %v2672_v34, %v1268_v15  ;;  %vm1111_vm9 = vweird.f32 %v1999_v27 }
 0x390   : > { %2000 = vrcp.f32 %v1137_v14  ;;  %vm1112_vm11 = vmor %vm1110_vm10, %vm1111_vm9  ;;  %v1149_v46 = vand.u32 2147483648, %v1137_v14  ;;  %v1147_v50 = vand.u32 2147483647, %v1137_v14  ;;  %vm1143_vm14 = vweird.f32 %v1137_v14 }
 0x391   : > { %v1107_v21 = vsub.f32 1.0, %v1106_v18  ;;  %v1281_v26 = vmax.f32 %v2758_v19, 0.0 }
 0x392   : > { %v1150_v54 = vor.u32 1.1754944e-38, %v1149_v46  ;;  %vm1148_vm0 = vcmp.eq.f32.partialorder %v1147_v50, 8.507059e+37 }
 0x393   : > { %1294 = vadd.xlane.f32.xlu2 %v1281_v26  ;;  %v1108_v25 = vmul.f32 %v1999_v27, %v1107_v21 }
 0x395   : > { %v1109_v39 = vadd.f32 %v1999_v27, %v1108_v25 }
 0x396   : > { %v2001_v44 = vpop.eup %2000 }
 0x397   : > { %v1139_v35 = vmul.f32 %v2001_v44, %v1137_v14  ;;  %v1113_v36 = vsel %vm1112_vm11, %v1999_v27, %v1109_v39  ;;  %vm1144_vm13 = vweird.f32 %v2001_v44  ;;  %v2792_v39 = vld [vmem:[%s2914_s8] ss:$0 sm:$0xff] }
 0x398   : > { %v1118_v37 = vsel %vm1115_vm12, %v1117_v61, %v1113_v36  ;;  %vm1145_vm15 = vmor %vm1143_vm14, %vm1144_vm13 }
 0x399   : > { %v1140_v40 = vsub.f32 1.0, %v1139_v35  ;;  %v1161_v43 = vsub.f32 1.0, %v1118_v37  ;;  %v1153_v58 = vmul.f32 %v1118_v37, %v2724_v31  ;;  %v1301_v37 = vmul.f32 0.03125, %v1287_v32 }
 0x39b   : > { %1337 = vadd.xlane.f32.xlu2 %v1329_v41  ;;  %v1141_v47 = vmul.f32 %v2001_v44, %v1140_v40  ;;  %v1162_v52 = vmul.f32 %v1161_v43, %v2724_v31  ;;  %v1157_v5 = vadd.f32 %v1155_v62, %v1153_v58 }
 0x39d   : > { %v1142_v45 = vadd.f32 %v2001_v44, %v1141_v47  ;;  %1165 = vst [vmem:[#allocation2] sm:$0xff] %v1162_v52 }
 0x39f   : > { %v1146_v7 = vsel %vm1145_vm15, %v2001_v44, %v1142_v45 }
 0x3a0   : > { %v1151_v59 = vsel %vm1148_vm0, %v1150_v54, %v1146_v7 }
 0x3a1   : > { %v1154_v11 = vmul.f32 %v1151_v59, %v2743_v56  ;;  %v1163_v49 = vsub.f32 1.0, %v1151_v59 }
 0x3a3   : > { %1343 = vadd.xlane.f32.xlu2 %v1332_v0  ;;  %v1158_v6 = vadd.f32 %v1156_v1, %v1154_v11  ;;  %v1164_v4 = vmul.f32 %v1163_v49, %v2743_v56 }
 0x3a5   : > { %1166 = vst [vmem:[#allocation2 + $0x8] sm:$0xff] %v1164_v4  ;;  %v1178_v63 = vpack.c.bf16 %v1158_v6, %v1157_v5 }
 0x3a7   : > { %1270 = vmatmul.bf16.gmra.mxu2 %v1178_v63 }
 0x3fe   : > { %v1293_v24 = vpop.xlane.xlu2 %1292 }
 0x3ff   : > { %v1304_v55 = vmul.f32 0.03125, %v1293_v24 }
 0x406   : > { %v1295_v31 = vpop.xlane.xlu2 %1294 }
 0x407   : > { %v1305_v58 = vmul.f32 0.03125, %v1295_v31 }
 0x409   : > { %v2826_v23 = vsub.f32 %v1281_v26, %v1305_v58 }
 0x40e   : > { %v1338_v8 = vpop.xlane.xlu2 %1337 }
 0x40f   : > { %v1353_v13 = vmul.f32 0.03125, %v1338_v8 }
 0x411   : > { %v1361_v2 = vadd.f32 1e-05, %v1353_v13 }
 0x413   : > { %2002 = vrsqrt.f32 %v1361_v2  ;;  %vm1375_vm2 = vweird.f32 %v1361_v2 }
 0x416   : > { %v1344_v27 = vpop.xlane.xlu2 %1343 }
 0x417   : > { %v1356_v14 = vmul.f32 0.03125, %v1344_v27 }
 0x419   : > { %v2003_v15 = vpop.eup %2002  ;;  %v1364_v16 = vadd.f32 1e-05, %v1356_v14 }
 0x41a   : > { %v1370_v48 = vmul.f32 %v2003_v15, %v1361_v2  ;;  %vm1376_vm1 = vweird.f32 %v2003_v15 }
 0x41b   : > { %2004 = vrsqrt.f32 %v1364_v16  ;;  %vm1377_vm3 = vmor %vm1375_vm2, %vm1376_vm1  ;;  %vm1405_vm5 = vweird.f32 %v1364_v16 }
 0x41c   : > { %v1371_v18 = vmul.f32 %v2003_v15, %v1370_v48 }
 0x41e   : > { %v1372_v21 = vmul.f32 0.5, %v1371_v18 }
 0x420   : > { %v1373_v28 = vsub.f32 1.5, %v1372_v21 }
 0x421   : > { %v2005_v56 = vpop.eup %2004 }
 0x422   : > { %v1374_v22 = vmul.f32 %v2003_v15, %v1373_v28  ;;  %v1400_v25 = vmul.f32 %v2005_v56, %v1364_v16  ;;  %vm1406_vm4 = vweird.f32 %v2005_v56 }
 0x423   : > { %vm1407_vm6 = vmor %vm1405_vm5, %vm1406_vm4 }
 0x424   : > { %v1378_v17 = vsel %vm1377_vm3, %v2003_v15, %v1374_v22  ;;  %v1401_v30 = vmul.f32 %v2005_v56, %v1400_v25 }
 0x425   : > { %v1449_v44 = vmul.f32 %v1378_v17, %v2762_v20  ;;  %v2801_v20 = vsub.f32 %v1277_v10, %v1301_v37  ;;  %v2813_v10 = vsub.f32 %v1278_v60, %v1302_v53 }
 0x426   : > { %v1402_v61 = vmul.f32 0.5, %v1401_v30 }
 0x427   : > { %v1461_v35 = vmul.f32 %v2787_v29, %v1449_v44  ;;  %v1317_v45 = vmul.f32 %v2801_v20, %v2801_v20  ;;  %v1318_v59 = vmul.f32 %v2813_v10, %v2813_v10 }
 0x428   : > { %v1403_v36 = vsub.f32 1.5, %v1402_v61 }
 0x429   : > { %v1473_v40 = vadd.f32 %v2792_v39, %v1461_v35  ;;  %v1330_v51 = vmul.f32 %v2769_v33, %v1317_v45  ;;  %v1331_v60 = vmul.f32 %v2769_v33, %v1318_v59 }
 0x42a   : > { %v1404_v41 = vmul.f32 %v2005_v56, %v1403_v36  ;;  %v1271_v42 = vpop.f32.mrf.mxu2 }
 0x42b   : > { %1481 = vst [vmem:[%s2435_s30] sm:$0xff] %v1473_v40  ;;  %v1272_v43 = vadd.f32 %v2672_v34, %v1271_v42 }
 0x42c   : > { %v1408_v46 = vsel %vm1407_vm6, %v2005_v56, %v1404_v41 }
 0x42d   : > { %v1452_v47 = vmul.f32 %v1408_v46, %v2771_v38  ;;  %v1282_v50 = vmax.f32 %v1272_v43, 0.0  ;;  %v2817_v38 = vsub.f32 %v1280_v12, %v1304_v55  ;;  %v1321_v12 = vmul.f32 %v2826_v23, %v2826_v23 }
 0x42f   : > { %v1464_v52 = vmul.f32 %v2787_v29, %v1452_v47  ;;  %1296 = vadd.xlane.f32.xlu0 %v1282_v50  ;;  %v1334_v62 = vmul.f32 %v2769_v33, %v1321_v12 }
 0x431   : > { %v1476_v57 = vadd.f32 %v2792_v39, %v1464_v52 }
 0x432   : > { %v1273_v54 = vpop.f32.mrf.mxu2 }
 0x433   : > { %1484 = vst [vmem:[%s2435_s30 + $0x18] sm:$0xff] %v1476_v57  ;;  %v1274_v3 = vadd.f32 %v2672_v34, %v1273_v54  ;;  %v1320_v34 = vmul.f32 %v2817_v38, %v2817_v38 }
 0x435   : > { %v1283_v7 = vmax.f32 %v1274_v3, 0.0  ;;  %v1333_v9 = vmul.f32 %v2769_v33, %v1320_v34 }
 0x437   : > { %1298 = vadd.xlane.f32.xlu1 %v1283_v7  ;;  %1339 = vadd.xlane.f32.xlu0 %v1330_v51 }
 0x43f   : > { %1341 = vadd.xlane.f32.xlu1 %v1331_v60  ;;  %1345 = vadd.xlane.f32.xlu0 %v1333_v9 }
 0x447   : > { %1347 = vadd.xlane.f32.xlu1 %v1334_v62 }
 0x4a2   : > { %v1297_v0 = vpop.xlane.xlu0 %1296 }
 0x4a3   : > { %v1306_v11 = vmul.f32 0.03125, %v1297_v0 }
 0x4a5   : > { %v2833_v1 = vsub.f32 %v1282_v50, %v1306_v11 }
 0x4a7   : > { %v1322_v19 = vmul.f32 %v2833_v1, %v2833_v1 }
 0x4a9   : > { %v1335_v26 = vmul.f32 %v2769_v33, %v1322_v19 }
 0x4aa   : > { %v1299_v49 = vpop.xlane.xlu1 %1298  ;;  %v1340_v5 = vpop.xlane.xlu0 %1339 }
 0x4ab   : > { %v1307_v6 = vmul.f32 0.03125, %v1299_v49  ;;  %v1354_v4 = vmul.f32 0.03125, %v1340_v5  ;;  %1349 = vadd.xlane.f32.xlu2 %v1335_v26 }
 0x4ad   : > { %v2838_v63 = vsub.f32 %v1283_v7, %v1307_v6  ;;  %v1362_v24 = vadd.f32 1e-05, %v1354_v4 }
 0x4af   : > { %2006 = vrsqrt.f32 %v1362_v24  ;;  %v1323_v31 = vmul.f32 %v2838_v63, %v2838_v63  ;;  %vm1385_vm8 = vweird.f32 %v1362_v24 }
 0x4b1   : > { %v1336_v8 = vmul.f32 %v2769_v33, %v1323_v31 }
 0x4b2   : > { %v1342_v13 = vpop.xlane.xlu1 %1341  ;;  %v1346_v2 = vpop.xlane.xlu0 %1345 }
 0x4b3   : > { %v1355_v27 = vmul.f32 0.03125, %v1342_v13  ;;  %v1357_v14 = vmul.f32 0.03125, %v1346_v2  ;;  %1351 = vadd.xlane.f32.xlu0 %v1336_v8 }
 0x4b5   : > { %v2007_v15 = vpop.eup %2006  ;;  %v1363_v16 = vadd.f32 1e-05, %v1355_v27  ;;  %v1365_v48 = vadd.f32 1e-05, %v1357_v14 }
 0x4b6   : > { %v1380_v18 = vmul.f32 %v2007_v15, %v1362_v24  ;;  %vm1386_vm7 = vweird.f32 %v2007_v15 }
 0x4b7   : > { %2008 = vrsqrt.f32 %v1363_v16  ;;  %vm1387_vm9 = vmor %vm1385_vm8, %vm1386_vm7  ;;  %vm1395_vm12 = vweird.f32 %v1363_v16  ;;  %vm1415_vm14 = vweird.f32 %v1365_v48 }
 0x4b8   : > { %v1381_v21 = vmul.f32 %v2007_v15, %v1380_v18  ;;  %2010 = vrsqrt.f32 %v1365_v48 }
 0x4ba   : > { %v1382_v28 = vmul.f32 0.5, %v1381_v21  ;;  %v1348_v56 = vpop.xlane.xlu1 %1347 }
 0x4bb   : > { %v1358_v22 = vmul.f32 0.03125, %v1348_v56 }
 0x4bc   : > { %v1383_v25 = vsub.f32 1.5, %v1382_v28 }
 0x4bd   : > { %v2009_v17 = vpop.eup %2008  ;;  %v1366_v30 = vadd.f32 1e-05, %v1358_v22 }
 0x4be   : > { %v2011_v33 = vpop.eup %2010  ;;  %v1384_v44 = vmul.f32 %v2007_v15, %v1383_v25  ;;  %v1390_v32 = vmul.f32 %v2009_v17, %v1363_v16  ;;  %vm1396_vm10 = vweird.f32 %v2009_v17 }
 0x4bf   : > { %v1410_v61 = vmul.f32 %v2011_v33, %v1365_v48  ;;  %2012 = vrsqrt.f32 %v1366_v30  ;;  %vm1416_vm11 = vweird.f32 %v2011_v33  ;;  %vm1397_vm13 = vmor %vm1395_vm12, %vm1396_vm10  ;;  %vm1425_vm1 = vweird.f32 %v1366_v30 }
 0x4c0   : > { %v1388_v35 = vsel %vm1387_vm9, %v2007_v15, %v1384_v44  ;;  %v1391_v36 = vmul.f32 %v2009_v17, %v1390_v32  ;;  %vm1417_vm15 = vmor %vm1415_vm14, %vm1416_vm11 }
 0x4c1   : > { %v1450_v37 = vmul.f32 %v1388_v35, %v2801_v20  ;;  %v1411_v40 = vmul.f32 %v2011_v33, %v1410_v61 }
 0x4c2   : > { %v1392_v41 = vmul.f32 0.5, %v1391_v36 }
 0x4c3   : > { %v1462_v42 = vmul.f32 %v2787_v29, %v1450_v37  ;;  %v1412_v43 = vmul.f32 0.5, %v1411_v40 }
 0x4c4   : > { %v1393_v46 = vsub.f32 1.5, %v1392_v41 }
 0x4c5   : > { %v2013_v47 = vpop.eup %2012  ;;  %v1474_v50 = vadd.f32 %v2792_v39, %v1462_v42  ;;  %v1413_v52 = vsub.f32 1.5, %v1412_v43 }
 0x4c6   : > { %v1394_v53 = vmul.f32 %v2009_v17, %v1393_v46  ;;  %v1420_v55 = vmul.f32 %v2013_v47, %v1366_v30  ;;  %vm1426_vm0 = vweird.f32 %v2013_v47 }
 0x4c7   : > { %1482 = vst [vmem:[%s2435_s30 + $0x8] sm:$0xff] %v1474_v50  ;;  %v1414_v57 = vmul.f32 %v2011_v33, %v1413_v52  ;;  %vm1427_vm2 = vmor %vm1425_vm1, %vm1426_vm0 }
 0x4c8   : > { %v1398_v20 = vsel %vm1397_vm13, %v2009_v17, %v1394_v53  ;;  %v1421_v45 = vmul.f32 %v2013_v47, %v1420_v55 }
 0x4c9   : > { %v1451_v54 = vmul.f32 %v1398_v20, %v2813_v10  ;;  %v1418_v3 = vsel %vm1417_vm15, %v2011_v33, %v1414_v57 }
 0x4ca   : > { %v1453_v7 = vmul.f32 %v1418_v3, %v2817_v38  ;;  %v1422_v51 = vmul.f32 0.5, %v1421_v45 }
 0x4cb   : > { %v1463_v58 = vmul.f32 %v2787_v29, %v1451_v54 }
 0x4cc   : > { %v1465_v59 = vmul.f32 %v2787_v29, %v1453_v7  ;;  %v1423_v34 = vsub.f32 1.5, %v1422_v51 }
 0x4cd   : > { %v1475_v60 = vadd.f32 %v2792_v39, %v1463_v58 }
 0x4ce   : > { %v1477_v9 = vadd.f32 %v2792_v39, %v1465_v59  ;;  %v1424_v12 = vmul.f32 %v2013_v47, %v1423_v34 }
 0x4cf   : > { %1483 = vst [vmem:[%s2435_s30 + $0x10] sm:$0xff] %v1475_v60 }
 0x4d0   : > { %1485 = vst [vmem:[%s2435_s30 + $0x20] sm:$0xff] %v1477_v9  ;;  %v1428_v10 = vsel %vm1427_vm2, %v2013_v47, %v1424_v12 }
 0x4d1   : > { %v1454_v38 = vmul.f32 %v1428_v10, %v2826_v23 }
 0x4d3   : > { %v1466_v62 = vmul.f32 %v2787_v29, %v1454_v38 }
 0x4d5   : > { %v1478_v0 = vadd.f32 %v2792_v39, %v1466_v62 }
 0x4d7   : > { %1486 = vst [vmem:[%s2435_s30 + $0x28] sm:$0xff] %v1478_v0 }
 0x51e   : > { %v1350_v11 = vpop.xlane.xlu2 %1349 }
 0x51f   : > { %v1359_v19 = vmul.f32 0.03125, %v1350_v11 }
 0x521   : > { %v1367_v26 = vadd.f32 1e-05, %v1359_v19 }
 0x523   : > { %2014 = vrsqrt.f32 %v1367_v26  ;;  %vm1435_vm4 = vweird.f32 %v1367_v26 }
 0x526   : > { %v1352_v49 = vpop.xlane.xlu0 %1351 }
 0x527   : > { %v1360_v5 = vmul.f32 0.03125, %v1352_v49 }
 0x529   : > { %v2015_v6 = vpop.eup %2014  ;;  %v1368_v4 = vadd.f32 1e-05, %v1360_v5 }
 0x52a   : > { %v1430_v24 = vmul.f32 %v2015_v6, %v1367_v26  ;;  %vm1436_vm3 = vweird.f32 %v2015_v6 }
 0x52b   : > { %2016 = vrsqrt.f32 %v1368_v4  ;;  %vm1437_vm5 = vmor %vm1435_vm4, %vm1436_vm3  ;;  %vm1445_vm7 = vweird.f32 %v1368_v4 }
 0x52c   : > { %v1431_v31 = vmul.f32 %v2015_v6, %v1430_v24 }
 0x52e   : > { %v1432_v8 = vmul.f32 0.5, %v1431_v31 }
 0x530   : > { %v1433_v13 = vsub.f32 1.5, %v1432_v8 }
 0x531   : > { %v2017_v23 = vpop.eup %2016 }
 0x532   : > { %v1434_v2 = vmul.f32 %v2015_v6, %v1433_v13  ;;  %v1440_v27 = vmul.f32 %v2017_v23, %v1368_v4  ;;  %vm1446_vm6 = vweird.f32 %v2017_v23 }
 0x533   : > { %vm1447_vm8 = vmor %vm1445_vm7, %vm1446_vm6 }
 0x534   : > { %v1438_v14 = vsel %vm1437_vm5, %v2015_v6, %v1434_v2  ;;  %v1441_v15 = vmul.f32 %v2017_v23, %v1440_v27 }
 0x535   : > { %v1455_v16 = vmul.f32 %v1438_v14, %v2833_v1 }
 0x536   : > { %v1442_v48 = vmul.f32 0.5, %v1441_v15 }
 0x537   : > { %v1467_v18 = vmul.f32 %v2787_v29, %v1455_v16 }
 0x538   : > { %v1443_v21 = vsub.f32 1.5, %v1442_v48 }
 0x539   : > { %v1479_v28 = vadd.f32 %v2792_v39, %v1467_v18 }
 0x53a   : > { %v1444_v56 = vmul.f32 %v2017_v23, %v1443_v21 }
 0x53b   : > { %1487 = vst [vmem:[%s2435_s30 + $0x30] sm:$0xff] %v1479_v28 }
 0x53c   : > { %v1448_v1 = vsel %vm1447_vm8, %v2017_v23, %v1444_v56 }
 0x53d   : > { %v1456_v22 = vmul.f32 %v1448_v1, %v2838_v63 }
 0x53f   : > { %v1468_v25 = vmul.f32 %v2787_v29, %v1456_v22 }
 0x541   : > { %v1480_v17 = vadd.f32 %v2792_v39, %v1468_v25 }
 0x543   : > { %1488 = vst [vmem:[%s2435_s30 + $0x38] sm:$0xff] %v1480_v17 }
 0x544   : > { %2165 = shalt.err (!%p2162_p3)
}
 0x545   : > { %s2237_s20 = smov 128   ;;  %s2238_s30 = smov 8  }
 0x546   : > { %1848 = dma.vmem_to_hbm [thread:$0]  (%p2393_p5), %s1506_s27, 1024, %s1508_s12, %s1490_s5, %s2237_s20, %s2237_s20, %s2238_s30  }
 0x547 PF: > { %s2957_s15 = sld [smem:[#allocation17_spill]]  ;;  %p1865_p7 = pnand %p1630_p11, %p2338_p6 }
 0x548   : > { %s2959_s28 = sld [smem:[#allocation18_spill]] }
 0x549   : > { %p1866_p9 = pneg %p1865_p7 }
 0x54d   : > { %s1522_s29 = sand.u32 1, %s2957_s15  }
 0x54e   : > { %s1523_s18 = scalar_lea.sflag [#allocation6], %s1522_s29 }
 0x54f   : > { %2203 = dma.done.wait (%p1866_p9), %s1523_s18, 1024  }
 0x550   : > { %2205 = vsyncadd (%p1866_p9), %s1523_s18, 4294966272  ;;  %s27_s14 = sadd.s32 1, %s2959_s28   ;;  %s2960_s26 = sld [smem:[#allocation20_spill]] }
 0x551   : > { %p24_p2 = scmp.ge.s32.totalorder %s27_s14, 4   ;;  %s2961_s30 = smov %s2212_s10 }
 0x552   : > { %s2962_s10 = smov %s2216_s11  ;;  %s2963_s11 = smov %s2402_s22 }
 0x553   : > { %s2964_s12 = smov %s2224_s13  ;;  %26 = sbr.rel (!%p24_p2) target bundleno = 12 (0xc), region = 123 }
 0x556   : > { %s2965_s13 = smov %s2960_s26 }
 0x558   :  { %1529 = vsyncpa [#allocation5], 1 }
 0x559   :  { %1531 = vsyncpa [#allocation5 + $0x1], 1 }
 0x55a   :  { %1532 = vsyncpa [#allocation8], 1 }
 0x55b   :  { %1533 = vsyncpa [#allocation11], 1 }
 0x55c   :  { %1534 = vsyncpa [#allocation6], 1 }
 0x55d   :  { %1536 = vsyncpa [#allocation6 + $0x1], 1 }

// kernel: tpu_custom_call.1
= control target key start
LH: loop header
LB: loop body
LE: loop exit
PB: predicated region body
PF: predicated region fallthrough
CT: control target
= control target key end

     0   :  { %s2906_s0 = inlined_call_operand.hbm [shape: bf16[8,16,128], index: 0, kind: input, shape index: {}]   ;;  %s2907_s1 = inlined_call_operand.hbm [shape: bf16[128,128], index: 1, kind: input, shape index: {}]   ;;  %s2908_s2 = inlined_call_operand.vmem [shape: f32[1,128], index: 2, kind: input, shape index: {}]   ;;  %s2909_s3 = inlined_call_operand.hbm [shape: bf16[128,128], index: 3, kind: input, shape index: {}]   ;;  %s2910_s4 = inlined_call_operand.vmem [shape: f32[1,128], index: 4, kind: input, shape index: {}]   ;;  %s2911_s5 = inlined_call_operand.hbm [shape: bf16[128,128], index: 5, kind: input, shape index: {}]   ;;  %s2912_s6 = inlined_call_operand.vmem [shape: f32[1,128], index: 6, kind: input, shape index: {}]   ;;  %s2913_s7 = inlined_call_operand.vmem [shape: f32[1,128], index: 7, kind: input, shape index: {}]   ;;  %s2914_s8 = inlined_call_operand.vmem [shape: f32[1,128], index: 8, kind: input, shape index: {}]   ;;  %s2915_s9 = inlined_call_operand.hbm [shape: f32[8,16,128], index: 9, kind: output, shape index: {}]  }
   0x1   :  { %2923 = sst [smem:[#allocation21_spill]] %s2907_s1 }
   0x2   :  { %2924 = sst [smem:[#allocation22_spill]] %s2909_s3 }
   0x3   :  { %2925 = sst [smem:[#allocation23_spill]] %s2911_s5 }
   0x4   :  { %14 = vsyncpa [#allocation5], 0 }
   0x5   :  { %16 = vsyncpa [#allocation5 + $0x1], 0 }
   0x6   :  { %17 = vsyncpa [#allocation8], 0 }
   0x7   :  { %18 = vsyncpa [#allocation11], 0 }
   0x8   :  { %19 = vsyncpa [#allocation6], 0 }
   0x9   :  { %21 = vsyncpa [#allocation6 + $0x1], 0  ;;  %s2289_s30 = smov 0   ;;  %s2291_s10 = smov 0  }
   0xa   :  { %s2293_s11 = smov 0   ;;  %s2295_s12 = smov 0  }
   0xb   :  { %s2297_s13 = smov 0   ;;  %s2299_s14 = smov 0  }
   0xc LB: > { %2926 = sst [smem:[#allocation17_spill]] %s2208_s30  ;;  %s1624_s15 = sadd.s32 4294967295, %s2228_s14   ;;  %s2228_s14 = sphi %s2299_s14, %s27_s14   ;;  %s2224_s13 = sphi %s2297_s13, %s2965_s13   ;;  %s2220_s12 = sphi %s2295_s12, %s2964_s12   ;;  %s2216_s11 = sphi %s2293_s11, %s2963_s11   ;;  %s2212_s10 = sphi %s2291_s10, %s2962_s10   ;;  %s2208_s30 = sphi %s2289_s30, %s2961_s30  }
   0xd   : > { %2927 = sst [smem:[#allocation18_spill]] %s2228_s14  ;;  %s1625_s16 = sadd.s32 4294967294, %s2228_s14  }
   0xe   : > { %p61_p0 = scmp.ne.s32.totalorder %s2212_s10, %s2208_s30  ;;  %p2323_p1 = scmp.eq.s32.totalorder %s1624_s15, 0 }
   0xf   : > { %p2327_p2 = scmp.eq.s32.totalorder %s1624_s15, 1  ;;  %p261_p3 = scmp.eq.s32.totalorder %s1625_s16, 1 }
  0x10   : > { %p2333_p4 = por %p2323_p1, %p61_p0  ;;  %p1626_p5 = scmp.ge.s32.totalorder %s2228_s14, 1 }
  0x11   : > { %p2338_p6 = por %p261_p3, %p61_p0  ;;  %p268_p7 = scmp.lt.s32.totalorder %s2228_s14, 3 }
  0x12   : > { %s2933_s1 = sld [smem:[#allocation21_spill]]  ;;  %s2230_s25 = smov [#allocation7]  }
  0x13   : > { %s2931_s20 = scalar_select %p2338_p6, 1, 0 }
  0x14   : > { %p2346_p8 = pnand %p1626_p5, %p268_p7  ;;  %s281_s26 = sshll.u32 %s2230_s25, 4  ;;  %s282_s26 = int_to_ptr.vmem [resolvable:$true] %s281_s26 }
  0x15   : > { %2932 = sst [smem:[#allocation19_spill]] %s2931_s20  ;;  %p1630_p11 = scmp.ge.s32.totalorder %s2228_s14, 2 }
  0x16   : > { %p1850_p9 = pneg %p2346_p8  ;;  %s2936_s3 = sld [smem:[#allocation22_spill]] }
  0x17   : > { %s2917_s16 = smov 64   ;;  %s2918_s21 = smov 4  }
  0x18   : > { %s279_s23 = sshll.u32 %s2933_s1, 4  ;;  %p2354_p10 = pnand %p1850_p9, %p2323_p1  ;;  %s280_s23 = int_to_ptr.hbm [resolvable:$true] %s279_s23 }
  0x19   : > { %s2233_s22 = smov [#allocation9]   ;;  %s2937_s5 = sld [smem:[#allocation23_spill]] }
  0x1a   : > { %1853 = dma.hbm_to_vmem [thread:$0]  (!%p2354_p10), %s280_s23, 1024, %s282_s26, [#allocation8], %s2917_s16, %s2917_s16, %s2918_s21  }
  0x1b   : > { %s298_s25 = sshll.u32 %s2233_s22, 4  ;;  %s2234_s29 = smov [#allocation10]   ;;  %s299_s25 = int_to_ptr.vmem [resolvable:$true] %s298_s25 }
  0x1c   : > { %s296_s15 = sshll.u32 %s2936_s3, 4  ;;  %s315_s3 = sshll.u32 %s2234_s29, 4  ;;  %s297_s15 = int_to_ptr.hbm [resolvable:$true] %s296_s15  ;;  %s316_s3 = int_to_ptr.vmem [resolvable:$true] %s315_s3 }
  0x1d   : > { %1856 = dma.hbm_to_vmem [thread:$0]  (!%p2354_p10), %s297_s15, 1024, %s299_s25, [#allocation8], %s2917_s16, %s2917_s16, %s2918_s21  }
  0x1e   : > { %s36_s1 = sadd.s32 1, %s2224_s13  ;;  %s48_s20 = sadd.s32 1, %s2216_s11 }
  0x1f   : > { %s313_s28 = sshll.u32 %s2937_s5, 4  ;;  %p37_p12 = scmp.ge.s32.totalorder %s36_s1, 2  ;;  %s314_s28 = int_to_ptr.hbm [resolvable:$true] %s313_s28 }
  0x20   : > { %1859 = dma.hbm_to_vmem [thread:$0]  (!%p2354_p10), %s314_s28, 1024, %s316_s3, [#allocation11], %s2917_s16, %s2917_s16, %s2918_s21  }
  0x21   : > { %p55_p13 = scmp.ne.s32.totalorder %s2216_s11, %s2212_s10  ;;  %p56_p0 = scmp.eq.s32.totalorder %s2228_s14, 0 }
  0x22   : > { %s2967_s1 = smov (%p37_p12, %s36_s1), 0  ;;  %p1871_p7 = scmp.lt.s32.totalorder %s2228_s14, 2 }
  0x23   : > { %2938 = sst [smem:[#allocation20_spill]] %s2967_s1  ;;  %p2387_p3 = por %p56_p0, %p55_p13 }
  0x24   : > { %p2393_p5 = por %p2327_p2, %p55_p13  ;;  %s43_s27 = ssub.s32 %s2224_s13, %s2967_s1 }
  0x25   : > { %p46_p9 = scmp.eq.s32.totalorder %s43_s27, 0  ;;  %s338_s3 = sand.u32 1, %s2216_s11  }
  0x26   : > { %s1631_s15 = sshll.u32 %s338_s3, 5  ;;  %s1784_s25 = sshll.u32 %s2224_s13, 5 }
  0x27   : > { %s2402_s22 = scalar_select %p46_p9, %s2216_s11, %s48_s20  }
  0x28   : > { %s350_s16 = scalar_lea.hbm %s2906_s0, %s1784_s25  ;;  %s342_s21 = scalar_lea.vmem [#allocation4], %s1631_s15 }
  0x29   : > { %s353_s5 = sshll.u32 %s342_s21, 4  ;;  %s351_s18 = sshll.u32 %s350_s16, 4  ;;  %s354_s5 = int_to_ptr.vmem [resolvable:$true] %s353_s5  ;;  %s352_s18 = int_to_ptr.hbm [resolvable:$true] %s351_s18 }
  0x2a   : > { %p1861_p2 = pnand %p1871_p7, %p2387_p3  ;;  %s339_s30 = scalar_lea.sflag [#allocation5], %s338_s3 }
  0x2b   : > { %s2941_s1 = smov 4   ;;  %s2942_s14 = smov 64  }
  0x2c   : > { %1863 = dma.hbm_to_vmem [thread:$0]  (!%p1861_p2), %s352_s18, 512, %s354_s5, %s339_s30, %s2942_s14, %s2942_s14, %s2941_s1  }
  0x2d   : > { %365 = sbr.rel (%p2346_p8) target bundleno = 1351 (0x547), region = 56  ;;  %s2416_s20 = sand.u32 (!%p2346_p8), 1, %s2212_s10  }
  0x2e   : > { %s1636_s21 = sshll.u32 (!%p2346_p8), %s2416_s20, 5  ;;  %s368_s16 = scalar_lea.sflag (!%p2346_p8), [#allocation5], %s2416_s20 }
  0x2f   : > { %s2420_s27 = scalar_lea.vmem (!%p2346_p8), [#allocation4], %s1636_s21 }
  0x32   : > { %2191 = dma.done.wait (%p2333_p4), %s368_s16, 512  }
  0x33   : > { %2193 = vsyncadd (%p2333_p4), %s368_s16, 4294966784 }
  0x34   : > { %2195 = dma.done.wait (%p2323_p1), [#allocation8], 2048  }
  0x35   : > { %2197 = vsyncadd (%p2323_p1), [#allocation8], 4294965248 }
  0x36   : > { %2199 = dma.done.wait (%p2323_p1), [#allocation11], 1024  }
  0x37   : > { %2201 = vsyncadd (%p2323_p1), [#allocation11], 4294966272  ;;  %s1640_s5 = sshll.u32 %s2416_s20, 6  ;;  %p1641_p8 = scmp.ne.s32.totalorder %s2220_s12, 0 }
  0x38   : > { %s2435_s30 = scalar_lea.vmem [#allocation12], %s1640_s5 }
  0x39   : > { %429 = sbr.rel (%p1641_p8) target bundleno = 65 (0x41), region = 76 }
  0x3e   : > { %v2235_v0 = vmov 0.0  }
  0x3f   : > { %430 = vst [vmem:[#allocation2] sm:$0xff] %v2235_v0 }
  0x40   : > { %431 = vst [vmem:[#allocation2 + $0x8] sm:$0xff] %v2235_v0 }
  0x41 PF: > { %v1796_v1 = vld [vmem:[#allocation7 + $0x38] sm:$0xff]  ;;  %v1795_v2 = vld [vmem:[#allocation7 + $0x30] sm:$0xff]  ;;  %v1794_v3 = vld [vmem:[#allocation7 + $0x28] sm:$0xff]  ;;  %s1814_s29 = sshll.u32 %s2220_s12, 6  ;;  %s1490_s5 = scalar_lea.sflag [#allocation6], %s2416_s20 }
  0x42   : > { %540 = vmatpush.bf16.msra.mxu0 %v1796_v1  ;;  %v1793_v4 = vld [vmem:[#allocation7 + $0x20] sm:$0xff]  ;;  %v1792_v5 = vld [vmem:[#allocation7 + $0x18] sm:$0xff]  ;;  %v1791_v6 = vld [vmem:[#allocation7 + $0x10] sm:$0xff]  ;;  %s1504_s16 = scalar_lea.hbm %s2915_s9, %s1814_s29  ;;  %s2158_s1 = scalar_lea.hbm %s2915_s9, 128 }
  0x43   : > { %v1790_v7 = vld [vmem:[#allocation7 + $0x8] sm:$0xff]  ;;  %v1789_v8 = vld [vmem:[#allocation7] sm:$0xff]  ;;  %v2439_v10 = vld [vmem:[#allocation9 + $0x38] sm:$0xff]  ;;  %s1507_s12 = sshll.u32 %s1504_s16, 4  ;;  %s1508_s12 = int_to_ptr.hbm [resolvable:$true] %s1507_s12 }
  0x44   : > { %v1785_v9 = vld [vmem:[%s2420_s27] sm:$0xff]  ;;  %824 = vmatpush.bf16.msra.mxu1 %v2439_v10  ;;  %857 = vmatpush.bf16.msra.mxu3 %v2439_v10  ;;  %v2445_v11 = vld [vmem:[#allocation9 + $0x30] sm:$0xff]  ;;  %v2451_v12 = vld [vmem:[#allocation9 + $0x28] sm:$0xff]  ;;  %s2152_s14 = sshra.s32 %s1508_s12, 4  ;;  %s2153_s14 = int_to_ptr.hbm [resolvable:$true] %s2152_s14 }
  0x45   : > { %1000 = vmatpush.bf16.msra.mxu2 %v2439_v10  ;;  %v2457_v13 = vld [vmem:[#allocation9 + $0x20] sm:$0xff]  ;;  %v1786_v14 = vld [vmem:[%s2420_s27 + $0x8] sm:$0xff]  ;;  %v2464_v15 = vld [vmem:[#allocation9 + $0x18] sm:$0xff]  ;;  %s2154_s17 = scalar_lea.hbm %s2153_s14, 64  ;;  %p2159_p12 = scmp.lt.s32.totalorder %s2153_s14, %s2915_s9 }
  0x46   : > { %541 = vmatpush.bf16.msra.mxu0 %v1795_v2  ;;  %v2469_v16 = vld [vmem:[#allocation9 + $0x10] sm:$0xff]  ;;  %v2480_v18 = vld [vmem:[#allocation9 + $0x8] sm:$0xff]  ;;  %v2485_v21 = vld [vmem:[#allocation9] sm:$0xff]  ;;  %p2155_p1 = scmp.ne.s32.totalorder %s2153_s14, %s2154_s17  ;;  %p2160_p13 = scmp.lt.s32.totalorder %s2158_s1, %s2154_s17 }
  0x47   : > { %v2476_v17 = vld [vmem:[%s2908_s2] ss:$0 sm:$0xff]  ;;  %v432_v36 = vld [vmem:[%s2420_s27] sm:$0xff]   ;;  %v763_v59 = vld [vmem:[#allocation2 + $0x8] sm:$0xff] }
  0x48   : > { %825 = vmatpush.bf16.msra.mxu1 %v2445_v11  ;;  %858 = vmatpush.bf16.msra.mxu3 %v2445_v11  ;;  %v440_v41 = vunpack.c.l.bf16 %v432_v36  ;;  %v762_v46 = vld [vmem:[#allocation2] sm:$0xff]  ;;  %v441_v55 = vunpack.c.h.bf16 %v432_v36  ;;  %p2156_p4 = pnand %p2155_p1, %p2393_p5  ;;  %p2161_p0 = por %p2160_p13, %p2159_p12 }
  0x49   : > { %1001 = vmatpush.bf16.msra.mxu2 %v2445_v11 }
  0x4a   : > { %542 = vmatpush.bf16.msra.mxu0 %v1794_v3  ;;  %p2157_p10 = pneg %p2156_p4 }
  0x4c   : > { %826 = vmatpush.bf16.msra.mxu1 %v2451_v12  ;;  %859 = vmatpush.bf16.msra.mxu3 %v2451_v12  ;;  %p2162_p3 = pnand %p2161_p0, %p2157_p10 }
  0x4d   : > { %1002 = vmatpush.bf16.msra.mxu2 %v2451_v12 }
  0x4e   : > { %543 = vmatpush.bf16.msra.mxu0 %v1793_v4  ;;  %v1787_v4 = vld [vmem:[%s2420_s27 + $0x10] sm:$0xff] }
  0x50   : > { %827 = vmatpush.bf16.msra.mxu1 %v2457_v13  ;;  %860 = vmatpush.bf16.msra.mxu3 %v2457_v13 }
  0x51   : > { %1003 = vmatpush.bf16.msra.mxu2 %v2457_v13 }
  0x52   : > { %544 = vmatpush.bf16.msra.mxu0 %v1792_v5 }
  0x54   : > { %828 = vmatpush.bf16.msra.mxu1 %v2464_v15  ;;  %861 = vmatpush.bf16.msra.mxu3 %v2464_v15 }
  0x55   : > { %1004 = vmatpush.bf16.msra.mxu2 %v2464_v15 }
  0x56   : > { %545 = vmatpush.bf16.msra.mxu0 %v1791_v6 }
  0x58   : > { %829 = vmatpush.bf16.msra.mxu1 %v2469_v16  ;;  %862 = vmatpush.bf16.msra.mxu3 %v2469_v16 }
  0x59   : > { %1005 = vmatpush.bf16.msra.mxu2 %v2469_v16 }
  0x5a   : > { %546 = vmatpush.bf16.msra.mxu0 %v1790_v7 }
  0x5c   : > { %830 = vmatpush.bf16.msra.mxu1 %v2480_v18  ;;  %863 = vmatpush.bf16.msra.mxu3 %v2480_v18 }
  0x5d   : > { %1006 = vmatpush.bf16.msra.mxu2 %v2480_v18 }
  0x5e   : > { %547 = vmatpush.bf16.msra.mxu0 %v1789_v8  ;;  %v2548_v8 = vld [vmem:[%s2910_s4] ss:$0 sm:$0xff] }
  0x60   : > { %831 = vmatpush.bf16.msra.mxu1 %v2485_v21  ;;  %864 = vmatpush.bf16.msra.mxu3 %v2485_v21 }
  0x61   : > { %548 = vmatmul.bf16.vlgmr.msra.gmra.mxu0 %v1785_v9  ;;  %1007 = vmatpush.bf16.msra.mxu2 %v2485_v21 }
  0x62   : > { %1088 = vmatpush.bf16.msrb.mxu0 %v2439_v10 }
  0x64   : > { %945 = vmatpush.bf16.msrb.mxu1 %v2439_v10  ;;  %912 = vmatpush.bf16.msrb.mxu3 %v2439_v10 }
  0x66   : > { %1089 = vmatpush.bf16.msrb.mxu0 %v2445_v11 }
  0x68   : > { %946 = vmatpush.bf16.msrb.mxu1 %v2445_v11  ;;  %913 = vmatpush.bf16.msrb.mxu3 %v2445_v11 }
  0x6a   : > { %1090 = vmatpush.bf16.msrb.mxu0 %v2451_v12 }
  0x6c   : > { %947 = vmatpush.bf16.msrb.mxu1 %v2451_v12  ;;  %914 = vmatpush.bf16.msrb.mxu3 %v2451_v12 }
  0x6e   : > { %1091 = vmatpush.bf16.msrb.mxu0 %v2457_v13 }
  0x70   : > { %948 = vmatpush.bf16.msrb.mxu1 %v2457_v13  ;;  %915 = vmatpush.bf16.msrb.mxu3 %v2457_v13 }
  0x71   : > { %553 = vmatmul.bf16.gmra.mxu0 %v1786_v14 }
  0x72   : > { %1092 = vmatpush.bf16.msrb.mxu0 %v2464_v15 }
  0x74   : > { %949 = vmatpush.bf16.msrb.mxu1 %v2464_v15  ;;  %916 = vmatpush.bf16.msrb.mxu3 %v2464_v15 }
  0x76   : > { %1093 = vmatpush.bf16.msrb.mxu0 %v2469_v16 }
  0x78   : > { %950 = vmatpush.bf16.msrb.mxu1 %v2469_v16  ;;  %917 = vmatpush.bf16.msrb.mxu3 %v2469_v16 }
  0x7a   : > { %1094 = vmatpush.bf16.msrb.mxu0 %v2480_v18 }
  0x7c   : > { %951 = vmatpush.bf16.msrb.mxu1 %v2480_v18  ;;  %918 = vmatpush.bf16.msrb.mxu3 %v2480_v18 }
  0x7e   : > { %1095 = vmatpush.bf16.msrb.mxu0 %v2485_v21 }
  0x80   : > { %952 = vmatpush.bf16.msrb.mxu1 %v2485_v21  ;;  %919 = vmatpush.bf16.msrb.mxu3 %v2485_v21 }
  0x81   : > { %558 = vmatmul.bf16.gmra.mxu0 %v1787_v4 }
  0xde   : > { %v549_v19 = vpop.f32.mrf.mxu0 }
  0xdf   : > { %v550_v20 = vadd.f32 %v2476_v17, %v549_v19 }
  0xe1   : > { %v1690_v22 = vmul.f32 -1.442695, %v550_v20 }
  0xe3   : > { %1938 = vpow2.f32 %v1690_v22 }
  0xe6   : > { %v551_v23 = vpop.f32.mrf.mxu0 }
  0xe7   : > { %v552_v24 = vadd.f32 %v2476_v17, %v551_v23 }
  0xe9   : > { %v1939_v25 = vpop.eup %1938  ;;  %v1691_v26 = vmul.f32 -1.442695, %v552_v24 }
  0xea   : > { %v593_v27 = vadd.f32 1.0, %v1939_v25 }
  0xeb   : > { %1940 = vpow2.f32 %v1691_v26 }
  0xec   : > { %1942 = vrcp.f32 %v593_v27  ;;  %v612_v33 = vand.u32 2147483648, %v593_v27  ;;  %v610_v35 = vand.u32 2147483647, %v593_v27  ;;  %vm606_vm1 = vweird.f32 %v593_v27 }
  0xee   : > { %v613_v39 = vor.u32 1.1754944e-38, %v612_v33  ;;  %vm611_vm3 = vcmp.eq.f32.partialorder %v610_v35, 8.507059e+37  ;;  %v554_v63 = vpop.f32.mrf.mxu0 }
  0xef   : > { %v555_v0 = vadd.f32 %v2476_v17, %v554_v63 }
  0xf1   : > { %v1941_v28 = vpop.eup %1940  ;;  %v1692_v1 = vmul.f32 -1.442695, %v555_v0 }
  0xf2   : > { %v1943_v29 = vpop.eup %1942  ;;  %v594_v30 = vadd.f32 1.0, %v1941_v28 }
  0xf3   : > { %v602_v31 = vmul.f32 %v1943_v29, %v593_v27  ;;  %vm607_vm0 = vweird.f32 %v1943_v29 }
  0xf4   : > { %1944 = vrcp.f32 %v594_v30  ;;  %vm608_vm2 = vmor %vm606_vm1, %vm607_vm0  ;;  %v627_v47 = vand.u32 2147483648, %v594_v30  ;;  %v625_v50 = vand.u32 2147483647, %v594_v30  ;;  %vm621_vm5 = vweird.f32 %v594_v30 }
  0xf5   : > { %v603_v32 = vsub.f32 1.0, %v602_v31  ;;  %1946 = vpow2.f32 %v1692_v1 }
  0xf6   : > { %v628_v53 = vor.u32 1.1754944e-38, %v627_v47  ;;  %vm626_vm7 = vcmp.eq.f32.partialorder %v625_v50, 8.507059e+37  ;;  %v556_v2 = vpop.f32.mrf.mxu0 }
  0xf7   : > { %v604_v34 = vmul.f32 %v1943_v29, %v603_v32  ;;  %v557_v3 = vadd.f32 %v2476_v17, %v556_v2 }
  0xf9   : > { %v605_v37 = vadd.f32 %v1943_v29, %v604_v34  ;;  %v1693_v6 = vmul.f32 -1.442695, %v557_v3 }
  0xfa   : > { %v1945_v38 = vpop.eup %1944 }
  0xfb   : > { %v617_v40 = vmul.f32 %v1945_v38, %v594_v30  ;;  %v609_v42 = vsel %vm608_vm2, %v1943_v29, %v605_v37  ;;  %vm622_vm4 = vweird.f32 %v1945_v38  ;;  %v1947_v5 = vpop.eup %1946  ;;  %1948 = vpow2.f32 %v1693_v6  ;;  %v1816_v37 = vld [vmem:[%s2420_s27] sm:$0xff]  }
  0xfc   : > { %v614_v43 = vsel %vm611_vm3, %v613_v39, %v609_v42  ;;  %vm623_vm6 = vmor %vm621_vm5, %vm622_vm4  ;;  %v595_v7 = vadd.f32 1.0, %v1947_v5 }
  0xfd   : > { %v618_v44 = vsub.f32 1.0, %v617_v40  ;;  %v721_v45 = vsub.f32 1.0, %v614_v43 }
  0xfe   : > { %1950 = vrcp.f32 %v595_v7  ;;  %vm636_vm8 = vweird.f32 %v595_v7  ;;  %v642_v26 = vand.u32 2147483648, %v595_v7  ;;  %v640_v28 = vand.u32 2147483647, %v595_v7  ;;  %v559_v30 = vpop.f32.mrf.mxu0 }
  0xff   : > { %v619_v48 = vmul.f32 %v1945_v38, %v618_v44  ;;  %v2510_v49 = vmul.f32 %v721_v45, %v440_v41  ;;  %v434_v44 = vld [vmem:[%s2420_s27 + $0x8] sm:$0xff]  }
 0x100   : > { %v643_v33 = vor.u32 1.1754944e-38, %v642_v26  ;;  %vm641_vm11 = vcmp.eq.f32.partialorder %v640_v28, 8.507059e+37 }
 0x101   : > { %v2515_v51 = vadd.f32 %v762_v46, %v2510_v49  ;;  %v620_v52 = vadd.f32 %v1945_v38, %v619_v48  ;;  %v1817_v46 = vunpack.c.l.bf16 %v1816_v37 }
 0x103   : > { %v772_v54 = vpack.c.bf16 %v2515_v51, %v2515_v51  ;;  %v624_v56 = vsel %vm623_vm6, %v1945_v38, %v620_v52  ;;  %v442_v52 = vunpack.c.l.bf16 %v434_v44 }
 0x104   : > { %v629_v57 = vsel %vm626_vm7, %v628_v53, %v624_v56  ;;  %v891_v56 = vsub.f32 %v1817_v46, %v2510_v49 }
 0x105   : > { %832 = vmatmul.bf16.vlgmr.msra.gmra.mxu1 %v772_v54  ;;  %v722_v58 = vsub.f32 1.0, %v629_v57 }
 0x106   : > { %1121 = vmatpush.bf16.msra.mxu1 %v2439_v10 }
 0x107   : > { %v2520_v60 = vmul.f32 %v722_v58, %v441_v55 }
 0x109   : > { %v2523_v61 = vadd.f32 %v763_v59, %v2520_v60 }
 0x10a   : > { %1122 = vmatpush.bf16.msra.mxu1 %v2445_v11 }
 0x10b   : > { %v856_v62 = vpack.c.bf16 %v2523_v61, %v2523_v61 }
 0x10d   : > { %865 = vmatmul.bf16.vlgmr.msra.gmra.mxu3 %v856_v62 }
 0x10e   : > { %1033 = vmatpush.bf16.msra.mxu3 %v2439_v10  ;;  %1123 = vmatpush.bf16.msra.mxu1 %v2451_v12 }
 0x112   : > { %1034 = vmatpush.bf16.msra.mxu3 %v2445_v11  ;;  %1124 = vmatpush.bf16.msra.mxu1 %v2457_v13  ;;  %v1949_v11 = vpop.eup %1948 }
 0x116   : > { %1035 = vmatpush.bf16.msra.mxu3 %v2451_v12  ;;  %1125 = vmatpush.bf16.msra.mxu1 %v2464_v15 }
 0x11a   : > { %1036 = vmatpush.bf16.msra.mxu3 %v2457_v13  ;;  %1126 = vmatpush.bf16.msra.mxu1 %v2469_v16  ;;  %v1951_v13 = vpop.eup %1950 }
 0x11b   : > { %v632_v14 = vmul.f32 %v1951_v13, %v595_v7  ;;  %vm637_vm9 = vweird.f32 %v1951_v13 }
 0x11c   : > { %vm2557_vm10 = vmor %vm636_vm8, %vm637_vm9 }
 0x11d   : > { %v633_v19 = vsub.f32 1.0, %v632_v14  ;;  %v1818_v14 = vunpack.c.h.bf16 %v1816_v37 }
 0x11e   : > { %1037 = vmatpush.bf16.msra.mxu3 %v2464_v15  ;;  %1127 = vmatpush.bf16.msra.mxu1 %v2480_v18  ;;  %v2551_v15 = vadd.f32 1.0, %v1949_v11 }
 0x11f   : > { %v634_v22 = vmul.f32 %v1951_v13, %v633_v19 }
 0x120   : > { %vm651_vm0 = vweird.f32 %v2551_v15  ;;  %v657_v59 = vand.u32 2147483648, %v2551_v15  ;;  %v655_v1 = vand.u32 2147483647, %v2551_v15 }
 0x121   : > { %v635_v27 = vadd.f32 %v1951_v13, %v634_v22 }
 0x122   : > { %1038 = vmatpush.bf16.msra.mxu3 %v2469_v16  ;;  %1128 = vmatpush.bf16.msra.mxu1 %v2485_v21  ;;  %v658_v5 = vor.u32 1.1754944e-38, %v657_v59  ;;  %vm656_vm3 = vcmp.eq.f32.partialorder %v655_v1, 8.507059e+37  ;;  %v1806_v1 = vld [vmem:[#allocation10 + $0x8] sm:$0xff] }
 0x123   : > { %v639_v36 = vsel %vm2557_vm10, %v1951_v13, %v635_v27 }
 0x124   : > { %v644_v45 = vsel %vm641_vm11, %v643_v33, %v639_v36  ;;  %v1812_v36 = vld [vmem:[#allocation10 + $0x38] sm:$0xff] }
 0x125   : > { %v723_v53 = vsub.f32 1.0, %v644_v45  ;;  %1247 = vmatpush.bf16.msrb.mxu2 %v1812_v36 }
 0x126   : > { %1039 = vmatpush.bf16.msra.mxu3 %v2480_v18 }
 0x127   : > { %v2574_v63 = vmul.f32 %v723_v53, %v442_v52  ;;  %v1807_v53 = vld [vmem:[#allocation10 + $0x10] sm:$0xff] }
 0x12a   : > { %1040 = vmatpush.bf16.msra.mxu3 %v2485_v21 }
 0x182   : > { %v833_v9 = vpop.f32.mrf.mxu1 }
 0x183   : > { %v834_v10 = vadd.f32 %v2548_v8, %v833_v9 }
 0x185   : > { %v1730_v12 = vmul.f32 -1.442695, %v834_v10 }
 0x187   : > { %1952 = vpow2.f32 %v1730_v12 }
 0x188   : > { %1954 = vrcp.f32 %v2551_v15 }
 0x18a   : > { %v835_v16 = vpop.f32.mrf.mxu1 }
 0x18b   : > { %v443_v16 = vunpack.c.h.bf16 %v434_v44  ;;  %v1809_v44 = vld [vmem:[#allocation10 + $0x20] sm:$0xff] }
 0x18d   : > { %v1953_v18 = vpop.eup %1952 }
 0x18e   : > { %v840_v20 = vadd.f32 1.0, %v1953_v18  ;;  %v2555_v24 = vpop.eup %1954 }
 0x18f   : > { %v647_v31 = vmul.f32 %v2555_v24, %v2551_v15  ;;  %vm652_vm1 = vweird.f32 %v2555_v24 }
 0x190   : > { %1956 = vrcp.f32 %v840_v20  ;;  %v866_v21 = vpop.f32.mrf.mxu3  ;;  %v852_v39 = vand.u32 2147483648, %v840_v20  ;;  %v850_v42 = vand.u32 2147483647, %v840_v20  ;;  %vm846_vm13 = vweird.f32 %v840_v20  ;;  %vm653_vm2 = vmor %vm651_vm0, %vm652_vm1 }
 0x191   : > { %v867_v23 = vadd.f32 %v2548_v8, %v866_v21  ;;  %v648_v38 = vsub.f32 1.0, %v647_v31  ;;  %v561_v31 = vpop.f32.mrf.mxu0 }
 0x192   : > { %v853_v50 = vor.u32 1.1754944e-38, %v852_v39  ;;  %vm851_vm15 = vcmp.eq.f32.partialorder %v850_v42, 8.507059e+37  ;;  %v562_v33 = vadd.f32 %v2476_v17, %v561_v31 }
 0x193   : > { %v1731_v25 = vmul.f32 -1.442695, %v867_v23  ;;  %v649_v48 = vmul.f32 %v2555_v24, %v648_v38  ;;  %v892_v23 = vsub.f32 %v1818_v14, %v2520_v60  ;;  %v560_v60 = vadd.f32 %v2476_v17, %v559_v30  ;;  %v1811_v38 = vld [vmem:[#allocation10 + $0x30] sm:$0xff] }
 0x194   : > { %1248 = vmatpush.bf16.msrb.mxu2 %v1811_v38 }
 0x195   : > { %1958 = vpow2.f32 %v1731_v25  ;;  %v650_v62 = vadd.f32 %v2555_v24, %v649_v48  ;;  %v1808_v48 = vld [vmem:[#allocation10 + $0x18] sm:$0xff] }
 0x196   : > { %v1957_v29 = vpop.eup %1956 }
 0x197   : > { %v842_v32 = vmul.f32 %v1957_v29, %v840_v20  ;;  %vm847_vm12 = vweird.f32 %v1957_v29  ;;  %v654_v9 = vsel %vm653_vm2, %v2555_v24, %v650_v62 }
 0x198   : > { %v868_v34 = vpop.f32.mrf.mxu3  ;;  %vm848_vm14 = vmor %vm846_vm13, %vm847_vm12  ;;  %v659_v12 = vsel %vm656_vm3, %v658_v5, %v654_v9  ;;  %v1805_v5 = vld [vmem:[#allocation10] sm:$0xff] }
 0x199   : > { %v843_v35 = vsub.f32 1.0, %v842_v32  ;;  %v724_v18 = vsub.f32 1.0, %v659_v12  ;;  %v1694_v32 = vmul.f32 -1.442695, %v560_v60 }
 0x19b   : > { %v1959_v40 = vpop.eup %1958  ;;  %v844_v41 = vmul.f32 %v1957_v29, %v843_v35  ;;  %v2588_v24 = vmul.f32 %v724_v18, %v443_v16  ;;  %v1788_v35 = vld [vmem:[%s2420_s27 + $0x18] sm:$0xff] }
 0x19c   : > { %v873_v43 = vadd.f32 1.0, %v1959_v40  ;;  %563 = vmatmul.bf16.gmra.mxu0 %v1788_v35  ;;  %v1810_v40 = vld [vmem:[#allocation10 + $0x28] sm:$0xff] }
 0x19d   : > { %v845_v47 = vadd.f32 %v1957_v29, %v844_v41  ;;  %1249 = vmatpush.bf16.msrb.mxu2 %v1810_v40 }
 0x19e   : > { %1960 = vrcp.f32 %v873_v43  ;;  %v885_v10 = vand.u32 2147483648, %v873_v43  ;;  %v883_v11 = vand.u32 2147483647, %v873_v43  ;;  %vm879_vm5 = vweird.f32 %v873_v43 }
 0x19f   : > { %v849_v54 = vsel %vm848_vm14, %v1957_v29, %v845_v47  ;;  %1962 = vpow2.f32 %v1694_v32 }
 0x1a0   : > { %v854_v55 = vsel %vm851_vm15, %v853_v50, %v849_v54  ;;  %v886_v15 = vor.u32 1.1754944e-38, %v885_v10  ;;  %vm884_vm7 = vcmp.eq.f32.partialorder %v883_v11, 8.507059e+37 }
 0x1a1   : > { %v897_v57 = vsub.f32 1.0, %v854_v55  ;;  %v889_v58 = vmul.f32 %v854_v55, %v2515_v51  ;;  %1250 = vmatpush.bf16.msrb.mxu2 %v1809_v44 }
 0x1a3   : > { %v898_v0 = vmul.f32 %v897_v57, %v2515_v51  ;;  %v2578_v2 = vadd.f32 %v891_v56, %v889_v58 }
 0x1a4   : > { %v1961_v49 = vpop.eup %1960 }
 0x1a5   : > { %v875_v3 = vmul.f32 %v1961_v49, %v873_v43  ;;  %v2581_v4 = vadd.f32 %v898_v0, %v2574_v63  ;;  %vm880_vm4 = vweird.f32 %v1961_v49  ;;  %v1963_v34 = vpop.eup %1962  ;;  %1251 = vmatpush.bf16.msrb.mxu2 %v1808_v48 }
 0x1a6   : > { %vm881_vm6 = vmor %vm879_vm5, %vm880_vm4  ;;  %v597_v37 = vadd.f32 1.0, %v1963_v34 }
 0x1a7   : > { %v876_v6 = vsub.f32 1.0, %v875_v3  ;;  %v911_v7 = vpack.c.bf16 %v2581_v4, %v2581_v4 }
 0x1a8   : > { %vm666_vm8 = vweird.f32 %v597_v37  ;;  %v670_v9 = vand.u32 2147483647, %v597_v37 }
 0x1a9   : > { %v877_v51 = vmul.f32 %v1961_v49, %v876_v6  ;;  %920 = vmatmul.bf16.vlgmr.msrb.gmra.mxu3 %v911_v7  ;;  %1252 = vmatpush.bf16.msrb.mxu2 %v1807_v53  ;;  %v672_v6 = vand.u32 2147483648, %v597_v37 }
 0x1aa   : > { %vm671_vm11 = vcmp.eq.f32.partialorder %v670_v9, 8.507059e+37 }
 0x1ab   : > { %v878_v13 = vadd.f32 %v1961_v49, %v877_v51 }
 0x1ad   : > { %v882_v19 = vsel %vm881_vm6, %v1961_v49, %v878_v13  ;;  %1253 = vmatpush.bf16.msrb.mxu2 %v1806_v1 }
 0x1ae   : > { %v887_v20 = vsel %vm884_vm7, %v886_v15, %v882_v19  ;;  %v673_v15 = vor.u32 1.1754944e-38, %v672_v6 }
 0x1af   : > { %v899_v21 = vsub.f32 1.0, %v887_v20  ;;  %v890_v22 = vmul.f32 %v887_v20, %v2523_v61 }
 0x1b1   : > { %v900_v25 = vmul.f32 %v899_v21, %v2523_v61  ;;  %v2591_v26 = vadd.f32 %v892_v23, %v890_v22  ;;  %v1695_v61 = vmul.f32 -1.442695, %v562_v33  ;;  %1254 = vmatpush.bf16.msrb.mxu2 %v1805_v5 }
 0x1b3   : > { %v2594_v27 = vadd.f32 %v900_v25, %v2588_v24  ;;  %v1175_v28 = vpack.c.bf16 %v2591_v26, %v2578_v2  ;;  %1964 = vpow2.f32 %v1695_v61  ;;  %v436_v25 = vld [vmem:[%s2420_s27 + $0x10] sm:$0xff]  }
 0x1b4   : > { %1966 = vrcp.f32 %v597_v37  ;;  %v444_v34 = vunpack.c.l.bf16 %v436_v25 }
 0x1b5   : > { %v944_v29 = vpack.c.bf16 %v2594_v27, %v2594_v27 }
 0x1b7   : > { %953 = vmatmul.bf16.vlgmr.msrb.gmra.mxu1 %v944_v29 }
 0x1b9   : > { %v1965_v39 = vpop.eup %1964 }
 0x1ba   : > { %v2603_v41 = vadd.f32 1.0, %v1965_v39  ;;  %v1967_v45 = vpop.eup %1966 }
 0x1bb   : > { %v662_v47 = vmul.f32 %v1967_v45, %v597_v37  ;;  %vm667_vm9 = vweird.f32 %v1967_v45 }
 0x1bc   : > { %1968 = vrcp.f32 %v2603_v41  ;;  %vm2612_vm10 = vmor %vm666_vm8, %vm667_vm9  ;;  %vm681_vm12 = vweird.f32 %v2603_v41  ;;  %v685_v18 = vand.u32 2147483647, %v2603_v41  ;;  %v687_v21 = vand.u32 2147483648, %v2603_v41 }
 0x1bd   : > { %v663_v56 = vsub.f32 1.0, %v662_v47 }
 0x1be   : > { %vm2629_vm0 = vcmp.eq.f32.partialorder %v685_v18, 8.507059e+37  ;;  %v688_v61 = vor.u32 1.1754944e-38, %v687_v21 }
 0x1bf   : > { %v664_v0 = vmul.f32 %v1967_v45, %v663_v56 }
 0x1c1   : > { %v665_v7 = vadd.f32 %v1967_v45, %v664_v0 }
 0x1c2   : > { %v2607_v54 = vpop.eup %1968 }
 0x1c3   : > { %v677_v59 = vmul.f32 %v2607_v54, %v2603_v41  ;;  %v669_v16 = vsel %vm2612_vm10, %v1967_v45, %v665_v7  ;;  %vm682_vm13 = vweird.f32 %v2607_v54 }
 0x1c4   : > { %v674_v29 = vsel %vm671_vm11, %v673_v15, %v669_v16  ;;  %vm2625_vm15 = vmor %vm681_vm12, %vm682_vm13 }
 0x1c5   : > { %v678_v49 = vsub.f32 1.0, %v677_v59  ;;  %v725_v35 = vsub.f32 1.0, %v674_v29 }
 0x1c7   : > { %v679_v12 = vmul.f32 %v2607_v54, %v678_v49  ;;  %v2637_v45 = vmul.f32 %v725_v35, %v444_v34  ;;  %v2672_v34 = vld [vmem:[%s2912_s6] ss:$0 sm:$0xff] }
 0x1c9   : > { %v680_v20 = vadd.f32 %v2607_v54, %v679_v12 }
 0x1cb   : > { %v684_v39 = vsel %vm2625_vm15, %v2607_v54, %v680_v20 }
 0x22c   : > { %v921_v42 = vpop.f32.mrf.mxu3 }
 0x22d   : > { %v922_v43 = vadd.f32 %v2548_v8, %v921_v42 }
 0x22f   : > { %v1734_v46 = vmul.f32 -1.442695, %v922_v43  ;;  %v1831_v43 = vld [vmem:[%s2420_s27 + $0x8] sm:$0xff]  }
 0x231   : > { %1970 = vpow2.f32 %v1734_v46  ;;  %v689_v46 = vsel %vm2629_vm0, %v688_v61, %v684_v39 }
 0x234   : > { %v923_v50 = vpop.f32.mrf.mxu3  ;;  %v954_v52 = vpop.f32.mrf.mxu1 }
 0x235   : > { %v955_v55 = vadd.f32 %v2548_v8, %v954_v52  ;;  %v1821_v52 = vunpack.c.l.bf16 %v1831_v43 }
 0x237   : > { %v1971_v57 = vpop.eup %1970  ;;  %v1735_v58 = vmul.f32 -1.442695, %v955_v55  ;;  %v1822_v55 = vunpack.c.h.bf16 %v1831_v43  ;;  %v979_v5 = vsub.f32 %v1821_v52, %v2574_v63  ;;  %v564_v63 = vpop.f32.mrf.mxu0 }
 0x238   : > { %v928_v62 = vadd.f32 1.0, %v1971_v57  ;;  %v445_v57 = vunpack.c.h.bf16 %v436_v25 }
 0x239   : > { %1972 = vpow2.f32 %v1735_v58  ;;  %v726_v58 = vsub.f32 1.0, %v689_v46  ;;  %v980_v6 = vsub.f32 %v1822_v55, %v2588_v24  ;;  %v565_v24 = vadd.f32 %v2476_v17, %v564_v63 }
 0x23a   : > { %1974 = vrcp.f32 %v928_v62  ;;  %v940_v22 = vand.u32 2147483648, %v928_v62  ;;  %v938_v30 = vand.u32 2147483647, %v928_v62  ;;  %vm934_vm1 = vweird.f32 %v928_v62 }
 0x23b   : > { %v2651_v7 = vmul.f32 %v726_v58, %v445_v57 }
 0x23c   : > { %v956_v3 = vpop.f32.mrf.mxu1  ;;  %v941_v36 = vor.u32 1.1754944e-38, %v940_v22  ;;  %vm939_vm3 = vcmp.eq.f32.partialorder %v938_v30, 8.507059e+37 }
 0x23f   : > { %v1973_v10 = vpop.eup %1972 }
 0x240   : > { %v1975_v11 = vpop.eup %1974  ;;  %v961_v13 = vadd.f32 1.0, %v1973_v10 }
 0x241   : > { %v930_v14 = vmul.f32 %v1975_v11, %v928_v62  ;;  %vm935_vm14 = vweird.f32 %v1975_v11 }
 0x242   : > { %1976 = vrcp.f32 %v961_v13  ;;  %vm936_vm2 = vmor %vm934_vm1, %vm935_vm14  ;;  %v973_v44 = vand.u32 2147483648, %v961_v13  ;;  %v971_v48 = vand.u32 2147483647, %v961_v13  ;;  %vm967_vm5 = vweird.f32 %v961_v13 }
 0x243   : > { %v931_v19 = vsub.f32 1.0, %v930_v14 }
 0x244   : > { %v974_v56 = vor.u32 1.1754944e-38, %v973_v44  ;;  %vm972_vm7 = vcmp.eq.f32.partialorder %v971_v48, 8.507059e+37 }
 0x245   : > { %v932_v23 = vmul.f32 %v1975_v11, %v931_v19 }
 0x247   : > { %v933_v32 = vadd.f32 %v1975_v11, %v932_v23 }
 0x248   : > { %v1977_v33 = vpop.eup %1976 }
 0x249   : > { %v963_v37 = vmul.f32 %v1977_v33, %v961_v13  ;;  %v937_v38 = vsel %vm936_vm2, %v1975_v11, %v933_v32  ;;  %vm968_vm4 = vweird.f32 %v1977_v33  ;;  %v1696_v13 = vmul.f32 -1.442695, %v565_v24 }
 0x24a   : > { %v942_v40 = vsel %vm939_vm3, %v941_v36, %v937_v38  ;;  %vm969_vm6 = vmor %vm967_vm5, %vm968_vm4 }
 0x24b   : > { %v964_v41 = vsub.f32 1.0, %v963_v37  ;;  %v985_v42 = vsub.f32 1.0, %v942_v40  ;;  %v977_v0 = vmul.f32 %v942_v40, %v2581_v4  ;;  %1978 = vpow2.f32 %v1696_v13 }
 0x24d   : > { %v965_v47 = vmul.f32 %v1977_v33, %v964_v41  ;;  %v986_v50 = vmul.f32 %v985_v42, %v2581_v4  ;;  %v981_v10 = vadd.f32 %v979_v5, %v977_v0  ;;  %v438_v5 = vld [vmem:[%s2420_s27 + $0x18] sm:$0xff]  }
 0x24e   : > { %v446_v24 = vunpack.c.l.bf16 %v438_v5 }
 0x24f   : > { %v966_v53 = vadd.f32 %v1977_v33, %v965_v47  ;;  %v2643_v54 = vadd.f32 %v986_v50, %v2637_v45 }
 0x251   : > { %v970_v59 = vsel %vm969_vm6, %v1977_v33, %v966_v53  ;;  %v999_v62 = vpack.c.bf16 %v2643_v54, %v2643_v54  ;;  %v1979_v16 = vpop.eup %1978 }
 0x252   : > { %v975_v1 = vsel %vm972_vm7, %v974_v56, %v970_v59  ;;  %v599_v18 = vadd.f32 1.0, %v1979_v16 }
 0x253   : > { %1008 = vmatmul.bf16.vlgmr.msra.gmra.mxu2 %v999_v62  ;;  %v987_v49 = vsub.f32 1.0, %v975_v1  ;;  %v978_v3 = vmul.f32 %v975_v1, %v2594_v27 }
 0x254   : > { %vm696_vm8 = vweird.f32 %v599_v18  ;;  %v702_v35 = vand.u32 2147483648, %v599_v18  ;;  %v700_v41 = vand.u32 2147483647, %v599_v18 }
 0x255   : > { %v988_v9 = vmul.f32 %v987_v49, %v2594_v27  ;;  %v982_v51 = vadd.f32 %v980_v6, %v978_v3  ;;  %v566_v27 = vpop.f32.mrf.mxu0 }
 0x256   : > { %v567_v14 = vadd.f32 %v2476_v17, %v566_v27  ;;  %v703_v47 = vor.u32 1.1754944e-38, %v702_v35  ;;  %vm701_vm11 = vcmp.eq.f32.partialorder %v700_v41, 8.507059e+37 }
 0x257   : > { %v2655_v11 = vadd.f32 %v988_v9, %v2651_v7  ;;  %v1176_v12 = vpack.c.bf16 %v982_v51, %v981_v10 }
 0x258   : > { %v1697_v15 = vmul.f32 -1.442695, %v567_v14 }
 0x259   : > { %v1032_v4 = vpack.c.bf16 %v2655_v11, %v2655_v11 }
 0x25a   : > { %1980 = vpow2.f32 %v1697_v15 }
 0x25b   : > { %1041 = vmatmul.bf16.vlgmr.msra.gmra.mxu3 %v1032_v4  ;;  %1982 = vrcp.f32 %v599_v18 }
 0x260   : > { %v1981_v19 = vpop.eup %1980 }
 0x261   : > { %v600_v20 = vadd.f32 1.0, %v1981_v19  ;;  %v1983_v26 = vpop.eup %1982 }
 0x262   : > { %v692_v22 = vmul.f32 %v1983_v26, %v599_v18  ;;  %vm697_vm9 = vweird.f32 %v1983_v26 }
 0x263   : > { %1255 = vmatmul.bf16.vlgmr.msrb.gmra.mxu2 %v1175_v28  ;;  %1984 = vrcp.f32 %v600_v20  ;;  %vm2677_vm10 = vmor %vm696_vm8, %vm697_vm9  ;;  %vm711_vm12 = vweird.f32 %v600_v20  ;;  %v715_v55 = vand.u32 2147483647, %v600_v20  ;;  %v717_v58 = vand.u32 2147483648, %v600_v20 }
 0x264   : > { %v693_v17 = vsub.f32 1.0, %v692_v22 }
 0x265   : > { %vm2700_vm0 = vcmp.eq.f32.partialorder %v715_v55, 8.507059e+37  ;;  %v718_v4 = vor.u32 1.1754944e-38, %v717_v58 }
 0x266   : > { %v694_v61 = vmul.f32 %v1983_v26, %v693_v17 }
 0x268   : > { %v695_v40 = vadd.f32 %v1983_v26, %v694_v61 }
 0x269   : > { %v2665_v29 = vpop.eup %1984 }
 0x26a   : > { %v707_v32 = vmul.f32 %v2665_v29, %v600_v20  ;;  %v699_v53 = vsel %vm2677_vm10, %v1983_v26, %v695_v40  ;;  %vm712_vm13 = vweird.f32 %v2665_v29  ;;  %v1832_v20 = vld [vmem:[%s2420_s27 + $0x10] sm:$0xff]  }
 0x26b   : > { %v704_v0 = vsel %vm701_vm11, %v703_v47, %v699_v53  ;;  %vm2696_vm15 = vmor %vm711_vm12, %vm712_vm13  ;;  %v1825_v17 = vunpack.c.l.bf16 %v1832_v20 }
 0x26c   : > { %v708_v36 = vsub.f32 1.0, %v707_v32  ;;  %v727_v13 = vsub.f32 1.0, %v704_v0 }
 0x26d   : > { %v1067_v42 = vsub.f32 %v1825_v17, %v2637_v45 }
 0x26e   : > { %v709_v48 = vmul.f32 %v2665_v29, %v708_v36 }
 0x270   : > { %v710_v57 = vadd.f32 %v2665_v29, %v709_v48 }
 0x272   : > { %v714_v15 = vsel %vm2696_vm15, %v2665_v29, %v710_v57 }
 0x273   : > { %1260 = vmatmul.bf16.gmra.mxu2 %v1176_v12  ;;  %v719_v26 = vsel %vm2700_vm0, %v718_v4, %v714_v15 }
 0x274   : > { %v728_v61 = vsub.f32 1.0, %v719_v26 }
 0x2d6   : > { %v1009_v21 = vpop.f32.mrf.mxu2 }
 0x2d7   : > { %v1010_v2 = vadd.f32 %v2548_v8, %v1009_v21 }
 0x2d9   : > { %v1738_v28 = vmul.f32 -1.442695, %v1010_v2  ;;  %v2712_v2 = vmul.f32 %v727_v13, %v446_v24  ;;  %v1324_v24 = vlaneseq }
 0x2db   : > { %1986 = vpow2.f32 %v1738_v28 }
 0x2de   : > { %v1011_v23 = vpop.f32.mrf.mxu2  ;;  %v1042_v25 = vpop.f32.mrf.mxu3 }
 0x2df   : > { %v1043_v30 = vadd.f32 %v2548_v8, %v1042_v25 }
 0x2e1   : > { %v1987_v60 = vpop.eup %1986  ;;  %v1739_v31 = vmul.f32 -1.442695, %v1043_v30  ;;  %v1826_v30 = vunpack.c.h.bf16 %v1832_v20 }
 0x2e2   : > { %v1016_v33 = vadd.f32 1.0, %v1987_v60 }
 0x2e3   : > { %1988 = vpow2.f32 %v1739_v31 }
 0x2e4   : > { %1990 = vrcp.f32 %v1016_v33  ;;  %v1028_v59 = vand.u32 2147483648, %v1016_v33  ;;  %v1026_v49 = vand.u32 2147483647, %v1016_v33  ;;  %vm1022_vm1 = vweird.f32 %v1016_v33 }
 0x2e6   : > { %v1044_v37 = vpop.f32.mrf.mxu3  ;;  %v1256_v38 = vpop.f32.mrf.mxu2  ;;  %v1029_v63 = vor.u32 1.1754944e-38, %v1028_v59  ;;  %vm1027_vm3 = vcmp.eq.f32.partialorder %v1026_v49, 8.507059e+37 }
 0x2e7   : > { %v2675_v39 = vadd.f32 %v2672_v34, %v1256_v38 }
 0x2e9   : > { %v1989_v43 = vpop.eup %1988  ;;  %v1276_v44 = vmax.f32 %v2675_v39, 0.0 }
 0x2ea   : > { %v1991_v46 = vpop.eup %1990  ;;  %v2683_v50 = vadd.f32 1.0, %v1989_v43  ;;  %v1068_v43 = vsub.f32 %v1826_v30, %v2651_v7 }
 0x2eb   : > { %v1018_v52 = vmul.f32 %v1991_v46, %v1016_v33  ;;  %1284 = vadd.xlane.f32.xlu0 %v1276_v44  ;;  %vm1023_vm14 = vweird.f32 %v1991_v46  ;;  %v447_v33 = vunpack.c.h.bf16 %v438_v5 }
 0x2ec   : > { %1992 = vrcp.f32 %v2683_v50  ;;  %vm1024_vm2 = vmor %vm1022_vm1, %vm1023_vm14  ;;  %v1059_v28 = vand.u32 2147483647, %v2683_v50  ;;  %v1061_v22 = vand.u32 2147483648, %v2683_v50  ;;  %vm1055_vm5 = vweird.f32 %v2683_v50 }
 0x2ed   : > { %v1019_v56 = vsub.f32 1.0, %v1018_v52  ;;  %v2735_v48 = vmul.f32 %v728_v61, %v447_v33 }
 0x2ee   : > { %v1258_v62 = vpop.f32.mrf.mxu2  ;;  %v1062_v35 = vor.u32 1.1754944e-38, %v1061_v22  ;;  %vm1060_vm7 = vcmp.eq.f32.partialorder %v1059_v28, 8.507059e+37 }
 0x2ef   : > { %v1020_v1 = vmul.f32 %v1991_v46, %v1019_v56  ;;  %v2693_v3 = vadd.f32 %v2672_v34, %v1258_v62 }
 0x2f1   : > { %v1277_v10 = vmax.f32 %v2693_v3, 0.0  ;;  %v1021_v51 = vadd.f32 %v1991_v46, %v1020_v1 }
 0x2f2   : > { %v1993_v12 = vpop.eup %1992 }
 0x2f3   : > { %v1051_v27 = vmul.f32 %v1993_v12, %v2683_v50  ;;  %1286 = vadd.xlane.f32.xlu0 %v1277_v10  ;;  %v1025_v14 = vsel %vm1024_vm2, %v1991_v46, %v1021_v51  ;;  %vm1056_vm4 = vweird.f32 %v1993_v12 }
 0x2f4   : > { %v1030_v16 = vsel %vm1027_vm3, %v1029_v63, %v1025_v14  ;;  %vm1057_vm6 = vmor %vm1055_vm5, %vm1056_vm4 }
 0x2f5   : > { %v1052_v18 = vsub.f32 1.0, %v1051_v27  ;;  %v1073_v19 = vsub.f32 1.0, %v1030_v16  ;;  %v1065_v38 = vmul.f32 %v1030_v16, %v2643_v54  ;;  %v1325_v16 = vand.u32 127, %v1324_v24 }
 0x2f6   : > { %v1261_v21 = vpop.f32.mrf.mxu2 }
 0x2f7   : > { %v2719_v23 = vadd.f32 %v2672_v34, %v1261_v21  ;;  %v1074_v25 = vmul.f32 %v1073_v19, %v2643_v54  ;;  %v1053_v29 = vmul.f32 %v1993_v12, %v1052_v18  ;;  %v1069_v52 = vadd.f32 %v1067_v42, %v1065_v38  ;;  %v1833_v42 = vld [vmem:[%s2420_s27 + $0x18] sm:$0xff]   ;;  %s1505_s27 = sshll.u32 %s2435_s30, 4  ;;  %s1506_s27 = int_to_ptr.vmem [resolvable:$true] %s1505_s27 }
 0x2f8   : > { %vm1326_vm8 = vcmp.lt.s32.totalorder %v1325_v16, 32 }
 0x2f9   : > { %v1278_v60 = vmax.f32 %v2719_v23, 0.0  ;;  %v2724_v31 = vadd.f32 %v1074_v25, %v2712_v2  ;;  %v1054_v32 = vadd.f32 %v1993_v12, %v1053_v29 }
 0x2fb   : > { %1288 = vadd.xlane.f32.xlu1 %v1278_v60  ;;  %v1087_v36 = vpack.c.bf16 %v2724_v31, %v2724_v31  ;;  %v1058_v37 = vsel %vm1057_vm6, %v1993_v12, %v1054_v32  ;;  %v2236_v32 = vmov 0.0  }
 0x2fc   : > { %v1063_v40 = vsel %vm1060_vm7, %v1062_v35, %v1058_v37  ;;  %v2769_v33 = vsel %vm1326_vm8, 1.0, %v2236_v32 }
 0x2fd   : > { %1096 = vmatmul.bf16.vlgmr.msrb.gmra.mxu0 %v1087_v36  ;;  %v1066_v41 = vmul.f32 %v1063_v40, %v2655_v11  ;;  %v1075_v46 = vsub.f32 1.0, %v1063_v40 }
 0x2fe   : > { %v1263_v47 = vpop.f32.mrf.mxu2 }
 0x2ff   : > { %v2738_v50 = vadd.f32 %v2672_v34, %v1263_v47  ;;  %v1070_v53 = vadd.f32 %v1068_v43, %v1066_v41  ;;  %v1076_v55 = vmul.f32 %v1075_v46, %v2655_v11 }
 0x301   : > { %v1279_v54 = vmax.f32 %v2738_v50, 0.0  ;;  %v2743_v56 = vadd.f32 %v1076_v55, %v2735_v48  ;;  %v1177_v57 = vpack.c.bf16 %v1070_v53, %v1069_v52  ;;  %v1829_v53 = vunpack.c.l.bf16 %v1833_v42 }
 0x303   : > { %1265 = vmatmul.bf16.gmra.mxu2 %v1177_v57  ;;  %1290 = vadd.xlane.f32.xlu1 %v1279_v54  ;;  %v1120_v45 = vpack.c.bf16 %v2743_v56, %v2743_v56  ;;  %v1830_v57 = vunpack.c.h.bf16 %v1833_v42 }
 0x305   : > { %1129 = vmatmul.bf16.vlgmr.msra.gmra.mxu1 %v1120_v45 }
 0x35e   : > { %v1285_v4 = vpop.xlane.xlu0 %1284 }
 0x35f   : > { %v1300_v13 = vmul.f32 0.03125, %v1285_v4 }
 0x361   : > { %v2762_v20 = vsub.f32 %v1276_v44, %v1300_v13 }
 0x363   : > { %v1316_v30 = vmul.f32 %v2762_v20, %v2762_v20 }
 0x365   : > { %v1329_v41 = vmul.f32 %v2769_v33, %v1316_v30 }
 0x366   : > { %v1287_v32 = vpop.xlane.xlu0 %1286 }
 0x36e   : > { %v2752_v51 = vpop.xlane.xlu1 %1288 }
 0x376   : > { %v1291_v28 = vpop.xlane.xlu1 %1290 }
 0x377   : > { %v1303_v17 = vmul.f32 0.03125, %v1291_v28 }
 0x379   : > { %v2771_v38 = vsub.f32 %v1279_v54, %v1303_v17 }
 0x37a   : > { %v1097_v7 = vpop.f32.mrf.mxu0 }
 0x37b   : > { %v1098_v58 = vadd.f32 %v2548_v8, %v1097_v7  ;;  %v1319_v55 = vmul.f32 %v2771_v38, %v2771_v38 }
 0x37d   : > { %v1742_v59 = vmul.f32 -1.442695, %v1098_v58 }
 0x37f   : > { %1994 = vpow2.f32 %v1742_v59 }
 0x382   : > { %v1099_v62 = vpop.f32.mrf.mxu0  ;;  %v1130_v0 = vpop.f32.mrf.mxu1 }
 0x383   : > { %v1131_v11 = vadd.f32 %v2548_v8, %v1130_v0  ;;  %v1155_v62 = vsub.f32 %v1829_v53, %v2712_v2  ;;  %v1332_v0 = vmul.f32 %v2769_v33, %v1319_v55  ;;  %v1302_v53 = vmul.f32 0.03125, %v2752_v51 }
 0x385   : > { %v1995_v1 = vpop.eup %1994  ;;  %v1743_v49 = vmul.f32 -1.442695, %v1131_v11 }
 0x386   : > { %v1104_v5 = vadd.f32 1.0, %v1995_v1  ;;  %v1266_v6 = vpop.f32.mrf.mxu2  ;;  %v1156_v1 = vsub.f32 %v1830_v57, %v2735_v48 }
 0x387   : > { %1996 = vpow2.f32 %v1743_v49  ;;  %v2750_v9 = vadd.f32 %v2672_v34, %v1266_v6 }
 0x388   : > { %1998 = vrcp.f32 %v1104_v5  ;;  %v1116_v22 = vand.u32 2147483648, %v1104_v5  ;;  %v1114_v29 = vand.u32 2147483647, %v1104_v5  ;;  %vm1110_vm10 = vweird.f32 %v1104_v5 }
 0x389   : > { %v1280_v12 = vmax.f32 %v2750_v9, 0.0 }
 0x38a   : > { %v1132_v63 = vpop.f32.mrf.mxu1  ;;  %v1117_v61 = vor.u32 1.1754944e-38, %v1116_v22  ;;  %vm1115_vm12 = vcmp.eq.f32.partialorder %v1114_v29, 8.507059e+37  ;;  %v2787_v29 = vld [vmem:[%s2913_s7] ss:$0 sm:$0xff] }
 0x38b   : > { %1292 = vadd.xlane.f32.xlu2 %v1280_v12 }
 0x38d   : > { %v1997_v8 = vpop.eup %1996 }
 0x38e   : > { %v1999_v27 = vpop.eup %1998  ;;  %v1137_v14 = vadd.f32 1.0, %v1997_v8  ;;  %v1268_v15 = vpop.f32.mrf.mxu2 }
 0x38f   : > { %v1106_v18 = vmul.f32 %v1999_v27, %v1104_v5  ;;  %v2758_v19 = vadd.f32 %v2672_v34, %v1268_v15  ;;  %vm1111_vm9 = vweird.f32 %v1999_v27 }
 0x390   : > { %2000 = vrcp.f32 %v1137_v14  ;;  %vm1112_vm11 = vmor %vm1110_vm10, %vm1111_vm9  ;;  %v1149_v46 = vand.u32 2147483648, %v1137_v14  ;;  %v1147_v50 = vand.u32 2147483647, %v1137_v14  ;;  %vm1143_vm14 = vweird.f32 %v1137_v14 }
 0x391   : > { %v1107_v21 = vsub.f32 1.0, %v1106_v18  ;;  %v1281_v26 = vmax.f32 %v2758_v19, 0.0 }
 0x392   : > { %v1150_v54 = vor.u32 1.1754944e-38, %v1149_v46  ;;  %vm1148_vm0 = vcmp.eq.f32.partialorder %v1147_v50, 8.507059e+37 }
 0x393   : > { %1294 = vadd.xlane.f32.xlu2 %v1281_v26  ;;  %v1108_v25 = vmul.f32 %v1999_v27, %v1107_v21 }
 0x395   : > { %v1109_v39 = vadd.f32 %v1999_v27, %v1108_v25 }
 0x396   : > { %v2001_v44 = vpop.eup %2000 }
 0x397   : > { %v1139_v35 = vmul.f32 %v2001_v44, %v1137_v14  ;;  %v1113_v36 = vsel %vm1112_vm11, %v1999_v27, %v1109_v39  ;;  %vm1144_vm13 = vweird.f32 %v2001_v44  ;;  %v2792_v39 = vld [vmem:[%s2914_s8] ss:$0 sm:$0xff] }
 0x398   : > { %v1118_v37 = vsel %vm1115_vm12, %v1117_v61, %v1113_v36  ;;  %vm1145_vm15 = vmor %vm1143_vm14, %vm1144_vm13 }
 0x399   : > { %v1140_v40 = vsub.f32 1.0, %v1139_v35  ;;  %v1161_v43 = vsub.f32 1.0, %v1118_v37  ;;  %v1153_v58 = vmul.f32 %v1118_v37, %v2724_v31  ;;  %v1301_v37 = vmul.f32 0.03125, %v1287_v32 }
 0x39b   : > { %1337 = vadd.xlane.f32.xlu2 %v1329_v41  ;;  %v1141_v47 = vmul.f32 %v2001_v44, %v1140_v40  ;;  %v1162_v52 = vmul.f32 %v1161_v43, %v2724_v31  ;;  %v1157_v5 = vadd.f32 %v1155_v62, %v1153_v58 }
 0x39d   : > { %v1142_v45 = vadd.f32 %v2001_v44, %v1141_v47  ;;  %1165 = vst [vmem:[#allocation2] sm:$0xff] %v1162_v52 }
 0x39f   : > { %v1146_v7 = vsel %vm1145_vm15, %v2001_v44, %v1142_v45 }
 0x3a0   : > { %v1151_v59 = vsel %vm1148_vm0, %v1150_v54, %v1146_v7 }
 0x3a1   : > { %v1154_v11 = vmul.f32 %v1151_v59, %v2743_v56  ;;  %v1163_v49 = vsub.f32 1.0, %v1151_v59 }
 0x3a3   : > { %1343 = vadd.xlane.f32.xlu2 %v1332_v0  ;;  %v1158_v6 = vadd.f32 %v1156_v1, %v1154_v11  ;;  %v1164_v4 = vmul.f32 %v1163_v49, %v2743_v56 }
 0x3a5   : > { %1166 = vst [vmem:[#allocation2 + $0x8] sm:$0xff] %v1164_v4  ;;  %v1178_v63 = vpack.c.bf16 %v1158_v6, %v1157_v5 }
 0x3a7   : > { %1270 = vmatmul.bf16.gmra.mxu2 %v1178_v63 }
 0x3fe   : > { %v1293_v24 = vpop.xlane.xlu2 %1292 }
 0x3ff   : > { %v1304_v55 = vmul.f32 0.03125, %v1293_v24 }
 0x406   : > { %v1295_v31 = vpop.xlane.xlu2 %1294 }
 0x407   : > { %v1305_v58 = vmul.f32 0.03125, %v1295_v31 }
 0x409   : > { %v2826_v23 = vsub.f32 %v1281_v26, %v1305_v58 }
 0x40e   : > { %v1338_v8 = vpop.xlane.xlu2 %1337 }
 0x40f   : > { %v1353_v13 = vmul.f32 0.03125, %v1338_v8 }
 0x411   : > { %v1361_v2 = vadd.f32 1e-05, %v1353_v13 }
 0x413   : > { %2002 = vrsqrt.f32 %v1361_v2  ;;  %vm1375_vm2 = vweird.f32 %v1361_v2 }
 0x416   : > { %v1344_v27 = vpop.xlane.xlu2 %1343 }
 0x417   : > { %v1356_v14 = vmul.f32 0.03125, %v1344_v27 }
 0x419   : > { %v2003_v15 = vpop.eup %2002  ;;  %v1364_v16 = vadd.f32 1e-05, %v1356_v14 }
 0x41a   : > { %v1370_v48 = vmul.f32 %v2003_v15, %v1361_v2  ;;  %vm1376_vm1 = vweird.f32 %v2003_v15 }
 0x41b   : > { %2004 = vrsqrt.f32 %v1364_v16  ;;  %vm1377_vm3 = vmor %vm1375_vm2, %vm1376_vm1  ;;  %vm1405_vm5 = vweird.f32 %v1364_v16 }
 0x41c   : > { %v1371_v18 = vmul.f32 %v2003_v15, %v1370_v48 }
 0x41e   : > { %v1372_v21 = vmul.f32 0.5, %v1371_v18 }
 0x420   : > { %v1373_v28 = vsub.f32 1.5, %v1372_v21 }
 0x421   : > { %v2005_v56 = vpop.eup %2004 }
 0x422   : > { %v1374_v22 = vmul.f32 %v2003_v15, %v1373_v28  ;;  %v1400_v25 = vmul.f32 %v2005_v56, %v1364_v16  ;;  %vm1406_vm4 = vweird.f32 %v2005_v56 }
 0x423   : > { %vm1407_vm6 = vmor %vm1405_vm5, %vm1406_vm4 }
 0x424   : > { %v1378_v17 = vsel %vm1377_vm3, %v2003_v15, %v1374_v22  ;;  %v1401_v30 = vmul.f32 %v2005_v56, %v1400_v25 }
 0x425   : > { %v1449_v44 = vmul.f32 %v1378_v17, %v2762_v20  ;;  %v2801_v20 = vsub.f32 %v1277_v10, %v1301_v37  ;;  %v2813_v10 = vsub.f32 %v1278_v60, %v1302_v53 }
 0x426   : > { %v1402_v61 = vmul.f32 0.5, %v1401_v30 }
 0x427   : > { %v1461_v35 = vmul.f32 %v2787_v29, %v1449_v44  ;;  %v1317_v45 = vmul.f32 %v2801_v20, %v2801_v20  ;;  %v1318_v59 = vmul.f32 %v2813_v10, %v2813_v10 }
 0x428   : > { %v1403_v36 = vsub.f32 1.5, %v1402_v61 }
 0x429   : > { %v1473_v40 = vadd.f32 %v2792_v39, %v1461_v35  ;;  %v1330_v51 = vmul.f32 %v2769_v33, %v1317_v45  ;;  %v1331_v60 = vmul.f32 %v2769_v33, %v1318_v59 }
 0x42a   : > { %v1404_v41 = vmul.f32 %v2005_v56, %v1403_v36  ;;  %v1271_v42 = vpop.f32.mrf.mxu2 }
 0x42b   : > { %1481 = vst [vmem:[%s2435_s30] sm:$0xff] %v1473_v40  ;;  %v1272_v43 = vadd.f32 %v2672_v34, %v1271_v42 }
 0x42c   : > { %v1408_v46 = vsel %vm1407_vm6, %v2005_v56, %v1404_v41 }
 0x42d   : > { %v1452_v47 = vmul.f32 %v1408_v46, %v2771_v38  ;;  %v1282_v50 = vmax.f32 %v1272_v43, 0.0  ;;  %v2817_v38 = vsub.f32 %v1280_v12, %v1304_v55  ;;  %v1321_v12 = vmul.f32 %v2826_v23, %v2826_v23 }
 0x42f   : > { %v1464_v52 = vmul.f32 %v2787_v29, %v1452_v47  ;;  %1296 = vadd.xlane.f32.xlu0 %v1282_v50  ;;  %v1334_v62 = vmul.f32 %v2769_v33, %v1321_v12 }
 0x431   : > { %v1476_v57 = vadd.f32 %v2792_v39, %v1464_v52 }
 0x432   : > { %v1273_v54 = vpop.f32.mrf.mxu2 }
 0x433   : > { %1484 = vst [vmem:[%s2435_s30 + $0x18] sm:$0xff] %v1476_v57  ;;  %v1274_v3 = vadd.f32 %v2672_v34, %v1273_v54  ;;  %v1320_v34 = vmul.f32 %v2817_v38, %v2817_v38 }
 0x435   : > { %v1283_v7 = vmax.f32 %v1274_v3, 0.0  ;;  %v1333_v9 = vmul.f32 %v2769_v33, %v1320_v34 }
 0x437   : > { %1298 = vadd.xlane.f32.xlu1 %v1283_v7  ;;  %1339 = vadd.xlane.f32.xlu0 %v1330_v51 }
 0x43f   : > { %1341 = vadd.xlane.f32.xlu1 %v1331_v60  ;;  %1345 = vadd.xlane.f32.xlu0 %v1333_v9 }
 0x447   : > { %1347 = vadd.xlane.f32.xlu1 %v1334_v62 }
 0x4a2   : > { %v1297_v0 = vpop.xlane.xlu0 %1296 }
 0x4a3   : > { %v1306_v11 = vmul.f32 0.03125, %v1297_v0 }
 0x4a5   : > { %v2833_v1 = vsub.f32 %v1282_v50, %v1306_v11 }
 0x4a7   : > { %v1322_v19 = vmul.f32 %v2833_v1, %v2833_v1 }
 0x4a9   : > { %v1335_v26 = vmul.f32 %v2769_v33, %v1322_v19 }
 0x4aa   : > { %v1299_v49 = vpop.xlane.xlu1 %1298  ;;  %v1340_v5 = vpop.xlane.xlu0 %1339 }
 0x4ab   : > { %v1307_v6 = vmul.f32 0.03125, %v1299_v49  ;;  %v1354_v4 = vmul.f32 0.03125, %v1340_v5  ;;  %1349 = vadd.xlane.f32.xlu2 %v1335_v26 }
 0x4ad   : > { %v2838_v63 = vsub.f32 %v1283_v7, %v1307_v6  ;;  %v1362_v24 = vadd.f32 1e-05, %v1354_v4 }
 0x4af   : > { %2006 = vrsqrt.f32 %v1362_v24  ;;  %v1323_v31 = vmul.f32 %v2838_v63, %v2838_v63  ;;  %vm1385_vm8 = vweird.f32 %v1362_v24 }
 0x4b1   : > { %v1336_v8 = vmul.f32 %v2769_v33, %v1323_v31 }
 0x4b2   : > { %v1342_v13 = vpop.xlane.xlu1 %1341  ;;  %v1346_v2 = vpop.xlane.xlu0 %1345 }
 0x4b3   : > { %v1355_v27 = vmul.f32 0.03125, %v1342_v13  ;;  %v1357_v14 = vmul.f32 0.03125, %v1346_v2  ;;  %1351 = vadd.xlane.f32.xlu0 %v1336_v8 }
 0x4b5   : > { %v2007_v15 = vpop.eup %2006  ;;  %v1363_v16 = vadd.f32 1e-05, %v1355_v27  ;;  %v1365_v48 = vadd.f32 1e-05, %v1357_v14 }
 0x4b6   : > { %v1380_v18 = vmul.f32 %v2007_v15, %v1362_v24  ;;  %vm1386_vm7 = vweird.f32 %v2007_v15 }
 0x4b7   : > { %2008 = vrsqrt.f32 %v1363_v16  ;;  %vm1387_vm9 = vmor %vm1385_vm8, %vm1386_vm7  ;;  %vm1395_vm12 = vweird.f32 %v1363_v16  ;;  %vm1415_vm14 = vweird.f32 %v1365_v48 }
 0x4b8   : > { %v1381_v21 = vmul.f32 %v2007_v15, %v1380_v18  ;;  %2010 = vrsqrt.f32 %v1365_v48 }
 0x4ba   : > { %v1382_v28 = vmul.f32 0.5, %v1381_v21  ;;  %v1348_v56 = vpop.xlane.xlu1 %1347 }
 0x4bb   : > { %v1358_v22 = vmul.f32 0.03125, %v1348_v56 }
 0x4bc   : > { %v1383_v25 = vsub.f32 1.5, %v1382_v28 }
 0x4bd   : > { %v2009_v17 = vpop.eup %2008  ;;  %v1366_v30 = vadd.f32 1e-05, %v1358_v22 }
 0x4be   : > { %v2011_v33 = vpop.eup %2010  ;;  %v1384_v44 = vmul.f32 %v2007_v15, %v1383_v25  ;;  %v1390_v32 = vmul.f32 %v2009_v17, %v1363_v16  ;;  %vm1396_vm10 = vweird.f32 %v2009_v17 }
 0x4bf   : > { %v1410_v61 = vmul.f32 %v2011_v33, %v1365_v48  ;;  %2012 = vrsqrt.f32 %v1366_v30  ;;  %vm1416_vm11 = vweird.f32 %v2011_v33  ;;  %vm1397_vm13 = vmor %vm1395_vm12, %vm1396_vm10  ;;  %vm1425_vm1 = vweird.f32 %v1366_v30 }
 0x4c0   : > { %v1388_v35 = vsel %vm1387_vm9, %v2007_v15, %v1384_v44  ;;  %v1391_v36 = vmul.f32 %v2009_v17, %v1390_v32  ;;  %vm1417_vm15 = vmor %vm1415_vm14, %vm1416_vm11 }
 0x4c1   : > { %v1450_v37 = vmul.f32 %v1388_v35, %v2801_v20  ;;  %v1411_v40 = vmul.f32 %v2011_v33, %v1410_v61 }
 0x4c2   : > { %v1392_v41 = vmul.f32 0.5, %v1391_v36 }
 0x4c3   : > { %v1462_v42 = vmul.f32 %v2787_v29, %v1450_v37  ;;  %v1412_v43 = vmul.f32 0.5, %v1411_v40 }
 0x4c4   : > { %v1393_v46 = vsub.f32 1.5, %v1392_v41 }
 0x4c5   : > { %v2013_v47 = vpop.eup %2012  ;;  %v1474_v50 = vadd.f32 %v2792_v39, %v1462_v42  ;;  %v1413_v52 = vsub.f32 1.5, %v1412_v43 }
 0x4c6   : > { %v1394_v53 = vmul.f32 %v2009_v17, %v1393_v46  ;;  %v1420_v55 = vmul.f32 %v2013_v47, %v1366_v30  ;;  %vm1426_vm0 = vweird.f32 %v2013_v47 }
 0x4c7   : > { %1482 = vst [vmem:[%s2435_s30 + $0x8] sm:$0xff] %v1474_v50  ;;  %v1414_v57 = vmul.f32 %v2011_v33, %v1413_v52  ;;  %vm1427_vm2 = vmor %vm1425_vm1, %vm1426_vm0 }
 0x4c8   : > { %v1398_v20 = vsel %vm1397_vm13, %v2009_v17, %v1394_v53  ;;  %v1421_v45 = vmul.f32 %v2013_v47, %v1420_v55 }
 0x4c9   : > { %v1451_v54 = vmul.f32 %v1398_v20, %v2813_v10  ;;  %v1418_v3 = vsel %vm1417_vm15, %v2011_v33, %v1414_v57 }
 0x4ca   : > { %v1453_v7 = vmul.f32 %v1418_v3, %v2817_v38  ;;  %v1422_v51 = vmul.f32 0.5, %v1421_v45 }
 0x4cb   : > { %v1463_v58 = vmul.f32 %v2787_v29, %v1451_v54 }
 0x4cc   : > { %v1465_v59 = vmul.f32 %v2787_v29, %v1453_v7  ;;  %v1423_v34 = vsub.f32 1.5, %v1422_v51 }
 0x4cd   : > { %v1475_v60 = vadd.f32 %v2792_v39, %v1463_v58 }
 0x4ce   : > { %v1477_v9 = vadd.f32 %v2792_v39, %v1465_v59  ;;  %v1424_v12 = vmul.f32 %v2013_v47, %v1423_v34 }
 0x4cf   : > { %1483 = vst [vmem:[%s2435_s30 + $0x10] sm:$0xff] %v1475_v60 }
 0x4d0   : > { %1485 = vst [vmem:[%s2435_s30 + $0x20] sm:$0xff] %v1477_v9  ;;  %v1428_v10 = vsel %vm1427_vm2, %v2013_v47, %v1424_v12 }
 0x4d1   : > { %v1454_v38 = vmul.f32 %v1428_v10, %v2826_v23 }
 0x4d3   : > { %v1466_v62 = vmul.f32 %v2787_v29, %v1454_v38 }
 0x4d5   : > { %v1478_v0 = vadd.f32 %v2792_v39, %v1466_v62 }
 0x4d7   : > { %1486 = vst [vmem:[%s2435_s30 + $0x28] sm:$0xff] %v1478_v0 }
 0x51e   : > { %v1350_v11 = vpop.xlane.xlu2 %1349 }
 0x51f   : > { %v1359_v19 = vmul.f32 0.03125, %v1350_v11 }
 0x521   : > { %v1367_v26 = vadd.f32 1e-05, %v1359_v19 }
 0x523   : > { %2014 = vrsqrt.f32 %v1367_v26  ;;  %vm1435_vm4 = vweird.f32 %v1367_v26 }
 0x526   : > { %v1352_v49 = vpop.xlane.xlu0 %1351 }
 0x527   : > { %v1360_v5 = vmul.f32 0.03125, %v1352_v49 }
 0x529   : > { %v2015_v6 = vpop.eup %2014  ;;  %v1368_v4 = vadd.f32 1e-05, %v1360_v5 }
 0x52a   : > { %v1430_v24 = vmul.f32 %v2015_v6, %v1367_v26  ;;  %vm1436_vm3 = vweird.f32 %v2015_v6 }
 0x52b   : > { %2016 = vrsqrt.f32 %v1368_v4  ;;  %vm1437_vm5 = vmor %vm1435_vm4, %vm1436_vm3  ;;  %vm1445_vm7 = vweird.f32 %v1368_v4 }
 0x52c   : > { %v1431_v31 = vmul.f32 %v2015_v6, %v1430_v24 }
 0x52e   : > { %v1432_v8 = vmul.f32 0.5, %v1431_v31 }
 0x530   : > { %v1433_v13 = vsub.f32 1.5, %v1432_v8 }
 0x531   : > { %v2017_v23 = vpop.eup %2016 }
 0x532   : > { %v1434_v2 = vmul.f32 %v2015_v6, %v1433_v13  ;;  %v1440_v27 = vmul.f32 %v2017_v23, %v1368_v4  ;;  %vm1446_vm6 = vweird.f32 %v2017_v23 }
 0x533   : > { %vm1447_vm8 = vmor %vm1445_vm7, %vm1446_vm6 }
 0x534   : > { %v1438_v14 = vsel %vm1437_vm5, %v2015_v6, %v1434_v2  ;;  %v1441_v15 = vmul.f32 %v2017_v23, %v1440_v27 }
 0x535   : > { %v1455_v16 = vmul.f32 %v1438_v14, %v2833_v1 }
 0x536   : > { %v1442_v48 = vmul.f32 0.5, %v1441_v15 }
 0x537   : > { %v1467_v18 = vmul.f32 %v2787_v29, %v1455_v16 }
 0x538   : > { %v1443_v21 = vsub.f32 1.5, %v1442_v48 }
 0x539   : > { %v1479_v28 = vadd.f32 %v2792_v39, %v1467_v18 }
 0x53a   : > { %v1444_v56 = vmul.f32 %v2017_v23, %v1443_v21 }
 0x53b   : > { %1487 = vst [vmem:[%s2435_s30 + $0x30] sm:$0xff] %v1479_v28 }
 0x53c   : > { %v1448_v1 = vsel %vm1447_vm8, %v2017_v23, %v1444_v56 }
 0x53d   : > { %v1456_v22 = vmul.f32 %v1448_v1, %v2838_v63 }
 0x53f   : > { %v1468_v25 = vmul.f32 %v2787_v29, %v1456_v22 }
 0x541   : > { %v1480_v17 = vadd.f32 %v2792_v39, %v1468_v25 }
 0x543   : > { %1488 = vst [vmem:[%s2435_s30 + $0x38] sm:$0xff] %v1480_v17 }
 0x544   : > { %2165 = shalt.err (!%p2162_p3)
}
 0x545   : > { %s2237_s20 = smov 128   ;;  %s2238_s30 = smov 8  }
 0x546   : > { %1848 = dma.vmem_to_hbm [thread:$0]  (%p2393_p5), %s1506_s27, 1024, %s1508_s12, %s1490_s5, %s2237_s20, %s2237_s20, %s2238_s30  }
 0x547 PF: > { %s2957_s15 = sld [smem:[#allocation17_spill]]  ;;  %p1865_p7 = pnand %p1630_p11, %p2338_p6 }
 0x548   : > { %s2959_s28 = sld [smem:[#allocation18_spill]] }
 0x549   : > { %p1866_p9 = pneg %p1865_p7 }
 0x54d   : > { %s1522_s29 = sand.u32 1, %s2957_s15  }
 0x54e   : > { %s1523_s18 = scalar_lea.sflag [#allocation6], %s1522_s29 }
 0x54f   : > { %2203 = dma.done.wait (%p1866_p9), %s1523_s18, 1024  }
 0x550   : > { %2205 = vsyncadd (%p1866_p9), %s1523_s18, 4294966272  ;;  %s27_s14 = sadd.s32 1, %s2959_s28   ;;  %s2960_s26 = sld [smem:[#allocation20_spill]] }
 0x551   : > { %p24_p2 = scmp.ge.s32.totalorder %s27_s14, 4   ;;  %s2961_s30 = smov %s2212_s10 }
 0x552   : > { %s2962_s10 = smov %s2216_s11  ;;  %s2963_s11 = smov %s2402_s22 }
 0x553   : > { %s2964_s12 = smov %s2224_s13  ;;  %26 = sbr.rel (!%p24_p2) target bundleno = 12 (0xc), region = 123 }
 0x556   : > { %s2965_s13 = smov %s2960_s26 }
 0x558   :  { %1529 = vsyncpa [#allocation5], 1 }
 0x559   :  { %1531 = vsyncpa [#allocation5 + $0x1], 1 }
 0x55a   :  { %1532 = vsyncpa [#allocation8], 1 }
 0x55b   :  { %1533 = vsyncpa [#allocation11], 1 }
 0x55c   :  { %1534 = vsyncpa [#allocation6], 1 }
 0x55d   :  { %1536 = vsyncpa [#allocation6 + $0x1], 1 }

</bundles_post_ra>
